<compile_context>
chip_gen: v6e
topology: v6e:2x2x1
jax: 0.10.0
libtpu: 0.0.40
codegen_flags: <defaults>
</compile_context>

<pallas_src>
import functools

import numpy as np

import jax
import jax.numpy as jnp
from jax.experimental import pallas as pl
from jax.experimental.pallas import tpu as pltpu

_VMEM_LIMIT = 32 * 1024 * 1024   # well below scoped limits on v5e/v6e/v7x


def _round_up(x, m):
    return (x + m - 1) // m * m


# ---------------------------------------------------------------------------
# Pallas kernels
# ---------------------------------------------------------------------------
def _conv_pool_kernel(x_ref, w_ref, b_ref, o_ref, *, offs):
    """Fused conv(5x5, pad 2) + bias + ReLU + maxpool(2x2) for a batch tile.

    x_ref: (B, S, Cs)      bf16  space-to-depth padded slab (Cs = 4*Cin), or
                                 pre-built patches for conv1 (offs == (0,)).
    w_ref: (len(offs)*Cs, 4*Co) bf16  packed weights; output cols are the 4
                                 pooling phases (dv, du) major, Co minor.
    b_ref: (1, Co)         f32   bias.
    o_ref: (B, M, Co)      bf16  pooled output; row m = ho*Sw + wo.
    """
    bsz, m_len, co = o_ref.shape
    # Build the im2col patch matrix from 9 contiguous tap slices of the slab
    # (single full-depth contraction -> MXU gets K = 36*Cin in one dot).
    pieces = [x_ref[:, off:off + m_len, :] for off in offs]
    patches = pieces[0] if len(pieces) == 1 else jnp.concatenate(pieces, axis=-1)
    k = patches.shape[-1]
    acc = jnp.dot(patches.reshape(bsz * m_len, k), w_ref[...],
                  preferred_element_type=jnp.float32)           # (B*M, 4*Co)
    # 2x2 max-pool == max over the 4 phase lane-groups (pure VPU).
    pooled = jnp.maximum(jnp.maximum(acc[:, 0:co], acc[:, co:2 * co]),
                         jnp.maximum(acc[:, 2 * co:3 * co], acc[:, 3 * co:4 * co]))
    y = jnp.maximum(pooled + b_ref[...], 0.0)                   # bias + ReLU
    o_ref[...] = y.astype(o_ref.dtype).reshape(bsz, m_len, co)


def conv_pool(slab, wmat, bias, *, offs, m_len, b_tile):
    """slab: (Nb, S, Cs) bf16 -> (Nb, m_len, Co) bf16 pooled output."""
    nb, s, cs = slab.shape
    k, n4 = wmat.shape
    co = bias.shape[1]
    assert n4 == 4 * co and k == len(offs) * cs and nb % b_tile == 0
    kernel = functools.partial(_conv_pool_kernel, offs=tuple(offs))
    return pl.pallas_call(
        kernel,
        out_shape=jax.ShapeDtypeStruct((nb, m_len, co), jnp.bfloat16),
        grid=(nb // b_tile,),
        in_specs=[
            pl.BlockSpec((b_tile, s, cs), lambda n: (n, 0, 0)),
            pl.BlockSpec((k, n4), lambda n: (0, 0)),
            pl.BlockSpec((1, co), lambda n: (0, 0)),
        ],
        out_specs=pl.BlockSpec((b_tile, m_len, co), lambda n: (n, 0, 0)),
        compiler_params=pltpu.CompilerParams(
            dimension_semantics=("parallel",),
            vmem_limit_bytes=_VMEM_LIMIT),
    )(slab, wmat, bias)


def _fc_core(x_ref, w7_ref, b7_ref, w8_ref, b8_ref):
    h = jnp.dot(x_ref[...], w7_ref[...], preferred_element_type=jnp.float32)
    h = jnp.maximum(h + b7_ref[...], 0.0)
    out = jnp.dot(h.astype(jnp.bfloat16), w8_ref[...],
                  preferred_element_type=jnp.float32) + b8_ref[...]
    return h, out


def _fc_logits_kernel(x_ref, w7_ref, b7_ref, w8_ref, b8_ref, o_ref):
    _, out = _fc_core(x_ref, w7_ref, b7_ref, w8_ref, b8_ref)
    o_ref[...] = out


def _fc_logits_hidden_kernel(x_ref, w7_ref, b7_ref, w8_ref, b8_ref, o_ref, h_ref):
    h, out = _fc_core(x_ref, w7_ref, b7_ref, w8_ref, b8_ref)
    o_ref[...] = out
    h_ref[...] = h


def fc_fused(x_bf16, w7, b7, w8, b8, *, want_hidden):
    """Fused fc7+ReLU+fc8.  x:(M,288) bf16 -> logits (M,128) f32 [+ h (M,512)]."""
    m, k = x_bf16.shape
    hd = w7.shape[1]
    no = w8.shape[1]
    tile_m = 512 if m >= 512 else _round_up(max(m, 1), 8)
    mp = _round_up(m, tile_m)
    if mp != m:
        x_bf16 = jnp.pad(x_bf16, ((0, mp - m), (0, 0)))
    in_specs = [
        pl.BlockSpec((tile_m, k), lambda i: (i, 0)),
        pl.BlockSpec((k, hd), lambda i: (0, 0)),
        pl.BlockSpec((1, hd), lambda i: (0, 0)),
        pl.BlockSpec((hd, no), lambda i: (0, 0)),
        pl.BlockSpec((1, no), lambda i: (0, 0)),
    ]
    cp = pltpu.CompilerParams(dimension_semantics=("parallel",),
                              vmem_limit_bytes=_VMEM_LIMIT)
    if want_hidden:
        out, h = pl.pallas_call(
            _fc_logits_hidden_kernel,
            out_shape=(jax.ShapeDtypeStruct((mp, no), jnp.float32),
                       jax.ShapeDtypeStruct((mp, hd), jnp.float32)),
            grid=(mp // tile_m,),
            in_specs=in_specs,
            out_specs=(pl.BlockSpec((tile_m, no), lambda i: (i, 0)),
                       pl.BlockSpec((tile_m, hd), lambda i: (i, 0))),
            compiler_params=cp,
        )(x_bf16, w7, b7, w8, b8)
        return out[:m], h[:m]
    out = pl.pallas_call(
        _fc_logits_kernel,
        out_shape=jax.ShapeDtypeStruct((mp, no), jnp.float32),
        grid=(mp // tile_m,),
        in_specs=in_specs,
        out_specs=pl.BlockSpec((tile_m, no), lambda i: (i, 0)),
        compiler_params=cp,
    )(x_bf16, w7, b7, w8, b8)
    return out[:m], None


# ---------------------------------------------------------------------------
# Parameter / input preparation (done once, not per forward)
# ---------------------------------------------------------------------------
def _pack_conv_weights(w_oihw, bias):
    """PyTorch (Co,Ci,5,5) -> (36*Ci, 4*Co) matrix for the fused stride-2
    "6x6 conv + pool" over the space-to-depth slab.

    Row k = ((a*3+b)*4 + (dh*2+dw))*Ci + ci   (tap (a,b) of the 3x3 s2d conv,
                                               s2d sub-pixel (dh,dw), channel ci)
    Col n = (dv*2+du)*Co + co                 (pooling phase (dv,du), channel co)
    Entry = w[co, ci, 2a+dh-dv, 2b+dw-du] when that 5x5 index is in range.
    """
    w = np.asarray(w_oihw, np.float32)
    co, ci = w.shape[0], w.shape[1]
    wmat = np.zeros((36 * ci, 4 * co), np.float32)
    for a in range(3):
        for b in range(3):
            for dh in range(2):
                for dw in range(2):
                    krow = ((a * 3 + b) * 4 + (dh * 2 + dw)) * ci
                    for dv in range(2):
                        for du in range(2):
                            kh = 2 * a + dh - dv
                            kw = 2 * b + dw - du
                            if 0 <= kh < 5 and 0 <= kw < 5:
                                ncol = (dv * 2 + du) * co
                                wmat[krow:krow + ci, ncol:ncol + co] = w[:, :, kh, kw].T
    return (jnp.asarray(wmat, jnp.bfloat16),
            jnp.asarray(np.asarray(bias, np.float32).reshape(1, co)))


def prepare_params(p):
    """One-time conversion of PyTorch-layout params into kernel operands."""
    w1, b1 = _pack_conv_weights(p["conv1_w"], p["conv1_b"])
    w2, b2 = _pack_conv_weights(p["conv3_w"], p["conv3_b"])
    w3, b3 = _pack_conv_weights(p["conv5_w"], p["conv5_b"])
    # fc7 consumes spatial-major (h*3+w)*32+c features; fold torch's
    # channel-major flatten into the weight row order.
    fc7_w = np.asarray(p["fc7_w"], np.float32).reshape(512, 32, 9)       # (o,c,s)
    fc7_w = np.transpose(fc7_w, (2, 1, 0)).reshape(288, 512)             # (s*32+c, o)
    fc8_wt = np.zeros((512, 128), np.float32)
    fc8_wt[:, :10] = np.asarray(p["fc8_w"], np.float32).T
    fc8_b = np.zeros((1, 128), np.float32)
    fc8_b[0, :10] = np.asarray(p["fc8_b"], np.float32)
    return {
        "w1": w1, "b1": b1, "w2": w2, "b2": b2, "w3": w3, "b3": b3,
        "fc7_w": jnp.asarray(fc7_w, jnp.bfloat16),
        "fc7_b": jnp.asarray(np.asarray(p["fc7_b"], np.float32).reshape(1, 512)),
        "fc8_w": jnp.asarray(fc8_wt, jnp.bfloat16),
        "fc8_b": jnp.asarray(fc8_b),
    }


def init_params(key):
    """Deterministic PyTorch-default-like uniform(-1/sqrt(fan_in), ...) init."""
    ks = jax.random.split(key, 10)

    def u(k, shape, fan_in):
        bound = 1.0 / jnp.sqrt(float(fan_in))
        return jax.random.uniform(k, shape, jnp.float32, -bound, bound)

    return {
        "conv1_w": u(ks[0], (16, 1, 5, 5), 1 * 25),
        "conv1_b": u(ks[1], (16,), 1 * 25),
        "conv3_w": u(ks[2], (32, 16, 5, 5), 16 * 25),
        "conv3_b": u(ks[3], (32,), 16 * 25),
        "conv5_w": u(ks[4], (32, 32, 5, 5), 32 * 25),
        "conv5_b": u(ks[5], (32,), 32 * 25),
        "fc7_w": u(ks[6], (512, 32 * 3 * 3), 32 * 3 * 3),
        "fc7_b": u(ks[7], (512,), 32 * 3 * 3),
        "fc8_w": u(ks[8], (10, 512), 512),
        "fc8_b": u(ks[9], (10,), 512),
    }


def _s2d_slab(x_nhwc, *, pad_b, pad_r):
    """(N,H,W,C) -> zero pad (top2/left2/bottom pad_b/right pad_r), 2x2
    space-to-depth, flatten -> (N, (Hp/2)*(Wp/2), 4C) bf16."""
    xp = jnp.pad(x_nhwc, ((0, 0), (2, pad_b), (2, pad_r), (0, 0)))
    n, hp, wp, c = xp.shape
    xs = xp.reshape(n, hp // 2, 2, wp // 2, 2, c)
    xs = jnp.transpose(xs, (0, 1, 3, 2, 4, 5))
    return xs.reshape(n, (hp // 2) * (wp // 2), 4 * c).astype(jnp.bfloat16)


# ---------------------------------------------------------------------------
# Forward graph (matches FMNISTNet.forward)
# ---------------------------------------------------------------------------
def fmnistnet_forward(prep, x_nchw, layer=None):
    """x_nchw: (N, 1, 28, 28) float32."""
    n = x_nchw.shape[0]
    b_tile = n if n < 8 else 8
    nb = _round_up(n, b_tile)
    x = jnp.transpose(x_nchw, (0, 2, 3, 1)).astype(jnp.float32)        # NHWC
    if nb != n:
        x = jnp.pad(x, ((0, nb - n), (0, 0), (0, 0), (0, 0)))

    # Stage 1: 28x28x1 -> 14x14x16   (Sh=17, Sw=16, M=14*16=224, K=36)
    slab1 = _s2d_slab(x, pad_b=4, pad_r=2)                              # (nb,272,4)
    offs1 = tuple(a * 16 + b for a in range(3) for b in range(3))
    pat1 = jnp.concatenate([slab1[:, o:o + 224, :] for o in offs1], axis=-1)
    y1 = conv_pool(pat1, prep["w1"], prep["b1"], offs=(0,), m_len=224,
                   b_tile=b_tile)                                       # (nb,224,16)
    y1 = y1.reshape(nb, 14, 16, 16)[:, :, :14, :]                       # (nb,14,14,16)

    # Stage 2: 14x14x16 -> 7x7x32    (Sh=10, Sw=9, M=64, K=576)
    slab2 = _s2d_slab(y1, pad_b=4, pad_r=2)                             # (nb,90,64)
    offs2 = tuple(a * 9 + b for a in range(3) for b in range(3))
    y2 = conv_pool(slab2, prep["w2"], prep["b2"], offs=offs2, m_len=64,
                   b_tile=b_tile)                                       # (nb,64,32)
    y2 = y2[:, :63, :].reshape(nb, 7, 9, 32)[:, :, :7, :]               # (nb,7,7,32)

    # Stage 3: 7x7x32 -> 3x3x32      (Sh=8, Sw=6, M=32, K=1152)
    slab3 = _s2d_slab(y2, pad_b=7, pad_r=3)                             # (nb,48,128)
    offs3 = tuple(a * 6 + b for a in range(3) for b in range(3))
    y3 = conv_pool(slab3, prep["w3"], prep["b3"], offs=offs3, m_len=32,
                   b_tile=b_tile)                                       # (nb,32,32)
    feats = y3[:, :18, :].reshape(nb, 3, 6, 32)[:, :, :3, :]            # (nb,3,3,32)

    x_fea_k = feats.reshape(nb, 288)                                    # spatial-major
    want_hidden = (layer is not None) and (layer != -1)
    logits_pad, h = fc_fused(x_fea_k, prep["fc7_w"], prep["fc7_b"],
                             prep["fc8_w"], prep["fc8_b"],
                             want_hidden=want_hidden)
    output = logits_pad[:n, :10]
    if layer is None:
        return output
    if layer == -1:
        # torch.flatten(x, 1) on NCHW is channel-major.
        x_fea = jnp.transpose(feats[:n], (0, 3, 1, 2)).reshape(n, 288)
        return output, x_fea.astype(jnp.float32)
    return output, h[:n]


# ---------------------------------------------------------------------------
# Pure-JAX f32 reference (correctness check only)
# ---------------------------------------------------------------------------
def fmnistnet_reference(params, x_nchw):
    def conv(x, w, b):
        y = jax.lax.conv_general_dilated(
            x, w, window_strides=(1, 1), padding=((2, 2), (2, 2)),
            dimension_numbers=("NCHW", "OIHW", "NCHW"))
        return jax.nn.relu(y + b.reshape(1, -1, 1, 1))

    def pool(x):
        return jax.lax.reduce_window(x, -jnp.inf, jax.lax.max,
                                     (1, 1, 2, 2), (1, 1, 2, 2), "VALID")

    x = pool(conv(x_nchw, params["conv1_w"], params["conv1_b"]))
    x = pool(conv(x, params["conv3_w"], params["conv3_b"]))
    x = pool(conv(x, params["conv5_w"], params["conv5_b"]))
    fea = x.reshape(x.shape[0], -1)
    h = jax.nn.relu(fea @ params["fc7_w"].T + params["fc7_b"])
    return h @ params["fc8_w"].T + params["fc8_b"], fea


if __name__ == "__main__":
    root = jax.random.PRNGKey(0)
    k_params, k_x = jax.random.split(root)
    params = init_params(k_params)
    prep = prepare_params(params)
    # Spatial size is fixed at 28x28 by fc7 (32*3*3); small batch of 2.
    x = jax.random.normal(k_x, (2, 1, 28, 28), dtype=jnp.float32)

    fwd = jax.jit(fmnistnet_forward, static_argnames=("layer",))
    out = jax.block_until_ready(fwd(prep, x))
    assert out.shape == (2, 10), out.shape

    ref, ref_fea = fmnistnet_reference(params, x)
    ref = jax.block_until_ready(ref)
    # bf16 matmul operands (f32 accumulation) => relaxed tolerance vs f32 ref.
    assert jnp.allclose(out, ref, rtol=5e-2, atol=5e-2), (
        "max abs diff = %f" % float(jnp.max(jnp.abs(out - ref))))

    # Exercise the feature-returning and hidden-returning branches once.
    out2, fea = fwd(prep, x, layer=-1)
    jax.block_until_ready((out2, fea))
    assert fea.shape == (2, 32 * 3 * 3)
    assert jnp.allclose(fea, ref_fea, rtol=5e-2, atol=5e-2), (
        "max abs feature diff = %f" % float(jnp.max(jnp.abs(fea - ref_fea))))

    out3, hid = fwd(prep, x, layer=1)
    jax.block_until_ready((out3, hid))
    assert hid.shape == (2, 512)

    print("KERNEL_OK")
</pallas_src>

<mosaic_0001>
module attributes {stable_mosaic.version = 11 : i64} {
  func.func @_conv_pool_kernel(%arg0: i32, %arg1: memref<2x224x36xbf16, #tpu.memory_space<vmem>>, %arg2: memref<36x64xbf16, #tpu.memory_space<vmem>>, %arg3: memref<1x16xf32, #tpu.memory_space<vmem>>, %arg4: memref<2x224x16xbf16, #tpu.memory_space<vmem>>) attributes {dimension_semantics = [#tpu.dimension_semantics<parallel>], iteration_bounds = array<i64: 1>, scalar_prefetch = 0 : i64, scratch_operands = 0 : i64, tpu.core_type = #tpu.core_type<tc>, window_params = [{transform_indices = @transform_0, window_bounds = array<i64: 2, 224, 36>}, {pipeline_mode = #tpu.pipeline_mode<synchronous>, transform_indices = @transform_1, window_bounds = array<i64: 36, 64>}, {pipeline_mode = #tpu.pipeline_mode<synchronous>, transform_indices = @transform_2, window_bounds = array<i64: 1, 16>}, {transform_indices = @transform_3, window_bounds = array<i64: 2, 224, 16>}]} {
    %c0 = arith.constant 0 : index
    %c0_0 = arith.constant 0 : index
    %c0_1 = arith.constant 0 : index
    %0 = vector.load %arg1[%c0, %c0_0, %c0_1] : memref<2x224x36xbf16, #tpu.memory_space<vmem>>, vector<2x224x36xbf16>
    %1 = vector.shape_cast %0 : vector<2x224x36xbf16> to vector<448x36xbf16>
    %c0_2 = arith.constant 0 : index
    %c0_3 = arith.constant 0 : index
    %2 = vector.load %arg2[%c0_2, %c0_3] : memref<36x64xbf16, #tpu.memory_space<vmem>>, vector<36x64xbf16>
    %cst = arith.constant dense<0.000000e+00> : vector<448x64xf32>
    %3 = tpu.matmul %1, %2, %cst {dimension_numbers = #tpu.dot_dimension_numbers<[1], [0], [0], [1], [0, 0, 1, 1], [], []>} : vector<448x36xbf16>, vector<36x64xbf16>, vector<448x64xf32> -> vector<448x64xf32>
    %4 = vector.extract_strided_slice %3 {offsets = [0, 0], sizes = [448, 16], strides = [1, 1]} : vector<448x64xf32> to vector<448x16xf32>
    %5 = vector.extract_strided_slice %3 {offsets = [0, 16], sizes = [448, 16], strides = [1, 1]} : vector<448x64xf32> to vector<448x16xf32>
    %6 = arith.maximumf %4, %5 : vector<448x16xf32>
    %7 = vector.extract_strided_slice %3 {offsets = [0, 32], sizes = [448, 16], strides = [1, 1]} : vector<448x64xf32> to vector<448x16xf32>
    %8 = vector.extract_strided_slice %3 {offsets = [0, 48], sizes = [448, 16], strides = [1, 1]} : vector<448x64xf32> to vector<448x16xf32>
    %9 = arith.maximumf %7, %8 : vector<448x16xf32>
    %10 = arith.maximumf %6, %9 : vector<448x16xf32>
    %c0_4 = arith.constant 0 : index
    %c0_5 = arith.constant 0 : index
    %11 = vector.load %arg3[%c0_4, %c0_5] : memref<1x16xf32, #tpu.memory_space<vmem>>, vector<1x16xf32>
    %12 = vector.broadcast %11 : vector<1x16xf32> to vector<448x16xf32>
    %13 = arith.addf %10, %12 : vector<448x16xf32>
    %cst_6 = arith.constant 0.000000e+00 : f32
    %14 = vector.broadcast %cst_6 : f32 to vector<448x16xf32>
    %15 = arith.maximumf %13, %14 : vector<448x16xf32>
    %16 = arith.truncf %15 : vector<448x16xf32> to vector<448x16xbf16>
    %17 = vector.shape_cast %16 : vector<448x16xbf16> to vector<2x224x16xbf16>
    %c0_7 = arith.constant 0 : index
    %c0_8 = arith.constant 0 : index
    %c0_9 = arith.constant 0 : index
    %18 = vector.load %arg4[%c0_7, %c0_8, %c0_9] : memref<2x224x16xbf16, #tpu.memory_space<vmem>>, vector<2x224x16xbf16>
    tpu.vector_store %arg4[%c0_7, %c0_8, %c0_9], %17 {strides = array<i32>} : memref<2x224x16xbf16, #tpu.memory_space<vmem>>, vector<2x224x16xbf16>,
    return
  }
  func.func @transform_0(%arg0: i32) -> (i32, i32, i32) {
    %c0_i32 = arith.constant 0 : i32
    %c0_i32_0 = arith.constant 0 : i32
    %c0_i32_1 = arith.constant 0 : i32
    return %arg0, %c0_i32, %c0_i32_0 : i32, i32, i32
  }
  func.func @transform_1(%arg0: i32) -> (i32, i32) {
    %c0_i32 = arith.constant 0 : i32
    %c0_i32_0 = arith.constant 0 : i32
    %c0_i32_1 = arith.constant 0 : i32
    return %c0_i32, %c0_i32_0 : i32, i32
  }
  func.func @transform_2(%arg0: i32) -> (i32, i32) {
    %c0_i32 = arith.constant 0 : i32
    %c0_i32_0 = arith.constant 0 : i32
    %c0_i32_1 = arith.constant 0 : i32
    return %c0_i32, %c0_i32_0 : i32, i32
  }
  func.func @transform_3(%arg0: i32) -> (i32, i32, i32) {
    %c0_i32 = arith.constant 0 : i32
    %c0_i32_0 = arith.constant 0 : i32
    %c0_i32_1 = arith.constant 0 : i32
    return %arg0, %c0_i32, %c0_i32_0 : i32, i32, i32
  }
}

module attributes {stable_mosaic.version = 11 : i64} {
  func.func @_conv_pool_kernel(%arg0: i32, %arg1: memref<2x90x64xbf16, #tpu.memory_space<vmem>>, %arg2: memref<576x128xbf16, #tpu.memory_space<vmem>>, %arg3: memref<1x32xf32, #tpu.memory_space<vmem>>, %arg4: memref<2x64x32xbf16, #tpu.memory_space<vmem>>) attributes {dimension_semantics = [#tpu.dimension_semantics<parallel>], iteration_bounds = array<i64: 1>, scalar_prefetch = 0 : i64, scratch_operands = 0 : i64, tpu.core_type = #tpu.core_type<tc>, window_params = [{transform_indices = @transform_0, window_bounds = array<i64: 2, 90, 64>}, {pipeline_mode = #tpu.pipeline_mode<synchronous>, transform_indices = @transform_1, window_bounds = array<i64: 576, 128>}, {pipeline_mode = #tpu.pipeline_mode<synchronous>, transform_indices = @transform_2, window_bounds = array<i64: 1, 32>}, {transform_indices = @transform_3, window_bounds = array<i64: 2, 64, 32>}]} {
    %c0 = arith.constant 0 : index
    %c0_0 = arith.constant 0 : index
    %c0_1 = arith.constant 0 : index
    %0 = vector.load %arg1[%c0, %c0_0, %c0_1] : memref<2x90x64xbf16, #tpu.memory_space<vmem>>, vector<2x64x64xbf16>
    %c0_2 = arith.constant 0 : index
    %c1 = arith.constant 1 : index
    %c0_3 = arith.constant 0 : index
    %1 = vector.load %arg1[%c0_2, %c1, %c0_3] : memref<2x90x64xbf16, #tpu.memory_space<vmem>>, vector<2x64x64xbf16>
    %c0_4 = arith.constant 0 : index
    %c2 = arith.constant 2 : index
    %c0_5 = arith.constant 0 : index
    %2 = vector.load %arg1[%c0_4, %c2, %c0_5] : memref<2x90x64xbf16, #tpu.memory_space<vmem>>, vector<2x64x64xbf16>
    %c0_6 = arith.constant 0 : index
    %c9 = arith.constant 9 : index
    %c0_7 = arith.constant 0 : index
    %3 = vector.load %arg1[%c0_6, %c9, %c0_7] : memref<2x90x64xbf16, #tpu.memory_space<vmem>>, vector<2x64x64xbf16>
    %c0_8 = arith.constant 0 : index
    %c10 = arith.constant 10 : index
    %c0_9 = arith.constant 0 : index
    %4 = vector.load %arg1[%c0_8, %c10, %c0_9] : memref<2x90x64xbf16, #tpu.memory_space<vmem>>, vector<2x64x64xbf16>
    %c0_10 = arith.constant 0 : index
    %c11 = arith.constant 11 : index
    %c0_11 = arith.constant 0 : index
    %5 = vector.load %arg1[%c0_10, %c11, %c0_11] : memref<2x90x64xbf16, #tpu.memory_space<vmem>>, vector<2x64x64xbf16>
    %c0_12 = arith.constant 0 : index
    %c18 = arith.constant 18 : index
    %c0_13 = arith.constant 0 : index
    %6 = vector.load %arg1[%c0_12, %c18, %c0_13] : memref<2x90x64xbf16, #tpu.memory_space<vmem>>, vector<2x64x64xbf16>
    %c0_14 = arith.constant 0 : index
    %c19 = arith.constant 19 : index
    %c0_15 = arith.constant 0 : index
    %7 = vector.load %arg1[%c0_14, %c19, %c0_15] : memref<2x90x64xbf16, #tpu.memory_space<vmem>>, vector<2x64x64xbf16>
    %c0_16 = arith.constant 0 : index
    %c20 = arith.constant 20 : index
    %c0_17 = arith.constant 0 : index
    %8 = vector.load %arg1[%c0_16, %c20, %c0_17] : memref<2x90x64xbf16, #tpu.memory_space<vmem>>, vector<2x64x64xbf16>
    %9 = tpu.concatenate %0, %1, %2, %3, %4, %5, %6, %7, %8 in 2 : vector<2x64x64xbf16>, vector<2x64x64xbf16>, vector<2x64x64xbf16>, vector<2x64x64xbf16>, vector<2x64x64xbf16>, vector<2x64x64xbf16>, vector<2x64x64xbf16>, vector<2x64x64xbf16>, vector<2x64x64xbf16> -> vector<2x64x576xbf16>
    %10 = vector.shape_cast %9 : vector<2x64x576xbf16> to vector<128x576xbf16>
    %c0_18 = arith.constant 0 : index
    %c0_19 = arith.constant 0 : index
    %11 = vector.load %arg2[%c0_18, %c0_19] : memref<576x128xbf16, #tpu.memory_space<vmem>>, vector<576x128xbf16>
    %cst = arith.constant dense<0.000000e+00> : vector<128x128xf32>
    %12 = tpu.matmul %10, %11, %cst {dimension_numbers = #tpu.dot_dimension_numbers<[1], [0], [0], [1], [0, 0, 1, 1], [], []>} : vector<128x576xbf16>, vector<576x128xbf16>, vector<128x128xf32> -> vector<128x128xf32>
    %13 = vector.extract_strided_slice %12 {offsets = [0, 0], sizes = [128, 32], strides = [1, 1]} : vector<128x128xf32> to vector<128x32xf32>
    %14 = vector.extract_strided_slice %12 {offsets = [0, 32], sizes = [128, 32], strides = [1, 1]} : vector<128x128xf32> to vector<128x32xf32>
    %15 = arith.maximumf %13, %14 : vector<128x32xf32>
    %16 = vector.extract_strided_slice %12 {offsets = [0, 64], sizes = [128, 32], strides = [1, 1]} : vector<128x128xf32> to vector<128x32xf32>
    %17 = vector.extract_strided_slice %12 {offsets = [0, 96], sizes = [128, 32], strides = [1, 1]} : vector<128x128xf32> to vector<128x32xf32>
    %18 = arith.maximumf %16, %17 : vector<128x32xf32>
    %19 = arith.maximumf %15, %18 : vector<128x32xf32>
    %c0_20 = arith.constant 0 : index
    %c0_21 = arith.constant 0 : index
    %20 = vector.load %arg3[%c0_20, %c0_21] : memref<1x32xf32, #tpu.memory_space<vmem>>, vector<1x32xf32>
    %21 = vector.broadcast %20 : vector<1x32xf32> to vector<128x32xf32>
    %22 = arith.addf %19, %21 : vector<128x32xf32>
    %cst_22 = arith.constant 0.000000e+00 : f32
    %23 = vector.broadcast %cst_22 : f32 to vector<128x32xf32>
    %24 = arith.maximumf %22, %23 : vector<128x32xf32>
    %25 = arith.truncf %24 : vector<128x32xf32> to vector<128x32xbf16>
    %26 = vector.shape_cast %25 : vector<128x32xbf16> to vector<2x64x32xbf16>
    %c0_23 = arith.constant 0 : index
    %c0_24 = arith.constant 0 : index
    %c0_25 = arith.constant 0 : index
    %27 = vector.load %arg4[%c0_23, %c0_24, %c0_25] : memref<2x64x32xbf16, #tpu.memory_space<vmem>>, vector<2x64x32xbf16>
    tpu.vector_store %arg4[%c0_23, %c0_24, %c0_25], %26 {strides = array<i32>} : memref<2x64x32xbf16, #tpu.memory_space<vmem>>, vector<2x64x32xbf16>,
    return
  }
  func.func @transform_0(%arg0: i32) -> (i32, i32, i32) {
    %c0_i32 = arith.constant 0 : i32
    %c0_i32_0 = arith.constant 0 : i32
    %c0_i32_1 = arith.constant 0 : i32
    return %arg0, %c0_i32, %c0_i32_0 : i32, i32, i32
  }
  func.func @transform_1(%arg0: i32) -> (i32, i32) {
    %c0_i32 = arith.constant 0 : i32
    %c0_i32_0 = arith.constant 0 : i32
    %c0_i32_1 = arith.constant 0 : i32
    return %c0_i32, %c0_i32_0 : i32, i32
  }
  func.func @transform_2(%arg0: i32) -> (i32, i32) {
    %c0_i32 = arith.constant 0 : i32
    %c0_i32_0 = arith.constant 0 : i32
    %c0_i32_1 = arith.constant 0 : i32
    return %c0_i32, %c0_i32_0 : i32, i32
  }
  func.func @transform_3(%arg0: i32) -> (i32, i32, i32) {
    %c0_i32 = arith.constant 0 : i32
    %c0_i32_0 = arith.constant 0 : i32
    %c0_i32_1 = arith.constant 0 : i32
    return %arg0, %c0_i32, %c0_i32_0 : i32, i32, i32
  }
}

module attributes {stable_mosaic.version = 11 : i64} {
  func.func @_conv_pool_kernel(%arg0: i32, %arg1: memref<2x48x128xbf16, #tpu.memory_space<vmem>>, %arg2: memref<1152x128xbf16, #tpu.memory_space<vmem>>, %arg3: memref<1x32xf32, #tpu.memory_space<vmem>>, %arg4: memref<2x32x32xbf16, #tpu.memory_space<vmem>>) attributes {dimension_semantics = [#tpu.dimension_semantics<parallel>], iteration_bounds = array<i64: 1>, scalar_prefetch = 0 : i64, scratch_operands = 0 : i64, tpu.core_type = #tpu.core_type<tc>, window_params = [{transform_indices = @transform_0, window_bounds = array<i64: 2, 48, 128>}, {pipeline_mode = #tpu.pipeline_mode<synchronous>, transform_indices = @transform_1, window_bounds = array<i64: 1152, 128>}, {pipeline_mode = #tpu.pipeline_mode<synchronous>, transform_indices = @transform_2, window_bounds = array<i64: 1, 32>}, {transform_indices = @transform_3, window_bounds = array<i64: 2, 32, 32>}]} {
    %c0 = arith.constant 0 : index
    %c0_0 = arith.constant 0 : index
    %c0_1 = arith.constant 0 : index
    %0 = vector.load %arg1[%c0, %c0_0, %c0_1] : memref<2x48x128xbf16, #tpu.memory_space<vmem>>, vector<2x32x128xbf16>
    %c0_2 = arith.constant 0 : index
    %c1 = arith.constant 1 : index
    %c0_3 = arith.constant 0 : index
    %1 = vector.load %arg1[%c0_2, %c1, %c0_3] : memref<2x48x128xbf16, #tpu.memory_space<vmem>>, vector<2x32x128xbf16>
    %c0_4 = arith.constant 0 : index
    %c2 = arith.constant 2 : index
    %c0_5 = arith.constant 0 : index
    %2 = vector.load %arg1[%c0_4, %c2, %c0_5] : memref<2x48x128xbf16, #tpu.memory_space<vmem>>, vector<2x32x128xbf16>
    %c0_6 = arith.constant 0 : index
    %c6 = arith.constant 6 : index
    %c0_7 = arith.constant 0 : index
    %3 = vector.load %arg1[%c0_6, %c6, %c0_7] : memref<2x48x128xbf16, #tpu.memory_space<vmem>>, vector<2x32x128xbf16>
    %c0_8 = arith.constant 0 : index
    %c7 = arith.constant 7 : index
    %c0_9 = arith.constant 0 : index
    %4 = vector.load %arg1[%c0_8, %c7, %c0_9] : memref<2x48x128xbf16, #tpu.memory_space<vmem>>, vector<2x32x128xbf16>
    %c0_10 = arith.constant 0 : index
    %c8 = arith.constant 8 : index
    %c0_11 = arith.constant 0 : index
    %5 = vector.load %arg1[%c0_10, %c8, %c0_11] : memref<2x48x128xbf16, #tpu.memory_space<vmem>>, vector<2x32x128xbf16>
    %c0_12 = arith.constant 0 : index
    %c12 = arith.constant 12 : index
    %c0_13 = arith.constant 0 : index
    %6 = vector.load %arg1[%c0_12, %c12, %c0_13] : memref<2x48x128xbf16, #tpu.memory_space<vmem>>, vector<2x32x128xbf16>
    %c0_14 = arith.constant 0 : index
    %c13 = arith.constant 13 : index
    %c0_15 = arith.constant 0 : index
    %7 = vector.load %arg1[%c0_14, %c13, %c0_15] : memref<2x48x128xbf16, #tpu.memory_space<vmem>>, vector<2x32x128xbf16>
    %c0_16 = arith.constant 0 : index
    %c14 = arith.constant 14 : index
    %c0_17 = arith.constant 0 : index
    %8 = vector.load %arg1[%c0_16, %c14, %c0_17] : memref<2x48x128xbf16, #tpu.memory_space<vmem>>, vector<2x32x128xbf16>
    %9 = tpu.concatenate %0, %1, %2, %3, %4, %5, %6, %7, %8 in 2 : vector<2x32x128xbf16>, vector<2x32x128xbf16>, vector<2x32x128xbf16>, vector<2x32x128xbf16>, vector<2x32x128xbf16>, vector<2x32x128xbf16>, vector<2x32x128xbf16>, vector<2x32x128xbf16>, vector<2x32x128xbf16> -> vector<2x32x1152xbf16>
    %10 = vector.shape_cast %9 : vector<2x32x1152xbf16> to vector<64x1152xbf16>
    %c0_18 = arith.constant 0 : index
    %c0_19 = arith.constant 0 : index
    %11 = vector.load %arg2[%c0_18, %c0_19] : memref<1152x128xbf16, #tpu.memory_space<vmem>>, vector<1152x128xbf16>
    %cst = arith.constant dense<0.000000e+00> : vector<64x128xf32>
    %12 = tpu.matmul %10, %11, %cst {dimension_numbers = #tpu.dot_dimension_numbers<[1], [0], [0], [1], [0, 0, 1, 1], [], []>} : vector<64x1152xbf16>, vector<1152x128xbf16>, vector<64x128xf32> -> vector<64x128xf32>
    %13 = vector.extract_strided_slice %12 {offsets = [0, 0], sizes = [64, 32], strides = [1, 1]} : vector<64x128xf32> to vector<64x32xf32>
    %14 = vector.extract_strided_slice %12 {offsets = [0, 32], sizes = [64, 32], strides = [1, 1]} : vector<64x128xf32> to vector<64x32xf32>
    %15 = arith.maximumf %13, %14 : vector<64x32xf32>
    %16 = vector.extract_strided_slice %12 {offsets = [0, 64], sizes = [64, 32], strides = [1, 1]} : vector<64x128xf32> to vector<64x32xf32>
    %17 = vector.extract_strided_slice %12 {offsets = [0, 96], sizes = [64, 32], strides = [1, 1]} : vector<64x128xf32> to vector<64x32xf32>
    %18 = arith.maximumf %16, %17 : vector<64x32xf32>
    %19 = arith.maximumf %15, %18 : vector<64x32xf32>
    %c0_20 = arith.constant 0 : index
    %c0_21 = arith.constant 0 : index
    %20 = vector.load %arg3[%c0_20, %c0_21] : memref<1x32xf32, #tpu.memory_space<vmem>>, vector<1x32xf32>
    %21 = vector.broadcast %20 : vector<1x32xf32> to vector<64x32xf32>
    %22 = arith.addf %19, %21 : vector<64x32xf32>
    %cst_22 = arith.constant 0.000000e+00 : f32
    %23 = vector.broadcast %cst_22 : f32 to vector<64x32xf32>
    %24 = arith.maximumf %22, %23 : vector<64x32xf32>
    %25 = arith.truncf %24 : vector<64x32xf32> to vector<64x32xbf16>
    %26 = vector.shape_cast %25 : vector<64x32xbf16> to vector<2x32x32xbf16>
    %c0_23 = arith.constant 0 : index
    %c0_24 = arith.constant 0 : index
    %c0_25 = arith.constant 0 : index
    %27 = vector.load %arg4[%c0_23, %c0_24, %c0_25] : memref<2x32x32xbf16, #tpu.memory_space<vmem>>, vector<2x32x32xbf16>
    tpu.vector_store %arg4[%c0_23, %c0_24, %c0_25], %26 {strides = array<i32>} : memref<2x32x32xbf16, #tpu.memory_space<vmem>>, vector<2x32x32xbf16>,
    return
  }
  func.func @transform_0(%arg0: i32) -> (i32, i32, i32) {
    %c0_i32 = arith.constant 0 : i32
    %c0_i32_0 = arith.constant 0 : i32
    %c0_i32_1 = arith.constant 0 : i32
    return %arg0, %c0_i32, %c0_i32_0 : i32, i32, i32
  }
  func.func @transform_1(%arg0: i32) -> (i32, i32) {
    %c0_i32 = arith.constant 0 : i32
    %c0_i32_0 = arith.constant 0 : i32
    %c0_i32_1 = arith.constant 0 : i32
    return %c0_i32, %c0_i32_0 : i32, i32
  }
  func.func @transform_2(%arg0: i32) -> (i32, i32) {
    %c0_i32 = arith.constant 0 : i32
    %c0_i32_0 = arith.constant 0 : i32
    %c0_i32_1 = arith.constant 0 : i32
    return %c0_i32, %c0_i32_0 : i32, i32
  }
  func.func @transform_3(%arg0: i32) -> (i32, i32, i32) {
    %c0_i32 = arith.constant 0 : i32
    %c0_i32_0 = arith.constant 0 : i32
    %c0_i32_1 = arith.constant 0 : i32
    return %arg0, %c0_i32, %c0_i32_0 : i32, i32, i32
  }
}

module attributes {stable_mosaic.version = 11 : i64} {
  func.func @_fc_logits_kernel(%arg0: i32, %arg1: memref<8x288xbf16, #tpu.memory_space<vmem>>, %arg2: memref<288x512xbf16, #tpu.memory_space<vmem>>, %arg3: memref<1x512xf32, #tpu.memory_space<vmem>>, %arg4: memref<512x128xbf16, #tpu.memory_space<vmem>>, %arg5: memref<1x128xf32, #tpu.memory_space<vmem>>, %arg6: memref<8x128xf32, #tpu.memory_space<vmem>>) attributes {dimension_semantics = [#tpu.dimension_semantics<parallel>], iteration_bounds = array<i64: 1>, scalar_prefetch = 0 : i64, scratch_operands = 0 : i64, tpu.core_type = #tpu.core_type<tc>, window_params = [{transform_indices = @transform_0, window_bounds = array<i64: 8, 288>}, {pipeline_mode = #tpu.pipeline_mode<synchronous>, transform_indices = @transform_1, window_bounds = array<i64: 288, 512>}, {pipeline_mode = #tpu.pipeline_mode<synchronous>, transform_indices = @transform_2, window_bounds = array<i64: 1, 512>}, {pipeline_mode = #tpu.pipeline_mode<synchronous>, transform_indices = @transform_3, window_bounds = array<i64: 512, 128>}, {pipeline_mode = #tpu.pipeline_mode<synchronous>, transform_indices = @transform_4, window_bounds = array<i64: 1, 128>}, {transform_indices = @transform_5, window_bounds = array<i64: 8, 128>}]} {
    %c0 = arith.constant 0 : index
    %c0_0 = arith.constant 0 : index
    %0 = vector.load %arg1[%c0, %c0_0] : memref<8x288xbf16, #tpu.memory_space<vmem>>, vector<8x288xbf16>
    %c0_1 = arith.constant 0 : index
    %c0_2 = arith.constant 0 : index
    %1 = vector.load %arg2[%c0_1, %c0_2] : memref<288x512xbf16, #tpu.memory_space<vmem>>, vector<288x512xbf16>
    %cst = arith.constant dense<0.000000e+00> : vector<8x512xf32>
    %2 = tpu.matmul %0, %1, %cst {dimension_numbers = #tpu.dot_dimension_numbers<[1], [0], [0], [1], [0, 0, 1, 1], [], []>} : vector<8x288xbf16>, vector<288x512xbf16>, vector<8x512xf32> -> vector<8x512xf32>
    %c0_3 = arith.constant 0 : index
    %c0_4 = arith.constant 0 : index
    %3 = vector.load %arg3[%c0_3, %c0_4] : memref<1x512xf32, #tpu.memory_space<vmem>>, vector<1x512xf32>
    %4 = vector.broadcast %3 : vector<1x512xf32> to vector<8x512xf32>
    %5 = arith.addf %2, %4 : vector<8x512xf32>
    %cst_5 = arith.constant 0.000000e+00 : f32
    %6 = vector.broadcast %cst_5 : f32 to vector<8x512xf32>
    %7 = arith.maximumf %5, %6 : vector<8x512xf32>
    %8 = arith.truncf %7 : vector<8x512xf32> to vector<8x512xbf16>
    %c0_6 = arith.constant 0 : index
    %c0_7 = arith.constant 0 : index
    %9 = vector.load %arg4[%c0_6, %c0_7] : memref<512x128xbf16, #tpu.memory_space<vmem>>, vector<512x128xbf16>
    %cst_8 = arith.constant dense<0.000000e+00> : vector<8x128xf32>
    %10 = tpu.matmul %8, %9, %cst_8 {dimension_numbers = #tpu.dot_dimension_numbers<[1], [0], [0], [1], [0, 0, 1, 1], [], []>} : vector<8x512xbf16>, vector<512x128xbf16>, vector<8x128xf32> -> vector<8x128xf32>
    %c0_9 = arith.constant 0 : index
    %c0_10 = arith.constant 0 : index
    %11 = vector.load %arg5[%c0_9, %c0_10] : memref<1x128xf32, #tpu.memory_space<vmem>>, vector<1x128xf32>
    %12 = vector.broadcast %11 : vector<1x128xf32> to vector<8x128xf32>
    %13 = arith.addf %10, %12 : vector<8x128xf32>
    %c0_11 = arith.constant 0 : index
    %c0_12 = arith.constant 0 : index
    %14 = vector.load %arg6[%c0_11, %c0_12] : memref<8x128xf32, #tpu.memory_space<vmem>>, vector<8x128xf32>
    tpu.vector_store %arg6[%c0_11, %c0_12], %13 {strides = array<i32>} : memref<8x128xf32, #tpu.memory_space<vmem>>, vector<8x128xf32>,
    return
  }
  func.func @transform_0(%arg0: i32) -> (i32, i32) {
    %c0_i32 = arith.constant 0 : i32
    %c0_i32_0 = arith.constant 0 : i32
    return %arg0, %c0_i32 : i32, i32
  }
  func.func @transform_1(%arg0: i32) -> (i32, i32) {
    %c0_i32 = arith.constant 0 : i32
    %c0_i32_0 = arith.constant 0 : i32
    %c0_i32_1 = arith.constant 0 : i32
    return %c0_i32, %c0_i32_0 : i32, i32
  }
  func.func @transform_2(%arg0: i32) -> (i32, i32) {
    %c0_i32 = arith.constant 0 : i32
    %c0_i32_0 = arith.constant 0 : i32
    %c0_i32_1 = arith.constant 0 : i32
    return %c0_i32, %c0_i32_0 : i32, i32
  }
  func.func @transform_3(%arg0: i32) -> (i32, i32) {
    %c0_i32 = arith.constant 0 : i32
    %c0_i32_0 = arith.constant 0 : i32
    %c0_i32_1 = arith.constant 0 : i32
    return %c0_i32, %c0_i32_0 : i32, i32
  }
  func.func @transform_4(%arg0: i32) -> (i32, i32) {
    %c0_i32 = arith.constant 0 : i32
    %c0_i32_0 = arith.constant 0 : i32
    %c0_i32_1 = arith.constant 0 : i32
    return %c0_i32, %c0_i32_0 : i32, i32
  }
  func.func @transform_5(%arg0: i32) -> (i32, i32) {
    %c0_i32 = arith.constant 0 : i32
    %c0_i32_0 = arith.constant 0 : i32
    return %arg0, %c0_i32 : i32, i32
  }
}

</mosaic_0001>

<bundles_post_ra>
// kernel: fmnistnet_forward.4
= control target key start
LH: loop header
LB: loop body
LE: loop exit
PB: predicated region body
PF: predicated region fallthrough
CT: control target
= control target key end

     0   :  { %vm316_vm0 = vcmask 1041408   ;;  %vm231_vm1 = vcmask 293888   ;;  %s1847_s18 = smov 112   ;;  %vm1480_vm2 = vcmask 125952   ;;  %s2835_s1 = inlined_call_operand.vmem [shape: bf16[36,64], index: 1, kind: input, shape index: {}]   ;;  %s2836_s0 = inlined_call_operand.vmem [shape: bf16[2,224,36], index: 0, kind: input, shape index: {}]   ;;  %s2837_s2 = inlined_call_operand.vmem [shape: f32[1,16], index: 2, kind: input, shape index: {}]   ;;  %s2838_s3 = inlined_call_operand.vmem [shape: bf16[2,224,16], index: 3, kind: output, shape index: {}]  }
   0x1   :  { %v1816_v0 = vld [vmem:[%s2835_s1 + $0x10] ss:$0 sps:$4 sm:$0x33]   ;;  %v1817_v1 = vld [vmem:[%s2835_s1 + $0x8] sm:$0xff]   ;;  %v1818_v3 = vld [vmem:[%s2835_s1] sm:$0xff]  }
   0x2   :  { %1812 = vmatprep.subr.msk.bf16.mxu0 %vm316_vm0, %v1816_v0  ;;  %1813 = vmatprep.subr.msk.bf16.mxu1 %vm316_vm0, %v1816_v0  ;;  %v318_v2 = vsel %vm316_vm0, %v1816_v0, 0  ;;  %v1819_v4 = vld [vmem:[%s2836_s0] sm:$0xff]   ;;  %v1820_v5 = vld [vmem:[%s2836_s0 + $0x70] sm:$0xff]   ;;  %v1821_v6 = vld [vmem:[%s2836_s0 + $0x8] sm:$0xff]  }
   0x3   :  { %1745 = vmatpush3.bf16.msra.mxu0 %v318_v2  ;;  %1809 = vmatpush3.bf16.msra.mxu1 %v318_v2  ;;  %v1822_v7 = vld [vmem:[%s2836_s0 + $0x78] sm:$0xff]   ;;  %v1823_v8 = vld [vmem:[%s2836_s0 + $0x10] sm:$0xff]   ;;  %v1825_v9 = vld [vmem:[%s2836_s0 + $0x80] sm:$0xff]  }
   0x4   :  { %1746 = vmatprep.subr.bf16.mxu0 %v1817_v1  ;;  %1807 = vmatprep.subr.bf16.mxu1 %v1817_v1  ;;  %v1824_v10 = vld [vmem:[%s2836_s0 + $0x18] sm:$0xff]   ;;  %v1826_v11 = vld [vmem:[%s2836_s0 + $0x88] sm:$0xff]   ;;  %v1827_v12 = vld [vmem:[%s2836_s0 + $0x20] sm:$0xff]  }
   0x5   :  { %1750 = vmatprep.mubr.msk.bf16.mxu0 %vm231_vm1, %v1819_v4  ;;  %1778 = vmatprep.mubr.msk.bf16.mxu1 %vm231_vm1, %v1820_v5  ;;  %v1829_v13 = vld [vmem:[%s2836_s0 + $0x90] sm:$0xff]   ;;  %v1828_v14 = vld [vmem:[%s2836_s0 + $0x28] sm:$0xff]   ;;  %v1830_v15 = vld [vmem:[%s2836_s0 + $0x98] sm:$0xff]  }
   0x6   :  { %v1831_v16 = vld [vmem:[%s2836_s0 + $0x30] sm:$0xff]   ;;  %v1833_v17 = vld [vmem:[%s2836_s0 + $0xa0] sm:$0xff]   ;;  %v1832_v18 = vld [vmem:[%s2836_s0 + $0x38] sm:$0xff]  }
   0x7   :  { %1747 = vmatpush3.bf16.msra.mxu0 %v1817_v1  ;;  %1810 = vmatpush3.bf16.msra.mxu1 %v1817_v1  ;;  %v1834_v19 = vld [vmem:[%s2836_s0 + $0xa8] sm:$0xff]   ;;  %v1835_v20 = vld [vmem:[%s2836_s0 + $0x40] sm:$0xff]   ;;  %v1837_v21 = vld [vmem:[%s2836_s0 + $0xb0] sm:$0xff]  }
   0x8   :  { %1748 = vmatprep.subr.bf16.mxu0 %v1818_v3  ;;  %1808 = vmatprep.subr.bf16.mxu1 %v1818_v3  ;;  %v1836_v22 = vld [vmem:[%s2836_s0 + $0x48] sm:$0xff]   ;;  %v1838_v23 = vld [vmem:[%s2836_s0 + $0xb8] sm:$0xff]   ;;  %v1839_v24 = vld [vmem:[%s2836_s0 + $0x50] sm:$0xff]  }
   0x9   :  { %v1841_v25 = vld [vmem:[%s2836_s0 + $0xc0] sm:$0xff]   ;;  %v1840_v26 = vld [vmem:[%s2836_s0 + $0x58] sm:$0xff]   ;;  %v1842_v27 = vld [vmem:[%s2836_s0 + $0xc8] sm:$0xff]  }
   0xa   :  { %v1843_v28 = vld [vmem:[%s2836_s0 + $0x60] sm:$0xff]   ;;  %v1845_v29 = vld [vmem:[%s2836_s0 + $0xd0] sm:$0xff]   ;;  %v1844_v30 = vld [vmem:[%s2836_s0 + $0x68] sm:$0xff]  }
   0xb   :  { %1749 = vmatpush3.bf16.msra.mxu0 %v1818_v3  ;;  %1811 = vmatpush3.bf16.msra.mxu1 %v1818_v3  ;;  %v1846_v31 = vld [vmem:[%s2836_s0 + $0xd8] sm:$0xff]   ;;  %s1848_s0 = smov 96  }
   0xe   :  { %1751 = vmatmul.mubr.msk.bf16.vlgmr.msra.gmra.mxu0 %vm231_vm1, %v1821_v6  ;;  %1779 = vmatmul.mubr.msk.bf16.vlgmr.msra.gmra.mxu1 %vm231_vm1, %v1822_v7 }
   0xf   :  { %1754 = vmatprep.mubr.msk.bf16.mxu0 %vm231_vm1, %v1823_v8  ;;  %1782 = vmatprep.mubr.msk.bf16.mxu1 %vm231_vm1, %v1825_v9 }
  0x16   :  { %1755 = vmatmul.mubr.msk.bf16.gmra.mxu0 %vm231_vm1, %v1824_v10  ;;  %1783 = vmatmul.mubr.msk.bf16.gmra.mxu1 %vm231_vm1, %v1826_v11 }
  0x17   :  { %1758 = vmatprep.mubr.msk.bf16.mxu0 %vm231_vm1, %v1827_v12  ;;  %1786 = vmatprep.mubr.msk.bf16.mxu1 %vm231_vm1, %v1829_v13 }
  0x1e   :  { %1759 = vmatmul.mubr.msk.bf16.gmra.mxu0 %vm231_vm1, %v1828_v14  ;;  %1787 = vmatmul.mubr.msk.bf16.gmra.mxu1 %vm231_vm1, %v1830_v15 }
  0x1f   :  { %1762 = vmatprep.mubr.msk.bf16.mxu0 %vm231_vm1, %v1831_v16  ;;  %1790 = vmatprep.mubr.msk.bf16.mxu1 %vm231_vm1, %v1833_v17 }
  0x26   :  { %1763 = vmatmul.mubr.msk.bf16.gmra.mxu0 %vm231_vm1, %v1832_v18  ;;  %1791 = vmatmul.mubr.msk.bf16.gmra.mxu1 %vm231_vm1, %v1834_v19 }
  0x27   :  { %1766 = vmatprep.mubr.msk.bf16.mxu0 %vm231_vm1, %v1835_v20  ;;  %1794 = vmatprep.mubr.msk.bf16.mxu1 %vm231_vm1, %v1837_v21 }
  0x2e   :  { %1767 = vmatmul.mubr.msk.bf16.gmra.mxu0 %vm231_vm1, %v1836_v22  ;;  %1795 = vmatmul.mubr.msk.bf16.gmra.mxu1 %vm231_vm1, %v1838_v23 }
  0x2f   :  { %1770 = vmatprep.mubr.msk.bf16.mxu0 %vm231_vm1, %v1839_v24  ;;  %1798 = vmatprep.mubr.msk.bf16.mxu1 %vm231_vm1, %v1841_v25 }
  0x36   :  { %1771 = vmatmul.mubr.msk.bf16.gmra.mxu0 %vm231_vm1, %v1840_v26  ;;  %1799 = vmatmul.mubr.msk.bf16.gmra.mxu1 %vm231_vm1, %v1842_v27 }
  0x37   :  { %1774 = vmatprep.mubr.msk.bf16.mxu0 %vm231_vm1, %v1843_v28  ;;  %1802 = vmatprep.mubr.msk.bf16.mxu1 %vm231_vm1, %v1845_v29 }
  0x3e   :  { %1775 = vmatmul.mubr.msk.bf16.gmra.mxu0 %vm231_vm1, %v1844_v30  ;;  %1803 = vmatmul.mubr.msk.bf16.gmra.mxu1 %vm231_vm1, %v1846_v31 }
  0xce   :  { %v1990_v32 = vpop.f32.mrf.mxu0  ;;  %v1992_v33 = vpop.f32.mrf.mxu1 }
  0xcf   :  { %693 = vrot.lane.b32.xlu0 %v1992_v33, %s1847_s18  ;;  %637 = vrot.lane.b32.xlu1 %v1990_v32, %s1847_s18 }
  0xd0   :  { %v1998_v34 = vpop.f32.mrf.mxu0  ;;  %v2000_v35 = vpop.f32.mrf.mxu1 }
  0xd2   :  { %v2002_v36 = vpop.f32.mrf.mxu0  ;;  %v2008_v37 = vpop.f32.mrf.mxu1 }
  0xd3   :  { %633 = vrot.lane.b32.xlu0 %v1998_v34, %s1847_s18  ;;  %639 = vrot.lane.b32.xlu1 %v2002_v36, %s1847_s18 }
  0xd4   :  { %v2010_v38 = vpop.f32.mrf.mxu0  ;;  %v2018_v40 = vpop.f32.mrf.mxu1 }
  0xd6   :  { %v2012_v39 = vpop.f32.mrf.mxu0  ;;  %v2022_v42 = vpop.f32.mrf.mxu1 }
  0xd7   :  { %689 = vrot.lane.b32.xlu0 %v2000_v35, %s1847_s18  ;;  %695 = vrot.lane.b32.xlu1 %v2008_v37, %s1847_s18 }
  0xd8   :  { %v2020_v41 = vpop.f32.mrf.mxu0  ;;  %v2030_v44 = vpop.f32.mrf.mxu1 }
  0xda   :  { %v2028_v43 = vpop.f32.mrf.mxu0  ;;  %v2036_v45 = vpop.f32.mrf.mxu1 }
  0xdb   :  { %691 = vrot.lane.b32.xlu1 %v2018_v40, %s1847_s18  ;;  %635 = vrot.lane.b32.xlu0 %v2010_v38, %s1847_s18 }
  0xdc   :  { %v2042_v46 = vpop.f32.mrf.mxu0  ;;  %v2050_v48 = vpop.f32.mrf.mxu1 }
  0xde   :  { %v2044_v47 = vpop.f32.mrf.mxu0  ;;  %v2054_v50 = vpop.f32.mrf.mxu1 }
  0xdf   :  { %645 = vrot.lane.b32.xlu0 %v2012_v39, %s1847_s18  ;;  %647 = vrot.lane.b32.xlu1 %v2028_v43, %s1847_s18 }
  0xe0   :  { %v2052_v49 = vpop.f32.mrf.mxu0  ;;  %v2062_v52 = vpop.f32.mrf.mxu1 }
  0xe2   :  { %v2060_v51 = vpop.f32.mrf.mxu0  ;;  %v2068_v53 = vpop.f32.mrf.mxu1 }
  0xe3   :  { %701 = vrot.lane.b32.xlu0 %v2022_v42, %s1847_s18  ;;  %703 = vrot.lane.b32.xlu1 %v2036_v45, %s1847_s18 }
  0xe4   :  { %v2074_v54 = vpop.f32.mrf.mxu0  ;;  %v2082_v56 = vpop.f32.mrf.mxu1 }
  0xe6   :  { %v2076_v55 = vpop.f32.mrf.mxu0  ;;  %v2086_v58 = vpop.f32.mrf.mxu1 }
  0xe7   :  { %641 = vrot.lane.b32.xlu0 %v2020_v41, %s1847_s18  ;;  %643 = vrot.lane.b32.xlu1 %v2042_v46, %s1847_s18 }
  0xe8   :  { %v2084_v57 = vpop.f32.mrf.mxu0  ;;  %v2094_v60 = vpop.f32.mrf.mxu1 }
  0xea   :  { %v2092_v59 = vpop.f32.mrf.mxu0  ;;  %v2100_v61 = vpop.f32.mrf.mxu1 }
  0xeb   :  { %697 = vrot.lane.b32.xlu0 %v2030_v44, %s1847_s18  ;;  %699 = vrot.lane.b32.xlu1 %v2050_v48, %s1847_s18 }
  0xec   :  { %v2106_v62 = vpop.f32.mrf.mxu0  ;;  %v2114_v0 = vpop.f32.mrf.mxu1 }
  0xee   :  { %v2108_v63 = vpop.f32.mrf.mxu0  ;;  %v2118_v2 = vpop.f32.mrf.mxu1 }
  0xef   :  { %653 = vrot.lane.b32.xlu0 %v2044_v47, %s1847_s18  ;;  %655 = vrot.lane.b32.xlu1 %v2060_v51, %s1847_s18 }
  0xf0   :  { %v2116_v1 = vpop.f32.mrf.mxu0  ;;  %v2126_v4 = vpop.f32.mrf.mxu1 }
  0xf2   :  { %v2124_v3 = vpop.f32.mrf.mxu0  ;;  %v2132_v5 = vpop.f32.mrf.mxu1 }
  0xf3   :  { %709 = vrot.lane.b32.xlu0 %v2054_v50, %s1847_s18  ;;  %711 = vrot.lane.b32.xlu1 %v2068_v53, %s1847_s18 }
  0xf4   :  { %v2138_v6 = vpop.f32.mrf.mxu0  ;;  %v2146_v8 = vpop.f32.mrf.mxu1 }
  0xf6   :  { %v2140_v7 = vpop.f32.mrf.mxu0  ;;  %v2150_v10 = vpop.f32.mrf.mxu1 }
  0xf7   :  { %649 = vrot.lane.b32.xlu0 %v2052_v49, %s1847_s18  ;;  %651 = vrot.lane.b32.xlu1 %v2074_v54, %s1847_s18 }
  0xf8   :  { %v2148_v9 = vpop.f32.mrf.mxu0  ;;  %v2158_v12 = vpop.f32.mrf.mxu1 }
  0xfa   :  { %v2156_v11 = vpop.f32.mrf.mxu0  ;;  %v2164_v13 = vpop.f32.mrf.mxu1 }
  0xfb   :  { %705 = vrot.lane.b32.xlu0 %v2062_v52, %s1847_s18  ;;  %707 = vrot.lane.b32.xlu1 %v2082_v56, %s1847_s18 }
  0xfc   :  { %v2170_v14 = vpop.f32.mrf.mxu0  ;;  %v2178_v16 = vpop.f32.mrf.mxu1 }
  0xfe   :  { %v2172_v15 = vpop.f32.mrf.mxu0  ;;  %v2182_v18 = vpop.f32.mrf.mxu1 }
  0xff   :  { %661 = vrot.lane.b32.xlu0 %v2076_v55, %s1847_s18  ;;  %663 = vrot.lane.b32.xlu1 %v2092_v59, %s1847_s18 }
 0x100   :  { %v2180_v17 = vpop.f32.mrf.mxu0  ;;  %v2190_v20 = vpop.f32.mrf.mxu1 }
 0x102   :  { %v2188_v19 = vpop.f32.mrf.mxu0  ;;  %v2196_v21 = vpop.f32.mrf.mxu1 }
 0x103   :  { %717 = vrot.lane.b32.xlu0 %v2086_v58, %s1847_s18  ;;  %719 = vrot.lane.b32.xlu1 %v2100_v61, %s1847_s18 }
 0x104   :  { %v2202_v22 = vpop.f32.mrf.mxu0  ;;  %v2208_v23 = vpop.f32.mrf.mxu1 }
 0x107   :  { %657 = vrot.lane.b32.xlu0 %v2084_v57, %s1847_s18  ;;  %659 = vrot.lane.b32.xlu1 %v2106_v62, %s1847_s18 }
 0x10b   :  { %713 = vrot.lane.b32.xlu0 %v2094_v60, %s1847_s18  ;;  %715 = vrot.lane.b32.xlu1 %v2114_v0, %s1847_s18 }
 0x10f   :  { %669 = vrot.lane.b32.xlu0 %v2108_v63, %s1847_s18  ;;  %671 = vrot.lane.b32.xlu1 %v2124_v3, %s1847_s18 }
 0x113   :  { %725 = vrot.lane.b32.xlu0 %v2118_v2, %s1847_s18  ;;  %727 = vrot.lane.b32.xlu1 %v2132_v5, %s1847_s18 }
 0x117   :  { %665 = vrot.lane.b32.xlu0 %v2116_v1, %s1847_s18  ;;  %667 = vrot.lane.b32.xlu1 %v2138_v6, %s1847_s18 }
 0x11b   :  { %721 = vrot.lane.b32.xlu0 %v2126_v4, %s1847_s18  ;;  %723 = vrot.lane.b32.xlu1 %v2146_v8, %s1847_s18 }
 0x11f   :  { %677 = vrot.lane.b32.xlu0 %v2140_v7, %s1847_s18  ;;  %679 = vrot.lane.b32.xlu1 %v2156_v11, %s1847_s18 }
 0x123   :  { %733 = vrot.lane.b32.xlu0 %v2150_v10, %s1847_s18  ;;  %735 = vrot.lane.b32.xlu1 %v2164_v13, %s1847_s18 }
 0x127   :  { %673 = vrot.lane.b32.xlu0 %v2148_v9, %s1847_s18  ;;  %675 = vrot.lane.b32.xlu1 %v2170_v14, %s1847_s18 }
 0x12b   :  { %729 = vrot.lane.b32.xlu0 %v2158_v12, %s1847_s18  ;;  %731 = vrot.lane.b32.xlu1 %v2178_v16, %s1847_s18 }
 0x12f   :  { %685 = vrot.lane.b32.xlu0 %v2172_v15, %s1847_s18  ;;  %687 = vrot.lane.b32.xlu1 %v2188_v19, %s1847_s18 }
 0x133   :  { %741 = vrot.lane.b32.xlu0 %v2182_v18, %s1847_s18  ;;  %743 = vrot.lane.b32.xlu1 %v2196_v21, %s1847_s18 }
 0x137   :  { %681 = vrot.lane.b32.xlu0 %v2180_v17, %s1847_s18  ;;  %683 = vrot.lane.b32.xlu1 %v2202_v22, %s1847_s18 }
 0x13b   :  { %737 = vrot.lane.b32.xlu0 %v2190_v20, %s1847_s18  ;;  %739 = vrot.lane.b32.xlu1 %v2208_v23, %s1847_s18 }
 0x141   :  { %v694_v24 = vpop.permute.xlu0 %693  ;;  %v638_v25 = vpop.permute.xlu1 %637 }
 0x142   :  { %v2215_v26 = vmax.f32 %v1990_v32, %v638_v25  ;;  %v2220_v29 = vmax.f32 %v1992_v33, %v694_v24 }
 0x144   :  { %2846 = vst [vmem:[#allocation2_spill] sm:$0xff] %v2215_v26  ;;  %917 = vrot.lane.b32.xlu0 %v2215_v26, %s1848_s0 }
 0x145   :  { %v634_v27 = vpop.permute.xlu0 %633  ;;  %v640_v28 = vpop.permute.xlu1 %639 }
 0x146   :  { %v2223_v30 = vmax.f32 %v2002_v36, %v640_v28  ;;  %v2230_v25 = vmax.f32 %v1998_v34, %v634_v27 }
 0x148   :  { %973 = vrot.lane.b32.xlu0 %v2220_v29, %s1848_s0  ;;  %919 = vrot.lane.b32.xlu1 %v2223_v30, %s1848_s0 }
 0x149   :  { %v690_v31 = vpop.permute.xlu0 %689  ;;  %v696_v32 = vpop.permute.xlu1 %695 }
 0x14a   :  { %v2233_v26 = vmax.f32 %v2008_v37, %v696_v32  ;;  %v2240_v24 = vmax.f32 %v2000_v35, %v690_v31 }
 0x14c   :  { %913 = vrot.lane.b32.xlu0 %v2230_v25, %s1848_s0  ;;  %975 = vrot.lane.b32.xlu1 %v2233_v26, %s1848_s0 }
 0x14d   :  { %v692_v33 = vpop.permute.xlu1 %691  ;;  %v636_v36 = vpop.permute.xlu0 %635 }
 0x14e   :  { %v2243_v28 = vmax.f32 %v2010_v38, %v636_v36  ;;  %v2250_v27 = vmax.f32 %v2018_v40, %v692_v33 }
 0x150   :  { %969 = vrot.lane.b32.xlu0 %v2240_v24, %s1848_s0  ;;  %915 = vrot.lane.b32.xlu1 %v2243_v28, %s1848_s0 }
 0x151   :  { %v646_v34 = vpop.permute.xlu0 %645  ;;  %v648_v37 = vpop.permute.xlu1 %647 }
 0x152   :  { %v2253_v32 = vmax.f32 %v2012_v39, %v646_v34  ;;  %v2260_v31 = vmax.f32 %v2028_v43, %v648_v37 }
 0x154   :  { %925 = vrot.lane.b32.xlu0 %v2253_v32, %s1848_s0  ;;  %971 = vrot.lane.b32.xlu1 %v2250_v27, %s1848_s0 }
 0x155   :  { %v702_v35 = vpop.permute.xlu0 %701  ;;  %v704_v38 = vpop.permute.xlu1 %703 }
 0x156   :  { %v2263_v36 = vmax.f32 %v2022_v42, %v702_v35  ;;  %v2270_v33 = vmax.f32 %v2036_v45, %v704_v38 }
 0x158   :  { %981 = vrot.lane.b32.xlu0 %v2263_v36, %s1848_s0  ;;  %927 = vrot.lane.b32.xlu1 %v2260_v31, %s1848_s0 }
 0x159   :  { %v642_v39 = vpop.permute.xlu0 %641  ;;  %v644_v40 = vpop.permute.xlu1 %643 }
 0x15a   :  { %v2273_v34 = vmax.f32 %v2020_v41, %v642_v39  ;;  %v2280_v37 = vmax.f32 %v2042_v46, %v644_v40 }
 0x15c   :  { %921 = vrot.lane.b32.xlu0 %v2273_v34, %s1848_s0  ;;  %983 = vrot.lane.b32.xlu1 %v2270_v33, %s1848_s0 }
 0x15d   :  { %v698_v42 = vpop.permute.xlu0 %697  ;;  %v700_v43 = vpop.permute.xlu1 %699 }
 0x15e   :  { %v2283_v35 = vmax.f32 %v2030_v44, %v698_v42  ;;  %v2290_v38 = vmax.f32 %v2050_v48, %v700_v43 }
 0x160   :  { %977 = vrot.lane.b32.xlu0 %v2283_v35, %s1848_s0  ;;  %923 = vrot.lane.b32.xlu1 %v2280_v37, %s1848_s0 }
 0x161   :  { %v654_v41 = vpop.permute.xlu0 %653  ;;  %v656_v45 = vpop.permute.xlu1 %655 }
 0x162   :  { %v2293_v39 = vmax.f32 %v2044_v47, %v654_v41  ;;  %v2300_v40 = vmax.f32 %v2060_v51, %v656_v45 }
 0x164   :  { %933 = vrot.lane.b32.xlu0 %v2293_v39, %s1848_s0  ;;  %979 = vrot.lane.b32.xlu1 %v2290_v38, %s1848_s0 }
 0x165   :  { %v710_v44 = vpop.permute.xlu0 %709  ;;  %v712_v46 = vpop.permute.xlu1 %711 }
 0x166   :  { %v2303_v42 = vmax.f32 %v2054_v50, %v710_v44  ;;  %v2310_v43 = vmax.f32 %v2068_v53, %v712_v46 }
 0x168   :  { %989 = vrot.lane.b32.xlu0 %v2303_v42, %s1848_s0  ;;  %935 = vrot.lane.b32.xlu1 %v2300_v40, %s1848_s0 }
 0x169   :  { %v650_v47 = vpop.permute.xlu0 %649  ;;  %v652_v48 = vpop.permute.xlu1 %651 }
 0x16a   :  { %v2313_v41 = vmax.f32 %v2052_v49, %v650_v47  ;;  %v2320_v45 = vmax.f32 %v2074_v54, %v652_v48 }
 0x16c   :  { %929 = vrot.lane.b32.xlu0 %v2313_v41, %s1848_s0  ;;  %991 = vrot.lane.b32.xlu1 %v2310_v43, %s1848_s0 }
 0x16d   :  { %v706_v50 = vpop.permute.xlu0 %705  ;;  %v708_v51 = vpop.permute.xlu1 %707 }
 0x16e   :  { %v2323_v44 = vmax.f32 %v2062_v52, %v706_v50  ;;  %v2330_v46 = vmax.f32 %v2082_v56, %v708_v51 }
 0x170   :  { %985 = vrot.lane.b32.xlu0 %v2323_v44, %s1848_s0  ;;  %931 = vrot.lane.b32.xlu1 %v2320_v45, %s1848_s0 }
 0x171   :  { %v662_v49 = vpop.permute.xlu0 %661  ;;  %v664_v53 = vpop.permute.xlu1 %663 }
 0x172   :  { %v2333_v47 = vmax.f32 %v2076_v55, %v662_v49  ;;  %v2340_v48 = vmax.f32 %v2092_v59, %v664_v53 }
 0x174   :  { %941 = vrot.lane.b32.xlu0 %v2333_v47, %s1848_s0  ;;  %987 = vrot.lane.b32.xlu1 %v2330_v46, %s1848_s0 }
 0x175   :  { %v718_v52 = vpop.permute.xlu0 %717  ;;  %v720_v54 = vpop.permute.xlu1 %719 }
 0x176   :  { %v2343_v50 = vmax.f32 %v2086_v58, %v718_v52  ;;  %v2350_v51 = vmax.f32 %v2100_v61, %v720_v54 }
 0x178   :  { %997 = vrot.lane.b32.xlu0 %v2343_v50, %s1848_s0  ;;  %943 = vrot.lane.b32.xlu1 %v2340_v48, %s1848_s0 }
 0x179   :  { %v658_v55 = vpop.permute.xlu0 %657  ;;  %v660_v56 = vpop.permute.xlu1 %659 }
 0x17a   :  { %v2353_v49 = vmax.f32 %v2084_v57, %v658_v55  ;;  %v2360_v53 = vmax.f32 %v2106_v62, %v660_v56 }
 0x17c   :  { %937 = vrot.lane.b32.xlu0 %v2353_v49, %s1848_s0  ;;  %999 = vrot.lane.b32.xlu1 %v2350_v51, %s1848_s0 }
 0x17d   :  { %v714_v58 = vpop.permute.xlu0 %713  ;;  %v716_v59 = vpop.permute.xlu1 %715 }
 0x17e   :  { %v2363_v52 = vmax.f32 %v2094_v60, %v714_v58  ;;  %v2370_v54 = vmax.f32 %v2114_v0, %v716_v59 }
 0x180   :  { %993 = vrot.lane.b32.xlu0 %v2363_v52, %s1848_s0  ;;  %939 = vrot.lane.b32.xlu1 %v2360_v53, %s1848_s0 }
 0x181   :  { %v670_v57 = vpop.permute.xlu0 %669  ;;  %v672_v61 = vpop.permute.xlu1 %671 }
 0x182   :  { %v2373_v55 = vmax.f32 %v2108_v63, %v670_v57  ;;  %v2380_v56 = vmax.f32 %v2124_v3, %v672_v61 }
 0x184   :  { %949 = vrot.lane.b32.xlu0 %v2373_v55, %s1848_s0  ;;  %995 = vrot.lane.b32.xlu1 %v2370_v54, %s1848_s0 }
 0x185   :  { %v726_v60 = vpop.permute.xlu0 %725  ;;  %v728_v62 = vpop.permute.xlu1 %727 }
 0x186   :  { %v2383_v58 = vmax.f32 %v2118_v2, %v726_v60  ;;  %v2390_v59 = vmax.f32 %v2132_v5, %v728_v62 }
 0x188   :  { %1005 = vrot.lane.b32.xlu0 %v2383_v58, %s1848_s0  ;;  %951 = vrot.lane.b32.xlu1 %v2380_v56, %s1848_s0 }
 0x189   :  { %v666_v63 = vpop.permute.xlu0 %665  ;;  %v668_v0 = vpop.permute.xlu1 %667 }
 0x18a   :  { %v2393_v57 = vmax.f32 %v2116_v1, %v666_v63  ;;  %v2400_v61 = vmax.f32 %v2138_v6, %v668_v0 }
 0x18c   :  { %945 = vrot.lane.b32.xlu0 %v2393_v57, %s1848_s0  ;;  %1007 = vrot.lane.b32.xlu1 %v2390_v59, %s1848_s0 }
 0x18d   :  { %v722_v2 = vpop.permute.xlu0 %721  ;;  %v724_v3 = vpop.permute.xlu1 %723 }
 0x18e   :  { %v2403_v60 = vmax.f32 %v2126_v4, %v722_v2  ;;  %v2410_v62 = vmax.f32 %v2146_v8, %v724_v3 }
 0x190   :  { %1001 = vrot.lane.b32.xlu0 %v2403_v60, %s1848_s0  ;;  %947 = vrot.lane.b32.xlu1 %v2400_v61, %s1848_s0 }
 0x191   :  { %v678_v1 = vpop.permute.xlu0 %677  ;;  %v680_v5 = vpop.permute.xlu1 %679 }
 0x192   :  { %v2413_v63 = vmax.f32 %v2140_v7, %v678_v1  ;;  %v2420_v0 = vmax.f32 %v2156_v11, %v680_v5 }
 0x194   :  { %957 = vrot.lane.b32.xlu0 %v2413_v63, %s1848_s0  ;;  %1003 = vrot.lane.b32.xlu1 %v2410_v62, %s1848_s0 }
 0x195   :  { %v734_v4 = vpop.permute.xlu0 %733  ;;  %v736_v6 = vpop.permute.xlu1 %735 }
 0x196   :  { %v2423_v2 = vmax.f32 %v2150_v10, %v734_v4  ;;  %v2430_v3 = vmax.f32 %v2164_v13, %v736_v6 }
 0x198   :  { %1013 = vrot.lane.b32.xlu0 %v2423_v2, %s1848_s0  ;;  %959 = vrot.lane.b32.xlu1 %v2420_v0, %s1848_s0 }
 0x199   :  { %v674_v7 = vpop.permute.xlu0 %673  ;;  %v676_v8 = vpop.permute.xlu1 %675 }
 0x19a   :  { %v2433_v1 = vmax.f32 %v2148_v9, %v674_v7  ;;  %v2440_v5 = vmax.f32 %v2170_v14, %v676_v8 }
 0x19c   :  { %953 = vrot.lane.b32.xlu0 %v2433_v1, %s1848_s0  ;;  %1015 = vrot.lane.b32.xlu1 %v2430_v3, %s1848_s0 }
 0x19d   :  { %v730_v10 = vpop.permute.xlu0 %729  ;;  %v732_v11 = vpop.permute.xlu1 %731 }
 0x19e   :  { %v2443_v4 = vmax.f32 %v2158_v12, %v730_v10  ;;  %v2450_v6 = vmax.f32 %v2178_v16, %v732_v11 }
 0x1a0   :  { %1009 = vrot.lane.b32.xlu0 %v2443_v4, %s1848_s0  ;;  %955 = vrot.lane.b32.xlu1 %v2440_v5, %s1848_s0 }
 0x1a1   :  { %v686_v9 = vpop.permute.xlu0 %685  ;;  %v688_v13 = vpop.permute.xlu1 %687 }
 0x1a2   :  { %v2453_v7 = vmax.f32 %v2172_v15, %v686_v9  ;;  %v2460_v8 = vmax.f32 %v2188_v19, %v688_v13 }
 0x1a4   :  { %965 = vrot.lane.b32.xlu0 %v2453_v7, %s1848_s0  ;;  %1011 = vrot.lane.b32.xlu1 %v2450_v6, %s1848_s0  ;;  %2847 = vst [vmem:[#allocation3_spill] sm:$0xff] %v2460_v8 }
 0x1a5   :  { %v742_v12 = vpop.permute.xlu0 %741  ;;  %v744_v14 = vpop.permute.xlu1 %743 }
 0x1a8   :  { %967 = vrot.lane.b32.xlu1 %v2460_v8, %s1848_s0 }
 0x1a9   :  { %v682_v10 = vpop.permute.xlu0 %681  ;;  %v684_v16 = vpop.permute.xlu1 %683 }
 0x1aa   :  { %v2465_v11 = vmax.f32 %v2180_v17, %v682_v10  ;;  %v2468_v15 = vmax.f32 %v2202_v22, %v684_v16  ;;  %v2485_v17 = vmax.f32 %v2182_v18, %v742_v12  ;;  %v2488_v22 = vmax.f32 %v2196_v21, %v744_v14  ;;  %v2853_v10 = vld [vmem:[#allocation2_spill] sm:$0xff] }
 0x1ac   :  { %2848 = vst [vmem:[#allocation4_spill] sm:$0xff] %v2468_v15  ;;  %961 = vrot.lane.b32.xlu0 %v2465_v11, %s1848_s0  ;;  %963 = vrot.lane.b32.xlu1 %v2468_v15, %s1848_s0  ;;  %2851 = vst [vmem:[#allocation7_spill] sm:$0xff] %v2485_v17 }
 0x1ad   :  { %v738_v9 = vpop.permute.xlu0 %737  ;;  %v740_v19 = vpop.permute.xlu1 %739  ;;  %2852 = vst [vmem:[#allocation8_spill] sm:$0xff] %v2488_v22 }
 0x1ae   :  { %v2475_v13 = vmax.f32 %v2190_v20, %v738_v9  ;;  %v2478_v8 = vmax.f32 %v2208_v23, %v740_v19  ;;  %v2497_v20 = vld [vmem:[%s2837_s2] ss:$0 sm:$0xff] }
 0x1b0   :  { %2849 = vst [vmem:[#allocation5_spill] sm:$0xff] %v2475_v13  ;;  %2850 = vst [vmem:[#allocation6_spill] sm:$0xff] %v2478_v8  ;;  %1017 = vrot.lane.b32.xlu0 %v2475_v13, %s1848_s0  ;;  %1019 = vrot.lane.b32.xlu1 %v2478_v8, %s1848_s0 }
 0x1b4   :  { %1021 = vrot.lane.b32.xlu0 %v2485_v17, %s1848_s0  ;;  %1023 = vrot.lane.b32.xlu1 %v2488_v22, %s1848_s0 }
 0x1b6   :  { %v918_v23 = vpop.permute.xlu0 %917 }
 0x1b7   :  { %v1083_v16 = vmax.f32 %v2853_v10, %v918_v23 }
 0x1b9   :  { %v1146_v18 = vadd.f32 %v2497_v20, %v1083_v16 }
 0x1ba   :  { %v974_v12 = vpop.permute.xlu0 %973  ;;  %v920_v9 = vpop.permute.xlu1 %919 }
 0x1bb   :  { %v1202_v21 = vmax.f32 %v1146_v18, 0.0  ;;  %v1111_v14 = vmax.f32 %v2220_v29, %v974_v12  ;;  %v1084_v19 = vmax.f32 %v2223_v30, %v920_v9 }
 0x1bd   :  { %v1659_v17 = vpack.c.bf16 %v1202_v21, %v1202_v21  ;;  %v1174_v22 = vadd.f32 %v2497_v20, %v1111_v14  ;;  %v1147_v8 = vadd.f32 %v2497_v20, %v1084_v19 }
 0x1be   :  { %v914_v13 = vpop.permute.xlu0 %913  ;;  %v976_v15 = vpop.permute.xlu1 %975 }
 0x1bf   :  { %1483 = vst.msk [vmem:[%s2838_s3 + $0x8] sm:$0xf] %vm1480_vm2, %v1659_v17  ;;  %v1230_v23 = vmax.f32 %v1174_v22, 0.0  ;;  %v1203_v10 = vmax.f32 %v1147_v8, 0.0  ;;  %v1081_v16 = vmax.f32 %v2230_v25, %v914_v13  ;;  %v1112_v29 = vmax.f32 %v2233_v26, %v976_v15 }
 0x1c1   :  { %v1687_v30 = vpack.c.bf16 %v1230_v23, %v1230_v23  ;;  %v1660_v18 = vpack.c.bf16 %v1203_v10, %v1203_v10  ;;  %v1144_v12 = vadd.f32 %v2497_v20, %v1081_v16  ;;  %v1175_v9 = vadd.f32 %v2497_v20, %v1112_v29 }
 0x1c2   :  { %v970_v21 = vpop.permute.xlu0 %969  ;;  %v916_v14 = vpop.permute.xlu1 %915 }
 0x1c3   :  { %1511 = vst.msk [vmem:[%s2838_s3 + $0x78] sm:$0xf] %vm1480_vm2, %v1687_v30  ;;  %1484 = vst.msk [vmem:[%s2838_s3 + $0xc] sm:$0xf] %vm1480_vm2, %v1660_v18  ;;  %v1200_v25 = vmax.f32 %v1144_v12, 0.0  ;;  %v1231_v26 = vmax.f32 %v1175_v9, 0.0  ;;  %v1109_v8 = vmax.f32 %v2240_v24, %v970_v21  ;;  %v1082_v15 = vmax.f32 %v2243_v28, %v916_v14 }
 0x1c5   :  { %v1657_v13 = vpack.c.bf16 %v1200_v25, %v1200_v25  ;;  %v1688_v17 = vpack.c.bf16 %v1231_v26, %v1231_v26  ;;  %v1172_v22 = vadd.f32 %v2497_v20, %v1109_v8  ;;  %v1145_v19 = vadd.f32 %v2497_v20, %v1082_v15 }
 0x1c6   :  { %v926_v23 = vpop.permute.xlu0 %925  ;;  %v972_v10 = vpop.permute.xlu1 %971 }
 0x1c7   :  { %1481 = vst.msk [vmem:[%s2838_s3] sm:$0xf] %vm1480_vm2, %v1657_v13  ;;  %1512 = vst.msk [vmem:[%s2838_s3 + $0x7c] sm:$0xf] %vm1480_vm2, %v1688_v17  ;;  %v1228_v24 = vmax.f32 %v1172_v22, 0.0  ;;  %v1201_v28 = vmax.f32 %v1145_v19, 0.0  ;;  %v1087_v16 = vmax.f32 %v2253_v32, %v926_v23  ;;  %v1110_v29 = vmax.f32 %v2250_v27, %v972_v10 }
 0x1c9   :  { %v1685_v30 = vpack.c.bf16 %v1228_v24, %v1228_v24  ;;  %v1658_v18 = vpack.c.bf16 %v1201_v28, %v1201_v28  ;;  %v1150_v12 = vadd.f32 %v2497_v20, %v1087_v16  ;;  %v1173_v9 = vadd.f32 %v2497_v20, %v1110_v29 }
 0x1ca   :  { %v982_v21 = vpop.permute.xlu0 %981  ;;  %v928_v14 = vpop.permute.xlu1 %927 }
 0x1cb   :  { %1509 = vst.msk [vmem:[%s2838_s3 + $0x70] sm:$0xf] %vm1480_vm2, %v1685_v30  ;;  %1482 = vst.msk [vmem:[%s2838_s3 + $0x4] sm:$0xf] %vm1480_vm2, %v1658_v18  ;;  %v1206_v32 = vmax.f32 %v1150_v12, 0.0  ;;  %v1229_v27 = vmax.f32 %v1173_v9, 0.0  ;;  %v1115_v25 = vmax.f32 %v2263_v36, %v982_v21  ;;  %v1088_v26 = vmax.f32 %v2260_v31, %v928_v14 }
 0x1cd   :  { %v1663_v8 = vpack.c.bf16 %v1206_v32, %v1206_v32  ;;  %v1686_v15 = vpack.c.bf16 %v1229_v27, %v1229_v27  ;;  %v1178_v13 = vadd.f32 %v2497_v20, %v1115_v25  ;;  %v1151_v17 = vadd.f32 %v2497_v20, %v1088_v26 }
 0x1ce   :  { %v922_v22 = vpop.permute.xlu0 %921  ;;  %v984_v19 = vpop.permute.xlu1 %983 }
 0x1cf   :  { %1487 = vst.msk [vmem:[%s2838_s3 + $0x18] sm:$0xf] %vm1480_vm2, %v1663_v8  ;;  %1510 = vst.msk [vmem:[%s2838_s3 + $0x74] sm:$0xf] %vm1480_vm2, %v1686_v15  ;;  %v1234_v36 = vmax.f32 %v1178_v13, 0.0  ;;  %v1207_v31 = vmax.f32 %v1151_v17, 0.0  ;;  %v1085_v23 = vmax.f32 %v2273_v34, %v922_v22  ;;  %v1116_v10 = vmax.f32 %v2270_v33, %v984_v19 }
 0x1d1   :  { %v1691_v24 = vpack.c.bf16 %v1234_v36, %v1234_v36  ;;  %v1664_v28 = vpack.c.bf16 %v1207_v31, %v1207_v31  ;;  %v1148_v16 = vadd.f32 %v2497_v20, %v1085_v23  ;;  %v1179_v29 = vadd.f32 %v2497_v20, %v1116_v10 }
 0x1d2   :  { %v978_v30 = vpop.permute.xlu0 %977  ;;  %v924_v18 = vpop.permute.xlu1 %923 }
 0x1d3   :  { %1515 = vst.msk [vmem:[%s2838_s3 + $0x88] sm:$0xf] %vm1480_vm2, %v1691_v24  ;;  %1488 = vst.msk [vmem:[%s2838_s3 + $0x1c] sm:$0xf] %vm1480_vm2, %v1664_v28  ;;  %v1204_v34 = vmax.f32 %v1148_v16, 0.0  ;;  %v1235_v33 = vmax.f32 %v1179_v29, 0.0  ;;  %v1113_v12 = vmax.f32 %v2283_v35, %v978_v30  ;;  %v1086_v9 = vmax.f32 %v2280_v37, %v924_v18 }
 0x1d5   :  { %v1661_v21 = vpack.c.bf16 %v1204_v34, %v1204_v34  ;;  %v1692_v14 = vpack.c.bf16 %v1235_v33, %v1235_v33  ;;  %v1176_v32 = vadd.f32 %v2497_v20, %v1113_v12  ;;  %v1149_v27 = vadd.f32 %v2497_v20, %v1086_v9 }
 0x1d6   :  { %v934_v25 = vpop.permute.xlu0 %933  ;;  %v980_v26 = vpop.permute.xlu1 %979 }
 0x1d7   :  { %1485 = vst.msk [vmem:[%s2838_s3 + $0x10] sm:$0xf] %vm1480_vm2, %v1661_v21  ;;  %1516 = vst.msk [vmem:[%s2838_s3 + $0x8c] sm:$0xf] %vm1480_vm2, %v1692_v14  ;;  %v1232_v35 = vmax.f32 %v1176_v32, 0.0  ;;  %v1205_v37 = vmax.f32 %v1149_v27, 0.0  ;;  %v1091_v8 = vmax.f32 %v2293_v39, %v934_v25  ;;  %v1114_v15 = vmax.f32 %v2290_v38, %v980_v26 }
 0x1d9   :  { %v1689_v13 = vpack.c.bf16 %v1232_v35, %v1232_v35  ;;  %v1662_v17 = vpack.c.bf16 %v1205_v37, %v1205_v37  ;;  %v1154_v22 = vadd.f32 %v2497_v20, %v1091_v8  ;;  %v1177_v19 = vadd.f32 %v2497_v20, %v1114_v15 }
 0x1da   :  { %v990_v36 = vpop.permute.xlu0 %989  ;;  %v936_v31 = vpop.permute.xlu1 %935 }
 0x1db   :  { %1513 = vst.msk [vmem:[%s2838_s3 + $0x80] sm:$0xf] %vm1480_vm2, %v1689_v13  ;;  %1486 = vst.msk [vmem:[%s2838_s3 + $0x14] sm:$0xf] %vm1480_vm2, %v1662_v17  ;;  %v1210_v39 = vmax.f32 %v1154_v22, 0.0  ;;  %v1233_v38 = vmax.f32 %v1177_v19, 0.0  ;;  %v1119_v23 = vmax.f32 %v2303_v42, %v990_v36  ;;  %v1092_v10 = vmax.f32 %v2300_v40, %v936_v31 }
 0x1dd   :  { %v1667_v24 = vpack.c.bf16 %v1210_v39, %v1210_v39  ;;  %v1690_v28 = vpack.c.bf16 %v1233_v38, %v1233_v38  ;;  %v1182_v16 = vadd.f32 %v2497_v20, %v1119_v23  ;;  %v1155_v29 = vadd.f32 %v2497_v20, %v1092_v10 }
 0x1de   :  { %v930_v30 = vpop.permute.xlu0 %929  ;;  %v992_v18 = vpop.permute.xlu1 %991 }
 0x1df   :  { %1491 = vst.msk [vmem:[%s2838_s3 + $0x28] sm:$0xf] %vm1480_vm2, %v1667_v24  ;;  %1514 = vst.msk [vmem:[%s2838_s3 + $0x84] sm:$0xf] %vm1480_vm2, %v1690_v28  ;;  %v1238_v42 = vmax.f32 %v1182_v16, 0.0  ;;  %v1211_v40 = vmax.f32 %v1155_v29, 0.0  ;;  %v1089_v34 = vmax.f32 %v2313_v41, %v930_v30  ;;  %v1120_v33 = vmax.f32 %v2310_v43, %v992_v18 }
 0x1e1   :  { %v1695_v12 = vpack.c.bf16 %v1238_v42, %v1238_v42  ;;  %v1668_v9 = vpack.c.bf16 %v1211_v40, %v1211_v40  ;;  %v1152_v21 = vadd.f32 %v2497_v20, %v1089_v34  ;;  %v1183_v14 = vadd.f32 %v2497_v20, %v1120_v33 }
 0x1e2   :  { %v986_v32 = vpop.permute.xlu0 %985  ;;  %v932_v27 = vpop.permute.xlu1 %931 }
 0x1e3   :  { %1519 = vst.msk [vmem:[%s2838_s3 + $0x98] sm:$0xf] %vm1480_vm2, %v1695_v12  ;;  %1492 = vst.msk [vmem:[%s2838_s3 + $0x2c] sm:$0xf] %vm1480_vm2, %v1668_v9  ;;  %v1208_v41 = vmax.f32 %v1152_v21, 0.0  ;;  %v1239_v43 = vmax.f32 %v1183_v14, 0.0  ;;  %v1117_v25 = vmax.f32 %v2323_v44, %v986_v32  ;;  %v1090_v26 = vmax.f32 %v2320_v45, %v932_v27 }
 0x1e5   :  { %v1665_v35 = vpack.c.bf16 %v1208_v41, %v1208_v41  ;;  %v1696_v37 = vpack.c.bf16 %v1239_v43, %v1239_v43  ;;  %v1180_v8 = vadd.f32 %v2497_v20, %v1117_v25  ;;  %v1153_v15 = vadd.f32 %v2497_v20, %v1090_v26 }
 0x1e6   :  { %v942_v13 = vpop.permute.xlu0 %941  ;;  %v988_v17 = vpop.permute.xlu1 %987 }
 0x1e7   :  { %1489 = vst.msk [vmem:[%s2838_s3 + $0x20] sm:$0xf] %vm1480_vm2, %v1665_v35  ;;  %1520 = vst.msk [vmem:[%s2838_s3 + $0x9c] sm:$0xf] %vm1480_vm2, %v1696_v37  ;;  %v1236_v44 = vmax.f32 %v1180_v8, 0.0  ;;  %v1209_v45 = vmax.f32 %v1153_v15, 0.0  ;;  %v1095_v22 = vmax.f32 %v2333_v47, %v942_v13  ;;  %v1118_v19 = vmax.f32 %v2330_v46, %v988_v17 }
 0x1e9   :  { %v1693_v36 = vpack.c.bf16 %v1236_v44, %v1236_v44  ;;  %v1666_v31 = vpack.c.bf16 %v1209_v45, %v1209_v45  ;;  %v1158_v39 = vadd.f32 %v2497_v20, %v1095_v22  ;;  %v1181_v38 = vadd.f32 %v2497_v20, %v1118_v19 }
 0x1ea   :  { %v998_v23 = vpop.permute.xlu0 %997  ;;  %v944_v10 = vpop.permute.xlu1 %943 }
 0x1eb   :  { %1517 = vst.msk [vmem:[%s2838_s3 + $0x90] sm:$0xf] %vm1480_vm2, %v1693_v36  ;;  %1490 = vst.msk [vmem:[%s2838_s3 + $0x24] sm:$0xf] %vm1480_vm2, %v1666_v31  ;;  %v1214_v47 = vmax.f32 %v1158_v39, 0.0  ;;  %v1237_v46 = vmax.f32 %v1181_v38, 0.0  ;;  %v1123_v24 = vmax.f32 %v2343_v50, %v998_v23  ;;  %v1096_v28 = vmax.f32 %v2340_v48, %v944_v10 }
 0x1ed   :  { %v1671_v16 = vpack.c.bf16 %v1214_v47, %v1214_v47  ;;  %v1694_v29 = vpack.c.bf16 %v1237_v46, %v1237_v46  ;;  %v1186_v30 = vadd.f32 %v2497_v20, %v1123_v24  ;;  %v1159_v18 = vadd.f32 %v2497_v20, %v1096_v28 }
 0x1ee   :  { %v938_v42 = vpop.permute.xlu0 %937  ;;  %v1000_v40 = vpop.permute.xlu1 %999 }
 0x1ef   :  { %1495 = vst.msk [vmem:[%s2838_s3 + $0x38] sm:$0xf] %vm1480_vm2, %v1671_v16  ;;  %1518 = vst.msk [vmem:[%s2838_s3 + $0x94] sm:$0xf] %vm1480_vm2, %v1694_v29  ;;  %v1242_v50 = vmax.f32 %v1186_v30, 0.0  ;;  %v1215_v48 = vmax.f32 %v1159_v18, 0.0  ;;  %v1093_v34 = vmax.f32 %v2353_v49, %v938_v42  ;;  %v1124_v33 = vmax.f32 %v2350_v51, %v1000_v40 }
 0x1f1   :  { %v1699_v12 = vpack.c.bf16 %v1242_v50, %v1242_v50  ;;  %v1672_v9 = vpack.c.bf16 %v1215_v48, %v1215_v48  ;;  %v1156_v21 = vadd.f32 %v2497_v20, %v1093_v34  ;;  %v1187_v14 = vadd.f32 %v2497_v20, %v1124_v33 }
 0x1f2   :  { %v994_v32 = vpop.permute.xlu0 %993  ;;  %v940_v27 = vpop.permute.xlu1 %939 }
 0x1f3   :  { %1523 = vst.msk [vmem:[%s2838_s3 + $0xa8] sm:$0xf] %vm1480_vm2, %v1699_v12  ;;  %1496 = vst.msk [vmem:[%s2838_s3 + $0x3c] sm:$0xf] %vm1480_vm2, %v1672_v9  ;;  %v1212_v49 = vmax.f32 %v1156_v21, 0.0  ;;  %v1243_v51 = vmax.f32 %v1187_v14, 0.0  ;;  %v1121_v41 = vmax.f32 %v2363_v52, %v994_v32  ;;  %v1094_v43 = vmax.f32 %v2360_v53, %v940_v27 }
 0x1f5   :  { %v1669_v25 = vpack.c.bf16 %v1212_v49, %v1212_v49  ;;  %v1700_v26 = vpack.c.bf16 %v1243_v51, %v1243_v51  ;;  %v1184_v35 = vadd.f32 %v2497_v20, %v1121_v41  ;;  %v1157_v37 = vadd.f32 %v2497_v20, %v1094_v43 }
 0x1f6   :  { %v950_v8 = vpop.permute.xlu0 %949  ;;  %v996_v15 = vpop.permute.xlu1 %995 }
 0x1f7   :  { %1493 = vst.msk [vmem:[%s2838_s3 + $0x30] sm:$0xf] %vm1480_vm2, %v1669_v25  ;;  %1524 = vst.msk [vmem:[%s2838_s3 + $0xac] sm:$0xf] %vm1480_vm2, %v1700_v26  ;;  %v1240_v52 = vmax.f32 %v1184_v35, 0.0  ;;  %v1213_v53 = vmax.f32 %v1157_v37, 0.0  ;;  %v1099_v13 = vmax.f32 %v2373_v55, %v950_v8  ;;  %v1122_v17 = vmax.f32 %v2370_v54, %v996_v15 }
 0x1f9   :  { %v1697_v44 = vpack.c.bf16 %v1240_v52, %v1240_v52  ;;  %v1670_v45 = vpack.c.bf16 %v1213_v53, %v1213_v53  ;;  %v1162_v22 = vadd.f32 %v2497_v20, %v1099_v13  ;;  %v1185_v19 = vadd.f32 %v2497_v20, %v1122_v17 }
 0x1fa   :  { %v1006_v36 = vpop.permute.xlu0 %1005  ;;  %v952_v31 = vpop.permute.xlu1 %951 }
 0x1fb   :  { %1521 = vst.msk [vmem:[%s2838_s3 + $0xa0] sm:$0xf] %vm1480_vm2, %v1697_v44  ;;  %1494 = vst.msk [vmem:[%s2838_s3 + $0x34] sm:$0xf] %vm1480_vm2, %v1670_v45  ;;  %v1218_v55 = vmax.f32 %v1162_v22, 0.0  ;;  %v1241_v54 = vmax.f32 %v1185_v19, 0.0  ;;  %v1127_v39 = vmax.f32 %v2383_v58, %v1006_v36  ;;  %v1100_v38 = vmax.f32 %v2380_v56, %v952_v31 }
 0x1fd   :  { %v1675_v23 = vpack.c.bf16 %v1218_v55, %v1218_v55  ;;  %v1698_v10 = vpack.c.bf16 %v1241_v54, %v1241_v54  ;;  %v1190_v47 = vadd.f32 %v2497_v20, %v1127_v39  ;;  %v1163_v46 = vadd.f32 %v2497_v20, %v1100_v38 }
 0x1fe   :  { %v946_v24 = vpop.permute.xlu0 %945  ;;  %v1008_v28 = vpop.permute.xlu1 %1007 }
 0x1ff   :  { %1499 = vst.msk [vmem:[%s2838_s3 + $0x48] sm:$0xf] %vm1480_vm2, %v1675_v23  ;;  %1522 = vst.msk [vmem:[%s2838_s3 + $0xa4] sm:$0xf] %vm1480_vm2, %v1698_v10  ;;  %v1246_v58 = vmax.f32 %v1190_v47, 0.0  ;;  %v1219_v56 = vmax.f32 %v1163_v46, 0.0  ;;  %v1097_v16 = vmax.f32 %v2393_v57, %v946_v24  ;;  %v1128_v29 = vmax.f32 %v2390_v59, %v1008_v28 }
 0x201   :  { %v1703_v30 = vpack.c.bf16 %v1246_v58, %v1246_v58  ;;  %v1676_v18 = vpack.c.bf16 %v1219_v56, %v1219_v56  ;;  %v1160_v42 = vadd.f32 %v2497_v20, %v1097_v16  ;;  %v1191_v40 = vadd.f32 %v2497_v20, %v1128_v29 }
 0x202   :  { %v1002_v50 = vpop.permute.xlu0 %1001  ;;  %v948_v48 = vpop.permute.xlu1 %947 }
 0x203   :  { %1527 = vst.msk [vmem:[%s2838_s3 + $0xb8] sm:$0xf] %vm1480_vm2, %v1703_v30  ;;  %1500 = vst.msk [vmem:[%s2838_s3 + $0x4c] sm:$0xf] %vm1480_vm2, %v1676_v18  ;;  %v1216_v57 = vmax.f32 %v1160_v42, 0.0  ;;  %v1247_v59 = vmax.f32 %v1191_v40, 0.0  ;;  %v1125_v34 = vmax.f32 %v2403_v60, %v1002_v50  ;;  %v1098_v33 = vmax.f32 %v2400_v61, %v948_v48 }
 0x205   :  { %v1673_v12 = vpack.c.bf16 %v1216_v57, %v1216_v57  ;;  %v1704_v9 = vpack.c.bf16 %v1247_v59, %v1247_v59  ;;  %v1188_v21 = vadd.f32 %v2497_v20, %v1125_v34  ;;  %v1161_v14 = vadd.f32 %v2497_v20, %v1098_v33 }
 0x206   :  { %v958_v32 = vpop.permute.xlu0 %957  ;;  %v1004_v27 = vpop.permute.xlu1 %1003 }
 0x207   :  { %1497 = vst.msk [vmem:[%s2838_s3 + $0x40] sm:$0xf] %vm1480_vm2, %v1673_v12  ;;  %1528 = vst.msk [vmem:[%s2838_s3 + $0xbc] sm:$0xf] %vm1480_vm2, %v1704_v9  ;;  %v1244_v60 = vmax.f32 %v1188_v21, 0.0  ;;  %v1217_v61 = vmax.f32 %v1161_v14, 0.0  ;;  %v1103_v49 = vmax.f32 %v2413_v63, %v958_v32  ;;  %v1126_v51 = vmax.f32 %v2410_v62, %v1004_v27 }
 0x208   :  { %v2855_v32 = vld [vmem:[#allocation4_spill] sm:$0xff] }
 0x209   :  { %v1701_v41 = vpack.c.bf16 %v1244_v60, %v1244_v60  ;;  %v1674_v43 = vpack.c.bf16 %v1217_v61, %v1217_v61  ;;  %v1166_v25 = vadd.f32 %v2497_v20, %v1103_v49  ;;  %v1189_v26 = vadd.f32 %v2497_v20, %v1126_v51 }
 0x20a   :  { %v1014_v35 = vpop.permute.xlu0 %1013  ;;  %v960_v37 = vpop.permute.xlu1 %959 }
 0x20b   :  { %1525 = vst.msk [vmem:[%s2838_s3 + $0xb0] sm:$0xf] %vm1480_vm2, %v1701_v41  ;;  %1498 = vst.msk [vmem:[%s2838_s3 + $0x44] sm:$0xf] %vm1480_vm2, %v1674_v43  ;;  %v1222_v63 = vmax.f32 %v1166_v25, 0.0  ;;  %v1245_v62 = vmax.f32 %v1189_v26, 0.0  ;;  %v1131_v8 = vmax.f32 %v2423_v2, %v1014_v35  ;;  %v1104_v15 = vmax.f32 %v2420_v0, %v960_v37 }
 0x20c   :  { %v2856_v26 = vld [vmem:[#allocation5_spill] sm:$0xff]  ;;  %v2857_v37 = vld [vmem:[#allocation6_spill] sm:$0xff] }
 0x20d   :  { %v1679_v52 = vpack.c.bf16 %v1222_v63, %v1222_v63  ;;  %v1702_v53 = vpack.c.bf16 %v1245_v62, %v1245_v62  ;;  %v1194_v13 = vadd.f32 %v2497_v20, %v1131_v8  ;;  %v1167_v17 = vadd.f32 %v2497_v20, %v1104_v15 }
 0x20e   :  { %v954_v44 = vpop.permute.xlu0 %953  ;;  %v1016_v45 = vpop.permute.xlu1 %1015 }
 0x20f   :  { %1503 = vst.msk [vmem:[%s2838_s3 + $0x58] sm:$0xf] %vm1480_vm2, %v1679_v52  ;;  %1526 = vst.msk [vmem:[%s2838_s3 + $0xb4] sm:$0xf] %vm1480_vm2, %v1702_v53  ;;  %v1250_v2 = vmax.f32 %v1194_v13, 0.0  ;;  %v1223_v0 = vmax.f32 %v1167_v17, 0.0  ;;  %v1101_v22 = vmax.f32 %v2433_v1, %v954_v44  ;;  %v1132_v19 = vmax.f32 %v2430_v3, %v1016_v45 }
 0x210   :  { %v2858_v44 = vld [vmem:[#allocation7_spill] sm:$0xff] }
 0x211   :  { %v1707_v36 = vpack.c.bf16 %v1250_v2, %v1250_v2  ;;  %v1680_v31 = vpack.c.bf16 %v1223_v0, %v1223_v0  ;;  %v1164_v55 = vadd.f32 %v2497_v20, %v1101_v22  ;;  %v1195_v54 = vadd.f32 %v2497_v20, %v1132_v19  ;;  %v2859_v2 = vld [vmem:[#allocation8_spill] sm:$0xff] }
 0x212   :  { %v1010_v39 = vpop.permute.xlu0 %1009  ;;  %v956_v38 = vpop.permute.xlu1 %955 }
 0x213   :  { %1531 = vst.msk [vmem:[%s2838_s3 + $0xc8] sm:$0xf] %vm1480_vm2, %v1707_v36  ;;  %1504 = vst.msk [vmem:[%s2838_s3 + $0x5c] sm:$0xf] %vm1480_vm2, %v1680_v31  ;;  %v1220_v1 = vmax.f32 %v1164_v55, 0.0  ;;  %v1251_v3 = vmax.f32 %v1195_v54, 0.0  ;;  %v1129_v23 = vmax.f32 %v2443_v4, %v1010_v39  ;;  %v1102_v10 = vmax.f32 %v2440_v5, %v956_v38 }
 0x215   :  { %v1677_v47 = vpack.c.bf16 %v1220_v1, %v1220_v1  ;;  %v1708_v46 = vpack.c.bf16 %v1251_v3, %v1251_v3  ;;  %v1192_v24 = vadd.f32 %v2497_v20, %v1129_v23  ;;  %v1165_v28 = vadd.f32 %v2497_v20, %v1102_v10 }
 0x216   :  { %v966_v58 = vpop.permute.xlu0 %965  ;;  %v1012_v56 = vpop.permute.xlu1 %1011 }
 0x217   :  { %1501 = vst.msk [vmem:[%s2838_s3 + $0x50] sm:$0xf] %vm1480_vm2, %v1677_v47  ;;  %1532 = vst.msk [vmem:[%s2838_s3 + $0xcc] sm:$0xf] %vm1480_vm2, %v1708_v46  ;;  %v1248_v4 = vmax.f32 %v1192_v24, 0.0  ;;  %v1221_v5 = vmax.f32 %v1165_v28, 0.0  ;;  %v1107_v16 = vmax.f32 %v2453_v7, %v966_v58  ;;  %v1130_v29 = vmax.f32 %v2450_v6, %v1012_v56 }
 0x218   :  { %v2854_v6 = vld [vmem:[#allocation3_spill] sm:$0xff] }
 0x219   :  { %v1705_v30 = vpack.c.bf16 %v1248_v4, %v1248_v4  ;;  %v1678_v18 = vpack.c.bf16 %v1221_v5, %v1221_v5  ;;  %v1170_v42 = vadd.f32 %v2497_v20, %v1107_v16  ;;  %v1193_v40 = vadd.f32 %v2497_v20, %v1130_v29 }
 0x21a   :  { %v968_v50 = vpop.permute.xlu1 %967 }
 0x21b   :  { %1529 = vst.msk [vmem:[%s2838_s3 + $0xc0] sm:$0xf] %vm1480_vm2, %v1705_v30  ;;  %1502 = vst.msk [vmem:[%s2838_s3 + $0x54] sm:$0xf] %vm1480_vm2, %v1678_v18  ;;  %v1226_v7 = vmax.f32 %v1170_v42, 0.0  ;;  %v1249_v48 = vmax.f32 %v1193_v40, 0.0  ;;  %v1108_v57 = vmax.f32 %v2854_v6, %v968_v50 }
 0x21d   :  { %v1683_v59 = vpack.c.bf16 %v1226_v7, %v1226_v7  ;;  %v1706_v34 = vpack.c.bf16 %v1249_v48, %v1249_v48  ;;  %v1171_v33 = vadd.f32 %v2497_v20, %v1108_v57 }
 0x21e   :  { %v962_v12 = vpop.permute.xlu0 %961  ;;  %v964_v9 = vpop.permute.xlu1 %963 }
 0x21f   :  { %1507 = vst.msk [vmem:[%s2838_s3 + $0x68] sm:$0xf] %vm1480_vm2, %v1683_v59  ;;  %1530 = vst.msk [vmem:[%s2838_s3 + $0xc4] sm:$0xf] %vm1480_vm2, %v1706_v34  ;;  %v1227_v21 = vmax.f32 %v1171_v33, 0.0  ;;  %v1105_v14 = vmax.f32 %v2465_v11, %v962_v12  ;;  %v1106_v27 = vmax.f32 %v2855_v32, %v964_v9 }
 0x221   :  { %v1684_v60 = vpack.c.bf16 %v1227_v21, %v1227_v21  ;;  %v1168_v61 = vadd.f32 %v2497_v20, %v1105_v14  ;;  %v1169_v49 = vadd.f32 %v2497_v20, %v1106_v27 }
 0x222   :  { %v1018_v51 = vpop.permute.xlu0 %1017  ;;  %v1020_v41 = vpop.permute.xlu1 %1019 }
 0x223   :  { %1508 = vst.msk [vmem:[%s2838_s3 + $0x6c] sm:$0xf] %vm1480_vm2, %v1684_v60  ;;  %v1224_v43 = vmax.f32 %v1168_v61, 0.0  ;;  %v1225_v25 = vmax.f32 %v1169_v49, 0.0  ;;  %v1133_v35 = vmax.f32 %v2856_v26, %v1018_v51  ;;  %v1134_v11 = vmax.f32 %v2857_v37, %v1020_v41 }
 0x225   :  { %v1681_v63 = vpack.c.bf16 %v1224_v43, %v1224_v43  ;;  %v1682_v62 = vpack.c.bf16 %v1225_v25, %v1225_v25  ;;  %v1196_v8 = vadd.f32 %v2497_v20, %v1133_v35  ;;  %v1197_v15 = vadd.f32 %v2497_v20, %v1134_v11 }
 0x226   :  { %v1022_v52 = vpop.permute.xlu0 %1021  ;;  %v1024_v53 = vpop.permute.xlu1 %1023 }
 0x227   :  { %1505 = vst.msk [vmem:[%s2838_s3 + $0x60] sm:$0xf] %vm1480_vm2, %v1681_v63  ;;  %1506 = vst.msk [vmem:[%s2838_s3 + $0x64] sm:$0xf] %vm1480_vm2, %v1682_v62  ;;  %v1252_v13 = vmax.f32 %v1196_v8, 0.0  ;;  %v1253_v17 = vmax.f32 %v1197_v15, 0.0  ;;  %v1135_v45 = vmax.f32 %v2858_v44, %v1022_v52  ;;  %v1136_v0 = vmax.f32 %v2859_v2, %v1024_v53 }
 0x229   :  { %v1709_v22 = vpack.c.bf16 %v1252_v13, %v1252_v13  ;;  %v1710_v19 = vpack.c.bf16 %v1253_v17, %v1253_v17  ;;  %v1198_v36 = vadd.f32 %v2497_v20, %v1135_v45  ;;  %v1199_v31 = vadd.f32 %v2497_v20, %v1136_v0 }
 0x22b   :  { %1533 = vst.msk [vmem:[%s2838_s3 + $0xd0] sm:$0xf] %vm1480_vm2, %v1709_v22  ;;  %1534 = vst.msk [vmem:[%s2838_s3 + $0xd4] sm:$0xf] %vm1480_vm2, %v1710_v19  ;;  %v1254_v55 = vmax.f32 %v1198_v36, 0.0  ;;  %v1255_v54 = vmax.f32 %v1199_v31, 0.0 }
 0x22d   :  { %v1711_v39 = vpack.c.bf16 %v1254_v55, %v1254_v55  ;;  %v1712_v38 = vpack.c.bf16 %v1255_v54, %v1255_v54 }
 0x22f   :  { %1535 = vst.msk [vmem:[%s2838_s3 + $0xd8] sm:$0xf] %vm1480_vm2, %v1711_v39  ;;  %1536 = vst.msk [vmem:[%s2838_s3 + $0xdc] sm:$0xf] %vm1480_vm2, %v1712_v38 }

// kernel: fmnistnet_forward.5
= control target key start
LH: loop header
LB: loop body
LE: loop exit
PB: predicated region body
PF: predicated region fallthrough
CT: control target
= control target key end

     0   :  { %vm99_vm0 = vsmask.f32 7424  ;;  %vm349_vm1 = vsmask.f32 6400  ;;  %s1935_s7 = smov 64   ;;  %vm194_vm2 = vcmask 1046528   ;;  %s2868_s0 = inlined_call_operand.vmem [shape: bf16[2,90,64], index: 0, kind: input, shape index: {}]   ;;  %s2869_s1 = inlined_call_operand.vmem [shape: bf16[576,128], index: 1, kind: input, shape index: {}]   ;;  %s2870_s2 = inlined_call_operand.vmem [shape: f32[1,32], index: 2, kind: input, shape index: {}]   ;;  %s2871_s3 = inlined_call_operand.vmem [shape: bf16[2,64,32], index: 3, kind: output, shape index: {}]  }
   0x1   :  { %v1960_v0 = vld [vmem:[%s2868_s0 + $0x4] sm:$0xf]  ;;  %v17_v1 = vld [vmem:[%s2868_s0 + $0x8] sm:$0xf]  ;;  %v18_v2 = vld [vmem:[%s2868_s0 + $0xc] sm:$0xf] }
   0x2   :  { %v19_v3 = vld [vmem:[%s2868_s0 + $0x10] sm:$0xf]  ;;  %v20_v4 = vld [vmem:[%s2868_s0 + $0x14] sm:$0xf]  ;;  %v1587_v5 = vcombine.low %v1960_v0, %v17_v1  ;;  %v15_v6 = vld [vmem:[%s2868_s0] sm:$0xf]  ;;  %v1978_v7 = vcombine.low %v17_v1, %v18_v2 }
   0x3   :  { %v1980_v8 = vcombine.low %v19_v3, %v20_v4  ;;  %v1982_v9 = vcombine.low %v18_v2, %v19_v3  ;;  %v1985_v10 = vcombine.low %v15_v6, %v1960_v0  ;;  %v43_v11 = vld [vmem:[%s2868_s0 + $0x8] sm:$0xe]  ;;  %v39_v16 = vld [vmem:[%s2868_s0 + $0x4] sm:$0xe]  ;;  %v1892_v17 = vld [vmem:[%s2869_s1 + $0x78] sm:$0xff]   ;;  %vm550_vm3 = vcmask 1045504  }
   0x4   :  { %v232_v12 = vshrl.u32 %v1587_v5, 16  ;;  %v234_v13 = vshll.u32 %v1587_v5, 16  ;;  %v108_v14 = vshll.u32 %v1978_v7, 16  ;;  %v1991_v15 = vcombine.low %v43_v11, %v18_v2  ;;  %v21_v22 = vld [vmem:[%s2868_s0 + $0x18] sm:$0xf]  ;;  %1688 = vmatprep.subr.bf16.mxu0 %v1892_v17  ;;  %v1894_v59 = vld [vmem:[%s2869_s1 + $0x70] sm:$0xff]  }
   0x5   :  { %v239_v18 = vshll.u32 %v1982_v9, 16  ;;  %v101_v19 = vshrl.u32 %v1985_v10, 16  ;;  %v103_v20 = vshll.u32 %v1985_v10, 16  ;;  %v116_v21 = vshll.u32 %v1980_v8, 16  ;;  %v22_v27 = vld [vmem:[%s2868_s0 + $0x1c] sm:$0xf] }
   0x6   :  { %v236_v23 = vrot.slane %v234_v13, 1  ;;  %v110_v24 = vrot.slane %v108_v14, 1  ;;  %v120_v25 = vshrl.u32 %v1980_v8, 16  ;;  %v461_v26 = vshrl.u32 %v1991_v15, 16  ;;  %v1893_v48 = vld [vmem:[%s2869_s1 + $0x38] sm:$0xff]  }
   0x7   :  { %v241_v28 = vrot.slane %v239_v18, 1  ;;  %v105_v29 = vrot.slane %v103_v20, 1  ;;  %v464_v30 = vshll.u32 %v1991_v15, 16  ;;  %v469_v31 = vrot.slane %v116_v21, 2  ;;  %v35_v53 = vld [vmem:[%s2868_s0 + $0x20] sm:$0xf]  ;;  %1689 = vmatpush3.bf16.msra.mxu0 %v1893_v48 }
   0x8   :  { %v237_v32 = vor.u32 %v236_v23, %v232_v12  ;;  %v463_v33 = vrot.slane %v461_v26, 1  ;;  %v468_v34 = vrot.slane %v120_v25, 1  ;;  %v243_v35 = vshrl.u32 %v1982_v9, 16  ;;  %v44_v58 = vld [vmem:[%s2868_s0 + $0x24] sm:$0xf]  ;;  %1690 = vmatprep.subr.bf16.mxu0 %v1894_v59  ;;  %v1898_v59 = vld [vmem:[%s2869_s1 + $0x68] sm:$0xff]  }
   0x9   :  { %v106_v36 = vor.u32 %v105_v29, %v101_v19  ;;  %v466_v37 = vrot.slane %v464_v30, 2  ;;  %v2015_v38 = vcombine.low %v39_v16, %v17_v1  ;;  %v359_v39 = vrot.slane %v239_v18, 2  ;;  %v2057_v18 = vld [vmem:[%s2868_s0 + $0x24] ss:$0 sps:$4 sm:$0x11]  }
   0xa   :  { %v242_v40 = vsel %vm99_vm0, %v237_v32, %v241_v28  ;;  %v470_v41 = vor.u32 %v469_v31, %v468_v34  ;;  %v358_v42 = vrot.slane %v243_v35, 1  ;;  %v2018_v43 = vcombine.low %v21_v22, %v22_v27 }
   0xb   :  { %303 = vrot.lane.b32.xlu0 %v242_v40, %s1935_s7  ;;  %v111_v44 = vsel %vm99_vm0, %v106_v36, %v110_v24  ;;  %v467_v45 = vor.u32 %v466_v37, %v463_v33  ;;  %v351_v46 = vshrl.u32 %v2015_v38, 16  ;;  %v354_v47 = vshll.u32 %v2015_v38, 16  ;;  %v1876_v33 = vld [vmem:[%s2868_s0 + $0x24] ss:$0 sps:$4 sm:$0x33]  }
   0xc   :  { %172 = vrot.lane.b32.xlu1 %v111_v44, %s1935_s7  ;;  %v360_v49 = vor.u32 %v359_v39, %v358_v42  ;;  %v2028_v50 = vcombine.low %v20_v4, %v21_v22  ;;  %v245_v51 = vor.u32 %v243_v35, %v241_v28  ;;  %v124_v52 = vshll.u32 %v2018_v43, 16  ;;  %v1895_v22 = vld [vmem:[%s2869_s1 + $0xf8] sm:$0xff]   ;;  %v2077_v28 = vld [vmem:[%s2868_s0 + $0x20] ss:$0 sps:$4 sm:$0x11]  }
   0xd   :  { %v471_v54 = vsel %vm349_vm1, %v467_v45, %v470_v41  ;;  %v353_v55 = vrot.slane %v351_v46, 1  ;;  %v356_v56 = vrot.slane %v354_v47, 2  ;;  %v128_v57 = vshrl.u32 %v2018_v43, 16  ;;  %1752 = vmatprep.subr.bf16.mxu1 %v1895_v22  ;;  %v2095_v42 = vld [vmem:[%s2868_s0 + $0x38] sm:$0xf]  ;;  %v1896_v45 = vld [vmem:[%s2869_s1 + $0x30] sm:$0xff]  }
   0xe   :  { %v247_v60 = vshll.u32 %v2028_v50, 16  ;;  %v473_v61 = vrot.slane %v124_v52, 2  ;;  %v112_v62 = vshrl.u32 %v1978_v7, 16  ;;  %v118_v63 = vrot.slane %v116_v21, 1  ;;  %v27_v44 = vld [vmem:[%s2868_s0 + $0x40] sm:$0xf]  ;;  %1691 = vmatpush3.bf16.msra.mxu0 %v1896_v45 }
   0xf   :  { %528 = vrot.lane.b32.xlu0 %v471_v54, %s1935_s7  ;;  %v357_v1 = vor.u32 %v356_v56, %v353_v55  ;;  %v472_v2 = vrot.slane %v128_v57, 1  ;;  %v251_v3 = vshrl.u32 %v2028_v50, 16  ;;  %v2048_v4 = vcombine.low %v22_v27, %v35_v53  ;;  %v2065_v21 = vld [vmem:[%s2868_s0 + $0x28] ss:$0 sps:$4 sm:$0x33]   ;;  %v1897_v54 = vld [vmem:[%s2869_s1 + $0xb8] sm:$0xff]   ;;  %1692 = vmatprep.subr.bf16.mxu0 %v1898_v59 }
  0x10   :  { %v249_v5 = vrot.slane %v247_v60, 1  ;;  %v114_v6 = vor.u32 %v112_v62, %v110_v24  ;;  %v363_v11 = vrot.slane %v247_v60, 2  ;;  %v2050_v12 = vcombine.low %v35_v53, %v44_v58  ;;  %v46_v53 = vld [vmem:[%s2868_s0 + $0x38] sm:$0xe]  ;;  %1753 = vmatpush3.bf16.msra.mxu1 %v1897_v54  ;;  %v30_v45 = vld [vmem:[%s2868_s0 + $0x4c] sm:$0xf] }
  0x11   :  { %v361_v13 = vsel %vm349_vm1, %v357_v1, %v360_v49  ;;  %v474_v14 = vor.u32 %v473_v61, %v472_v2  ;;  %v362_v16 = vrot.slane %v251_v3, 1  ;;  %v255_v17 = vshll.u32 %v2048_v4, 16  ;;  %v23_v1 = vld [vmem:[%s2868_s0 + $0x30] sm:$0xf]  ;;  %v1900_v54 = vld [vmem:[%s2869_s1 + $0x28] sm:$0xff]  }
  0x12   :  { %408 = vrot.lane.b32.xlu1 %v361_v13, %s1935_s7  ;;  %v250_v19 = vsel %vm99_vm0, %v245_v51, %v249_v5  ;;  %v477_v20 = vshrl.u32 %v2050_v12, 16  ;;  %v119_v24 = vsel %vm99_vm0, %v114_v6, %v118_v63  ;;  %v480_v27 = vshll.u32 %v2050_v12, 16  ;;  %1693 = vmatpush3.bf16.msra.mxu0 %v1900_v54 }
  0x13   :  { %305 = vrot.lane.b32.xlu0 %v250_v19, %s1935_s7  ;;  %v475_v23 = vsel %vm349_vm1, %v470_v41, %v474_v14  ;;  %v364_v26 = vor.u32 %v363_v11, %v362_v16  ;;  %v253_v29 = vor.u32 %v251_v3, %v249_v5  ;;  %v257_v30 = vrot.slane %v255_v17, 1  ;;  %v2090_v41 = vld [vmem:[%s2868_s0 + $0x34] sm:$0xf] }
  0x14   :  { %v479_v31 = vrot.slane %v477_v20, 1  ;;  %v259_v32 = vshrl.u32 %v2048_v4, 16  ;;  %v482_v34 = vrot.slane %v480_v27, 2  ;;  %v367_v35 = vrot.slane %v255_v17, 2  ;;  %v1899_v17 = vld [vmem:[%s2869_s1 + $0xf0] sm:$0xff]  }
  0x15   :  { %v122_v36 = vor.u32 %v120_v25, %v118_v63  ;;  %v126_v37 = vrot.slane %v124_v52, 1  ;;  %v263_v40 = vshll.u32 %v2057_v18, 16  ;;  %v2103_v25 = vld [vmem:[%s2868_s0 + $0x44] sm:$0xf]  ;;  %v365_v46 = vsel %vm349_vm1, %v360_v49, %v364_v26  ;;  %v2117_v52 = vld [vmem:[%s2868_s0 + $0x3c] sm:$0xf]  ;;  %1754 = vmatprep.subr.bf16.mxu1 %v1899_v17 }
  0x16   :  { %530 = vrot.lane.b32.xlu1 %v475_v23, %s1935_s7  ;;  %v366_v39 = vrot.slane %v259_v32, 1  ;;  %v2110_v47 = vor.u32 %v482_v34, %v479_v31  ;;  %v486_v48 = vshrl.u32 %v2065_v21, 16  ;;  %v489_v51 = vshll.u32 %v2065_v21, 16 }
  0x17   :  { %174 = vrot.lane.b32.xlu0 %v119_v24, %s1935_s7  ;;  %v258_v49 = vsel %vm99_vm0, %v253_v29, %v257_v30  ;;  %v132_v56 = vshll.u32 %v2077_v28, 16  ;;  %v371_v58 = vshrl.u32 %v1876_v33, 16  ;;  %v265_v60 = vrot.slane %v263_v40, 1 }
  0x18   :  { %v2126_v55 = vor.u32 %v367_v35, %v366_v39  ;;  %v488_v61 = vrot.slane %v486_v48, 1  ;;  %v491_v62 = vrot.slane %v489_v51, 2  ;;  %v374_v63 = vshll.u32 %v1876_v33, 16 }
  0x19   :  { %v127_v2 = vsel %vm99_vm0, %v122_v36, %v126_v37  ;;  %v134_v3 = vrot.slane %v132_v56, 1  ;;  %v373_v5 = vrot.slane %v371_v58, 1  ;;  %v484_v6 = vsel %vm349_vm1, %v474_v14, %v2110_v47 }
  0x1a   :  { %410 = vrot.lane.b32.xlu1 %v365_v46, %s1935_s7  ;;  %v376_v11 = vrot.slane %v374_v63, 2  ;;  %v2141_v13 = vcombine.low %v27_v44, %v2103_v25  ;;  %v1592_v16 = vcombine.low %v2090_v41, %v2095_v42  ;;  %v261_v19 = vor.u32 %v259_v32, %v257_v30  ;;  %v40_v30 = vld [vmem:[%s2868_s0 + $0x34] sm:$0xe] }
  0x1b   :  { %307 = vrot.lane.b32.xlu0 %v258_v49, %s1935_s7  ;;  %v130_v20 = vor.u32 %v128_v57, %v126_v37  ;;  %v2151_v22 = vcombine.low %v2117_v52, %v27_v44  ;;  %v2154_v14 = vcombine.low %v46_v53, %v2117_v52  ;;  %v369_v23 = vsel %vm349_vm1, %v364_v26, %v2126_v55  ;;  %v29_v44 = vld [vmem:[%s2868_s0 + $0x48] sm:$0xf] }
  0x1c   :  { %v268_v24 = vshrl.u32 %v1592_v16, 16  ;;  %v270_v27 = vshll.u32 %v1592_v16, 16  ;;  %v2159_v29 = vcombine.low %v23_v1, %v2090_v41  ;;  %v152_v31 = vshll.u32 %v2141_v13, 16  ;;  %v1901_v16 = vld [vmem:[%s2869_s1 + $0xb0] sm:$0xff]  }
  0x1d   :  { %v275_v57 = vshll.u32 %v2151_v22, 16  ;;  %v156_v32 = vshrl.u32 %v2141_v13, 16  ;;  %v495_v26 = vshrl.u32 %v2154_v14, 16  ;;  %v492_v33 = vor.u32 %v491_v62, %v488_v61  ;;  %1755 = vmatpush3.bf16.msra.mxu1 %v1901_v16  ;;  %v1909_v16 = vld [vmem:[%s2869_s1 + $0xa0] sm:$0xff]  }
  0x1e   :  { %532 = vrot.lane.b32.xlu1 %v484_v6, %s1935_s7  ;;  %v272_v34 = vrot.slane %v270_v27, 1  ;;  %v498_v35 = vshll.u32 %v2154_v14, 16  ;;  %v2173_v36 = vcombine.low %v2095_v42, %v2117_v52  ;;  %v266_v37 = vsel %vm99_vm0, %v261_v19, %v265_v60 }
  0x1f   :  { %176 = vrot.lane.b32.xlu0 %v127_v2, %s1935_s7  ;;  %v2176_v39 = vrot.slane %v275_v57, 1  ;;  %v2178_v40 = vrot.slane %v495_v26, 1  ;;  %v135_v46 = vsel %vm99_vm0, %v130_v20, %v134_v3  ;;  %v502_v48 = vrot.slane %v156_v32, 1  ;;  %v1904_v26 = vld [vmem:[%s2869_s1 + $0x20] sm:$0xff]  }
  0x20   :  { %v503_v51 = vrot.slane %v152_v31, 2  ;;  %v139_v53 = vshll.u32 %v2159_v29, 16  ;;  %v377_v49 = vor.u32 %v376_v11, %v373_v5  ;;  %v500_v56 = vrot.slane %v498_v35, 2 }
  0x21   :  { %v279_v58 = vshrl.u32 %v2151_v22, 16  ;;  %v2198_v59 = vcombine.low %v40_v30, %v2095_v42  ;;  %v493_v60 = vsel %vm349_vm1, %v2110_v47, %v492_v33  ;;  %v273_v61 = vor.u32 %v272_v34, %v268_v24  ;;  %v37_v47 = vld [vmem:[%s2868_s0 + $0x50] sm:$0xf]  ;;  %v1903_v24 = vld [vmem:[%s2869_s1 + $0xe8] sm:$0xff]  }
  0x22   :  { %412 = vrot.lane.b32.xlu1 %v369_v23, %s1935_s7  ;;  %v137_v62 = vshrl.u32 %v2159_v29, 16  ;;  %v144_v63 = vshll.u32 %v2173_v36, 16  ;;  %v141_v1 = vrot.slane %v139_v53, 1  ;;  %v388_v5 = vrot.slane %v275_v57, 2  ;;  %v1902_v23 = vld [vmem:[%s2869_s1 + $0x60] sm:$0xff]   ;;  %1756 = vmatprep.subr.bf16.mxu1 %v1903_v24 }
  0x23   :  { %309 = vrot.lane.b32.xlu0 %v266_v37, %s1935_s7  ;;  %v380_v2 = vshrl.u32 %v2198_v59, 16  ;;  %v383_v3 = vshll.u32 %v2198_v59, 16  ;;  %v387_v6 = vrot.slane %v279_v58, 1  ;;  %v2207_v42 = vcombine.low %v29_v44, %v30_v45  ;;  %1694 = vmatprep.subr.bf16.mxu0 %v1902_v23  ;;  %v1910_v23 = vld [vmem:[%s2869_s1 + $0x50] sm:$0xff]  }
  0x24   :  { %v2210_v11 = vcombine.low %v2103_v25, %v29_v44  ;;  %v378_v17 = vsel %vm349_vm1, %v2126_v55, %v377_v49  ;;  %v47_v25 = vld [vmem:[%s2868_s0 + $0x54] sm:$0xf]  ;;  %v501_v27 = vor.u32 %v500_v56, %v2178_v40  ;;  %v2232_v30 = vor.u32 %v503_v51, %v502_v48  ;;  %v1905_v40 = vld [vmem:[%s2869_s1 + $0xa8] sm:$0xff]   ;;  %1695 = vmatpush3.bf16.msra.mxu0 %v1904_v26 }
  0x25   :  { %v382_v19 = vrot.slane %v380_v2, 1  ;;  %v385_v20 = vrot.slane %v383_v3, 2  ;;  %v160_v55 = vshll.u32 %v2207_v42, 16  ;;  %v164_v57 = vshrl.u32 %v2207_v42, 16  ;;  %1757 = vmatpush3.bf16.msra.mxu1 %v1905_v40  ;;  %v1907_v2 = vld [vmem:[%s2869_s1 + $0xe0] sm:$0xff]  }
  0x26   :  { %534 = vrot.lane.b32.xlu1 %v493_v60, %s1935_s7  ;;  %v278_v33 = vsel %vm99_vm0, %v273_v61, %v2176_v39  ;;  %v142_v34 = vor.u32 %v141_v1, %v137_v62  ;;  %v146_v35 = vrot.slane %v144_v63, 1  ;;  %v283_v37 = vshll.u32 %v2210_v11, 16  ;;  %v2257_v56 = vld [vmem:[%s2868_s0 + $0x54] ss:$0 sps:$4 sm:$0x11]   ;;  %v1906_v60 = vld [vmem:[%s2869_s1 + $0x58] sm:$0xff]   ;;  %1758 = vmatprep.subr.bf16.mxu1 %v1907_v2 }
  0x27   :  { %178 = vrot.lane.b32.xlu0 %v135_v46, %s1935_s7  ;;  %v506_v44 = vrot.slane %v164_v57, 1  ;;  %v148_v46 = vshrl.u32 %v2173_v36, 16  ;;  %v287_v48 = vshrl.u32 %v2210_v11, 16  ;;  %v386_v51 = vor.u32 %v385_v20, %v382_v19  ;;  %1696 = vmatprep.subr.bf16.mxu0 %v1906_v60  ;;  %v2275_v3 = vld [vmem:[%s2868_s0 + $0x58] ss:$0 sps:$4 sm:$0x33]  }
  0x28   :  { %v2250_v53 = vor.u32 %v388_v5, %v387_v6  ;;  %v507_v54 = vrot.slane %v160_v55, 2  ;;  %v2252_v49 = vcombine.low %v30_v45, %v37_v47  ;;  %v505_v61 = vsel %vm349_vm1, %v501_v27, %v2232_v30  ;;  %v1908_v5 = vld [vmem:[%s2869_s1 + $0x18] sm:$0xff]   ;;  %v2304_v40 = vld [vmem:[%s2868_s0 + $0x50] ss:$0 sps:$4 sm:$0x11]  }
  0x29   :  { %v2265_v62 = vcombine.low %v37_v47, %v47_v25  ;;  %v147_v63 = vsel %vm99_vm0, %v142_v34, %v146_v35  ;;  %v281_v45 = vor.u32 %v279_v58, %v2176_v39  ;;  %v285_v1 = vrot.slane %v283_v37, 1  ;;  %1697 = vmatpush3.bf16.msra.mxu0 %v1908_v5  ;;  %1759 = vmatpush3.bf16.msra.mxu1 %v1909_v16  ;;  %v1915_v16 = vld [vmem:[%s2869_s1 + $0xd0] sm:$0xff]  }
  0x2a   :  { %414 = vrot.lane.b32.xlu1 %v378_v17, %s1935_s7  ;;  %v390_v39 = vsel %vm349_vm1, %v386_v51, %v2250_v53  ;;  %v392_v58 = vrot.slane %v283_v37, 2  ;;  %v291_v6 = vshll.u32 %v2252_v49, 16  ;;  %v508_v17 = vor.u32 %v507_v54, %v506_v44  ;;  %1698 = vmatprep.subr.bf16.mxu0 %v1910_v23 }
  0x2b   :  { %311 = vrot.lane.b32.xlu0 %v278_v33, %s1935_s7  ;;  %v511_v47 = vshrl.u32 %v2265_v62, 16  ;;  %v391_v19 = vrot.slane %v287_v48, 1  ;;  %v514_v20 = vshll.u32 %v2265_v62, 16  ;;  %v295_v25 = vshrl.u32 %v2252_v49, 16 }
  0x2c   :  { %v286_v24 = vsel %vm99_vm0, %v281_v45, %v285_v1  ;;  %v150_v27 = vor.u32 %v148_v46, %v146_v35  ;;  %v154_v26 = vrot.slane %v152_v31, 1  ;;  %v299_v33 = vshll.u32 %v2257_v56, 16  ;;  %v1891_v31 = vld [vmem:[%s2868_s0 + $0x54] ss:$0 sps:$4 sm:$0x33]  }
  0x2d   :  { %v2298_v34 = vrot.slane %v160_v55, 1  ;;  %v520_v37 = vshrl.u32 %v2275_v3, 16  ;;  %v293_v44 = vrot.slane %v291_v6, 1  ;;  %v513_v35 = vrot.slane %v511_v47, 1  ;;  %v1911_v55 = vld [vmem:[%s2869_s1 + $0xd8] sm:$0xff]  }
  0x2e   :  { %536 = vrot.lane.b32.xlu1 %v505_v61, %s1935_s7  ;;  %v396_v46 = vrot.slane %v291_v6, 2  ;;  %v509_v51 = vsel %vm349_vm1, %v2232_v30, %v508_v17  ;;  %v393_v54 = vor.u32 %v392_v58, %v391_v19  ;;  %v516_v60 = vrot.slane %v514_v20, 2  ;;  %1760 = vmatprep.subr.bf16.mxu1 %v1911_v55  ;;  %v1913_v6 = vld [vmem:[%s2869_s1 + $0x98] sm:$0xff]   ;;  %v1914_v30 = vld [vmem:[%s2869_s1 + $0x48] sm:$0xff]  }
  0x2f   :  { %180 = vrot.lane.b32.xlu0 %v147_v63, %s1935_s7  ;;  %v395_v61 = vrot.slane %v295_v25, 1  ;;  %v155_v63 = vsel %vm99_vm0, %v150_v27, %v154_v26  ;;  %v289_v45 = vor.u32 %v287_v48, %v285_v1  ;;  %v301_v2 = vrot.slane %v299_v33, 1  ;;  %1761 = vmatpush3.bf16.msra.mxu1 %v1913_v6  ;;  %v1917_v27 = vld [vmem:[%s2869_s1 + $0x90] sm:$0xff]  }
  0x30   :  { %v523_v5 = vshll.u32 %v2275_v3, 16  ;;  %v522_v47 = vrot.slane %v520_v37, 1  ;;  %v394_v48 = vsel %vm349_vm1, %v2250_v53, %v393_v54  ;;  %v517_v1 = vor.u32 %v516_v60, %v513_v35  ;;  %1762 = vmatprep.subr.bf16.mxu1 %v1915_v16  ;;  %v1919_v35 = vld [vmem:[%s2869_s1 + $0xc8] sm:$0xff]   ;;  %v1920_v60 = vld [vmem:[%s2869_s1] sm:$0xff]  }
  0x31   :  { %v168_v58 = vshll.u32 %v2304_v40, 16  ;;  %v294_v19 = vsel %vm99_vm0, %v289_v45, %v293_v44  ;;  %v158_v20 = vor.u32 %v156_v32, %v154_v26  ;;  %v400_v23 = vshrl.u32 %v1891_v31, 16  ;;  %v1918_v32 = vld [vmem:[%s2869_s1 + $0x40] sm:$0xff]  }
  0x32   :  { %416 = vrot.lane.b32.xlu1 %v390_v39, %s1935_s7  ;;  %v1912_v39 = vld [vmem:[%s2869_s1 + $0x10] sm:$0xff]   ;;  %v525_v53 = vrot.slane %v523_v5, 2  ;;  %v403_v33 = vshll.u32 %v1891_v31, 16  ;;  %v518_v26 = vsel %vm349_vm1, %v508_v17, %v517_v1  ;;  %v397_v37 = vor.u32 %v396_v46, %v395_v61  ;;  %v1921_v46 = vld [vmem:[%s2869_s1 + $0x88] sm:$0xff]   ;;  %v1924_v5 = vld [vmem:[%s2869_s1 + $0x80] sm:$0xff]  }
  0x33   :  { %313 = vrot.lane.b32.xlu0 %v286_v24, %s1935_s7  ;;  %1699 = vmatpush3.bf16.msra.mxu0 %v1912_v39  ;;  %v1916_v24 = vld [vmem:[%s2869_s1 + $0x8] sm:$0xff]   ;;  %v325_v55 = vrot.slane %v2015_v38, 1  ;;  %v163_v31 = vsel %vm99_vm0, %v158_v20, %v2298_v34  ;;  %v402_v17 = vrot.slane %v400_v23, 1  ;;  %v166_v6 = vor.u32 %v164_v57, %v2298_v34 }
  0x34   :  { %1700 = vmatprep.subr.bf16.mxu0 %v1914_v30  ;;  %1763 = vmatpush3.bf16.msra.mxu1 %v1917_v27  ;;  %v526_v38 = vor.u32 %v525_v53, %v522_v47  ;;  %v398_v61 = vsel %vm349_vm1, %v393_v54, %v397_v37  ;;  %v405_v45 = vrot.slane %v403_v33, 2  ;;  %v170_v47 = vrot.slane %v168_v58, 1 }
  0x35   :  { %1764 = vmatprep.subr.bf16.mxu1 %v1919_v35  ;;  %v330_v30 = vrot.slane %v2048_v4, 1  ;;  %v337_v16 = vrot.slane %v2210_v11, 1  ;;  %v556_v53 = vrot.slane %v2050_v12, 2  ;;  %v558_v27 = vrot.slane %v2065_v21, 2 }
  0x36   :  { %538 = vrot.lane.b32.xlu1 %v509_v51, %s1935_s7  ;;  %v297_v51 = vor.u32 %v295_v25, %v293_v44  ;;  %v1923_v25 = vld [vmem:[%s2869_s1 + $0xc0] sm:$0xff]   ;;  %v406_v57 = vor.u32 %v405_v45, %v402_v17  ;;  %v171_v4 = vsel %vm99_vm0, %v166_v6, %v170_v47  ;;  %v565_v33 = vrot.slane %v2265_v62, 2  ;;  %v1926_v17 = vld [vmem:[%s2869_s1 + $0x110] sm:$0xff]  }
  0x37   :  { %182 = vrot.lane.b32.xlu0 %v155_v63, %s1935_s7  ;;  %1701 = vmatpush3.bf16.msra.mxu0 %v1916_v24  ;;  %v326_v63 = vrot.slane %v1982_v9, 1  ;;  %v328_v9 = vrot.slane %v2028_v50, 1  ;;  %v2383_v50 = vld [vmem:[%s2869_s1 + $0x118] sm:$0xff]   ;;  %v339_v24 = vrot.slane %v2252_v49, 1  ;;  %v2429_v49 = vsel %vm550_vm3, %v556_v53, %v558_v27  ;;  %v1930_v47 = vld [vmem:[%s2869_s1 + $0x100] sm:$0xff]  }
  0x38   :  { %1702 = vmatprep.subr.bf16.mxu0 %v1918_v32  ;;  %1765 = vmatpush3.bf16.msra.mxu1 %v1921_v46  ;;  %v302_v39 = vsel %vm99_vm0, %v297_v51, %v301_v2  ;;  %v527_v2 = vsel %vm349_vm1, %v517_v1, %v526_v38  ;;  %v335_v1 = vrot.slane %v2151_v22, 1  ;;  %v196_v35 = vrot.slane %v1978_v7, 1 }
  0x39   :  { %v2368_v44 = vsel %vm194_vm2, %v325_v55, %v326_v63  ;;  %1766 = vmatprep.subr.bf16.mxu1 %v1923_v25  ;;  %v2386_v54 = vsel %vm194_vm2, %v326_v63, %v328_v9  ;;  %v2395_v34 = vsel %vm194_vm2, %v328_v9, %v330_v30  ;;  %v2418_v22 = vsel %vm194_vm2, %v337_v16, %v339_v24  ;;  %v1929_v9 = vld [vmem:[%s2869_s1 + $0x108] sm:$0xff]  }
  0x3a   :  { %418 = vrot.lane.b32.xlu1 %v394_v48, %s1935_s7  ;;  %v332_v48 = vrot.slane %v2057_v18, 1  ;;  %v334_v18 = vrot.slane %v2198_v59, 1  ;;  %v2412_v23 = vsel %vm194_vm2, %v335_v1, %v337_v16  ;;  %v341_v59 = vrot.slane %v2257_v56, 1 }
  0x3b   :  { %315 = vrot.lane.b32.xlu0 %v294_v19, %s1935_s7  ;;  %1703 = vmatpush3.bf16.msra.mxu0 %v1920_v60  ;;  %v407_v19 = vsel %vm349_vm1, %v397_v37, %v406_v57  ;;  %v567_v56 = vrot.slane %v2275_v3, 2  ;;  %vm569_vm4 = vcmask 523264   ;;  %v442_v3 = vrot.slane %v1991_v15, 1 }
  0x3c   :  { %1828 = vmatprep.subr.bf16.mxu0 %v2383_v50  ;;  %1767 = vmatpush3.bf16.msra.mxu1 %v1924_v5  ;;  %v2398_v58 = vsel %vm194_vm2, %v330_v30, %v332_v48  ;;  %v2409_v20 = vsel %vm194_vm2, %v334_v18, %v335_v1  ;;  %v2421_v11 = vsel %vm194_vm2, %v339_v24, %v341_v59  ;;  %v200_v25 = vrot.slane %v2018_v43, 1 }
  0x3d   :  { %1852 = vmatprep.subr.bf16.mxu1 %v2383_v50  ;;  %v2435_v32 = vsel %vm550_vm3, %v565_v33, %v567_v56  ;;  %v444_v57 = vrot.slane %v2050_v12, 1  ;;  %vm1554_vm5 = vcmask 257024  }
  0x3e   :  { %540 = vrot.lane.b32.xlu1 %v518_v26, %s1935_s7  ;;  %v33_v26 = vld [vmem:[%s2868_s0] sm:$0xe] }
  0x3f   :  { %184 = vrot.lane.b32.xlu0 %v163_v31, %s1935_s7  ;;  %v1585_v21 = vcombine.low %v33_v26, %v1960_v0  ;;  %v198_v31 = vrot.slane %v1980_v8, 1  ;;  %v445_v16 = vsel %vm194_vm2, %v200_v25, %v444_v57 }
  0x41   :  { %v195_v37 = vrot.slane %v1585_v21, 1  ;;  %v443_v46 = vsel %vm194_vm2, %v442_v3, %v198_v31  ;;  %v201_v6 = vsel %vm194_vm2, %v198_v31, %v200_v25 }
  0x42   :  { %420 = vrot.lane.b32.xlu1 %v398_v61, %s1935_s7  ;;  %v199_v61 = vsel %vm194_vm2, %v196_v35, %v198_v31 }
  0x43   :  { %317 = vrot.lane.b32.xlu0 %v302_v39, %s1935_s7  ;;  %v197_v55 = vsel %vm194_vm2, %v195_v37, %v196_v35 }
  0x46   :  { %542 = vrot.lane.b32.xlu1 %v527_v2, %s1935_s7 }
  0x47   :  { %186 = vrot.lane.b32.xlu0 %v171_v4, %s1935_s7 }
  0x4a   :  { %422 = vrot.lane.b32.xlu1 %v407_v19, %s1935_s7  ;;  %v202_v19 = vrot.slane %v2077_v28, 1 }
  0x4c   :  { %v203_v21 = vsel %vm194_vm2, %v200_v25, %v202_v19 }
  0x7d   :  { %v304_v51 = vpop.permute.xlu0 %303 }
  0x7e   :  { %v173_v60 = vpop.permute.xlu1 %172  ;;  %v596_v63 = vsel %vm569_vm4, %v197_v55, %v304_v51 }
  0x7f   :  { %1032 = vmatprep.mubr.bf16.mxu0 %v596_v63  ;;  %v571_v0 = vsel %vm569_vm4, %v1985_v10, %v173_v60  ;;  %v205_v60 = vrot.slane %v2173_v36, 1 }
  0x80   :  { %1033 = vmatmul.mubr.bf16.vlgmr.msra.gmra.mxu0 %v571_v0 }
  0x81   :  { %v529_v38 = vpop.permute.xlu0 %528  ;;  %1829 = vmatpush3.bf16.msra.mxu0 %v2383_v50 }
  0x82   :  { %v660_v15 = vsel %vm569_vm4, %v443_v46, %v529_v38  ;;  %1830 = vmatprep.subr.bf16.mxu0 %v1926_v17  ;;  %v448_v46 = vrot.slane %v2154_v14, 1 }
  0x83   :  { %1129 = vmatprep.mubr.bf16.mxu1 %v660_v15 }
  0x84   :  { %v409_v45 = vpop.permute.xlu1 %408 }
  0x85   :  { %v628_v10 = vsel %vm569_vm4, %v2368_v44, %v409_v45  ;;  %v306_v5 = vpop.permute.xlu0 %305  ;;  %1831 = vmatpush3.bf16.msra.mxu0 %v1926_v17 }
  0x86   :  { %1130 = vmatmul.mubr.bf16.vlgmr.msra.gmra.mxu1 %v628_v10  ;;  %v600_v39 = vsel %vm569_vm4, %v199_v61, %v306_v5  ;;  %1832 = vmatprep.subr.bf16.mxu0 %v1929_v9 }
  0x87   :  { %1040 = vmatprep.mubr.bf16.mxu0 %v600_v39  ;;  %1856 = vmatpush3.bf16.msra.mxu1 %v2383_v50 }
  0x88   :  { %v531_v30 = vpop.permute.xlu1 %530  ;;  %1853 = vmatprep.subr.bf16.mxu1 %v1926_v17 }
  0x89   :  { %v175_v48 = vpop.permute.xlu0 %174  ;;  %v663_v44 = vsel %vm569_vm4, %v201_v6, %v531_v30  ;;  %1833 = vmatpush3.bf16.msra.mxu0 %v1929_v9 }
  0x8a   :  { %v574_v2 = vsel %vm569_vm4, %v1978_v7, %v175_v48  ;;  %1137 = vmatprep.mubr.bf16.mxu1 %v663_v44  ;;  %1834 = vmatprep.subr.bf16.mxu0 %v1930_v47  ;;  %v1927_v7 = vld [vmem:[%s2868_s0 + $0x28] ss:$0 sps:$4 sm:$0x11]  }
  0x8b   :  { %1041 = vmatmul.mubr.bf16.gmra.mxu0 %v574_v2  ;;  %1857 = vmatpush3.bf16.msra.mxu1 %v1926_v17  ;;  %v446_v26 = vrot.slane %v1927_v7, 1 }
  0x8c   :  { %v411_v4 = vpop.permute.xlu1 %410  ;;  %1854 = vmatprep.subr.bf16.mxu1 %v1929_v9 }
  0x8d   :  { %v632_v50 = vsel %vm569_vm4, %v2386_v54, %v411_v4  ;;  %v308_v18 = vpop.permute.xlu0 %307  ;;  %1835 = vmatpush3.bf16.msra.mxu0 %v1930_v47  ;;  %v34_v54 = vld [vmem:[%s2868_s0 + $0x30] sm:$0xe]  ;;  %v447_v3 = vsel %vm194_vm2, %v444_v57, %v446_v26 }
  0x8e   :  { %1138 = vmatmul.mubr.bf16.gmra.mxu1 %v632_v50  ;;  %v604_v1 = vsel %vm569_vm4, %v201_v6, %v308_v18  ;;  %v1586_v28 = vcombine.low %v34_v54, %v2090_v41  ;;  %v209_v6 = vrot.slane %v2207_v42, 1  ;;  %v450_v18 = vrot.slane %v2265_v62, 1 }
  0x8f   :  { %1048 = vmatprep.mubr.bf16.mxu0 %v604_v1  ;;  %1858 = vmatpush3.bf16.msra.mxu1 %v1929_v9  ;;  %v211_v54 = vrot.slane %v2304_v40, 1 }
  0x90   :  { %v533_v24 = vpop.permute.xlu1 %532  ;;  %1855 = vmatprep.subr.bf16.mxu1 %v1930_v47  ;;  %v204_v51 = vrot.slane %v1586_v28, 1  ;;  %v451_v19 = vsel %vm194_vm2, %v209_v6, %v450_v18 }
  0x91   :  { %v177_v59 = vpop.permute.xlu0 %176  ;;  %v667_v27 = vsel %vm569_vm4, %v445_v16, %v533_v24  ;;  %v1931_v24 = vld [vmem:[%s2868_s0 + $0x58] ss:$0 sps:$4 sm:$0x11]   ;;  %v212_v40 = vsel %vm194_vm2, %v209_v6, %v211_v54 }
  0x92   :  { %v577_v56 = vsel %vm569_vm4, %v1980_v8, %v177_v59  ;;  %1145 = vmatprep.mubr.bf16.mxu1 %v667_v27  ;;  %v206_v38 = vsel %vm194_vm2, %v204_v51, %v205_v60 }
  0x93   :  { %1049 = vmatmul.mubr.bf16.gmra.mxu0 %v577_v56  ;;  %1859 = vmatpush3.bf16.msra.mxu1 %v1930_v47  ;;  %v1934_v56 = vld [vmem:[%s2868_s0 + $0xc] sm:$0xf] }
  0x94   :  { %v413_v37 = vpop.permute.xlu1 %412 }
  0x95   :  { %v636_v35 = vsel %vm569_vm4, %v2395_v34, %v413_v37  ;;  %v310_v55 = vpop.permute.xlu0 %309  ;;  %v207_v34 = vrot.slane %v2141_v13, 1  ;;  %v452_v37 = vrot.slane %v1931_v24, 1 }
  0x96   :  { %1146 = vmatmul.mubr.bf16.gmra.mxu1 %v636_v35  ;;  %v608_v31 = vsel %vm569_vm4, %v203_v21, %v310_v55  ;;  %v52_v21 = vld [vmem:[%s2868_s0 + $0x38] sm:$0xc] }
  0x97   :  { %1056 = vmatprep.mubr.bf16.mxu0 %v608_v31  ;;  %v449_v45 = vsel %vm194_vm2, %v448_v46, %v207_v34  ;;  %v210_v2 = vsel %vm194_vm2, %v207_v34, %v209_v6  ;;  %v1610_v55 = vcombine.low %v52_v21, %v2117_v52 }
  0x98   :  { %v535_v63 = vpop.permute.xlu1 %534 }
  0x99   :  { %v179_v17 = vpop.permute.xlu0 %178  ;;  %v671_v0 = vsel %vm569_vm4, %v447_v3, %v535_v63 }
  0x9a   :  { %v580_v41 = vsel %vm569_vm4, %v2018_v43, %v179_v17  ;;  %1153 = vmatprep.mubr.bf16.mxu1 %v671_v0  ;;  %v453_v17 = vsel %vm194_vm2, %v450_v18, %v452_v37 }
  0x9b   :  { %1057 = vmatmul.mubr.bf16.gmra.mxu0 %v580_v41  ;;  %v560_v41 = vrot.slane %v1610_v55, 2 }
  0x9c   :  { %v415_v15 = vpop.permute.xlu1 %414 }
  0x9d   :  { %v640_v25 = vsel %vm569_vm4, %v2398_v58, %v415_v15  ;;  %v312_v9 = vpop.permute.xlu0 %311  ;;  %v208_v58 = vsel %vm194_vm2, %v205_v60, %v207_v34  ;;  %v552_v60 = vrot.slane %v1980_v8, 2  ;;  %v561_v34 = vrot.slane %v2141_v13, 2 }
  0x9e   :  { %1154 = vmatmul.mubr.bf16.gmra.mxu1 %v640_v25  ;;  %v612_v61 = vsel %vm569_vm4, %v206_v38, %v312_v9  ;;  %v554_v15 = vrot.slane %v2018_v43, 2  ;;  %v563_v9 = vrot.slane %v2207_v42, 2 }
  0x9f   :  { %1064 = vmatprep.mubr.bf16.mxu0 %v612_v61  ;;  %v562_v25 = vsel %vm550_vm3, %v560_v41, %v561_v34 }
  0xa0   :  { %v537_v10 = vpop.permute.xlu1 %536  ;;  %v555_v61 = vsel %vm550_vm3, %v552_v60, %v554_v15  ;;  %v564_v43 = vsel %vm550_vm3, %v561_v34, %v563_v9 }
  0xa1   :  { %v181_v5 = vpop.permute.xlu0 %180  ;;  %v675_v39 = vsel %vm569_vm4, %v449_v45, %v537_v10  ;;  %v557_v45 = vsel %vm550_vm3, %v554_v15, %v556_v53 }
  0xa2   :  { %v583_v14 = vsel %vm569_vm4, %v2159_v29, %v181_v5  ;;  %1161 = vmatprep.mubr.bf16.mxu1 %v675_v39 }
  0xa3   :  { %1065 = vmatmul.mubr.bf16.gmra.mxu0 %v583_v14 }
  0xa4   :  { %v417_v47 = vpop.permute.xlu1 %416 }
  0xa5   :  { %v644_v30 = vsel %vm569_vm4, %v2409_v20, %v417_v47  ;;  %v314_v48 = vpop.permute.xlu0 %313 }
  0xa6   :  { %1162 = vmatmul.mubr.bf16.gmra.mxu1 %v644_v30  ;;  %v616_v44 = vsel %vm569_vm4, %v208_v58, %v314_v48 }
  0xa7   :  { %1072 = vmatprep.mubr.bf16.mxu0 %v616_v44 }
  0xa8   :  { %v539_v57 = vpop.permute.xlu1 %538 }
  0xa9   :  { %v183_v4 = vpop.permute.xlu0 %182  ;;  %v678_v29 = vsel %vm569_vm4, %v210_v2, %v539_v57 }
  0xaa   :  { %v586_v50 = vsel %vm569_vm4, %v2173_v36, %v183_v4  ;;  %1169 = vmatprep.mubr.bf16.mxu1 %v678_v29  ;;  %v51_v36 = vld [vmem:[%s2868_s0 + $0x8] sm:$0xc]  ;;  %s1936_s0 = smov 96  }
  0xab   :  { %1073 = vmatmul.mubr.bf16.gmra.mxu0 %v586_v50  ;;  %v1609_v26 = vcombine.low %v51_v36, %v1934_v56 }
  0xac   :  { %v419_v1 = vpop.permute.xlu1 %418 }
  0xad   :  { %v648_v20 = vsel %vm569_vm4, %v2412_v23, %v419_v1  ;;  %v316_v16 = vpop.permute.xlu0 %315  ;;  %v551_v51 = vrot.slane %v1609_v26, 2 }
  0xae   :  { %1170 = vmatmul.mubr.bf16.gmra.mxu1 %v648_v20  ;;  %v620_v7 = vsel %vm569_vm4, %v210_v2, %v316_v16 }
  0xaf   :  { %1080 = vmatprep.mubr.bf16.mxu0 %v620_v7  ;;  %v553_v38 = vsel %vm550_vm3, %v551_v51, %v552_v60 }
  0xb0   :  { %v541_v59 = vpop.permute.xlu1 %540 }
  0xb1   :  { %v185_v27 = vpop.permute.xlu0 %184  ;;  %v682_v23 = vsel %vm569_vm4, %v451_v19, %v541_v59 }
  0xb2   :  { %v589_v28 = vsel %vm569_vm4, %v2141_v13, %v185_v27  ;;  %1177 = vmatprep.mubr.bf16.mxu1 %v682_v23 }
  0xb3   :  { %1081 = vmatmul.mubr.bf16.gmra.mxu0 %v589_v28 }
  0xb4   :  { %v421_v35 = vpop.permute.xlu1 %420 }
  0xb5   :  { %v652_v31 = vsel %vm569_vm4, %v2418_v22, %v421_v35  ;;  %v318_v3 = vpop.permute.xlu0 %317 }
  0xb6   :  { %1178 = vmatmul.mubr.bf16.gmra.mxu1 %v652_v31  ;;  %v624_v63 = vsel %vm569_vm4, %v212_v40, %v318_v3 }
  0xb7   :  { %1088 = vmatprep.mubr.bf16.mxu0 %v624_v63 }
  0xb8   :  { %v543_v0 = vpop.permute.xlu1 %542 }
  0xb9   :  { %v187_v46 = vpop.permute.xlu0 %186  ;;  %v686_v52 = vsel %vm569_vm4, %v453_v17, %v543_v0 }
  0xba   :  { %v592_v22 = vsel %vm569_vm4, %v2207_v42, %v187_v46  ;;  %1185 = vmatprep.mubr.bf16.mxu1 %v686_v52 }
  0xbb   :  { %1089 = vmatmul.mubr.bf16.gmra.mxu0 %v592_v22 }
  0xbc   :  { %v423_v8 = vpop.permute.xlu1 %422  ;;  %1836 = vmatprep.mubr.msk.bf16.mxu0 %vm569_vm4, %v553_v38 }
  0xbd   :  { %v656_v13 = vsel %vm569_vm4, %v2421_v11, %v423_v8  ;;  %v566_v11 = vsel %vm550_vm3, %v563_v9, %v565_v33 }
  0xbe   :  { %1186 = vmatmul.mubr.bf16.gmra.mxu1 %v656_v13 }
  0xbf   :  { %1844 = vmatprep.mubr.msk.bf16.mxu1 %vm569_vm4, %v562_v25 }
  0xc3   :  { %1837 = vmatmul.mubr.msk.bf16.vlgmr.msra.gmra.mxu0 %vm569_vm4, %v555_v61 }
  0xc4   :  { %1840 = vmatprep.mubr.msk.bf16.mxu0 %vm569_vm4, %v557_v45 }
  0xc6   :  { %1845 = vmatmul.mubr.msk.bf16.vlgmr.msra.gmra.mxu1 %vm569_vm4, %v564_v43 }
  0xc7   :  { %1848 = vmatprep.mubr.msk.bf16.mxu1 %vm569_vm4, %v566_v11 }
  0xcb   :  { %1841 = vmatmul.mubr.msk.bf16.gmra.mxu0 %vm569_vm4, %v2429_v49 }
  0xce   :  { %1849 = vmatmul.mubr.msk.bf16.gmra.mxu1 %vm569_vm4, %v2435_v32 }
 0x140   :  { %v1704_v12 = vpop.f32.mrf.mxu0 }
 0x142   :  { %v1705_v42 = vpop.f32.mrf.mxu0 }
 0x143   :  { %v1706_v53 = vadd.f32 %v1705_v42, %v1704_v12 }
 0x144   :  { %v1707_v10 = vpop.f32.mrf.mxu0 }
 0x146   :  { %v1768_v5 = vpop.f32.mrf.mxu1  ;;  %v1708_v39 = vpop.f32.mrf.mxu0 }
 0x147   :  { %v1709_v14 = vadd.f32 %v1708_v39, %v1707_v10 }
 0x148   :  { %v1769_v62 = vpop.f32.mrf.mxu1 }
 0x149   :  { %v1770_v6 = vadd.f32 %v1769_v62, %v1768_v5 }
 0x14a   :  { %v1771_v33 = vpop.f32.mrf.mxu1 }
 0x14b   :  { %v1710_v58 = vpop.f32.mrf.mxu0  ;;  %v2570_v47 = vadd.f32 %v1770_v6, %v1706_v53 }
 0x14c   :  { %v1772_v30 = vpop.f32.mrf.mxu1 }
 0x14d   :  { %v1773_v48 = vadd.f32 %v1772_v30, %v1771_v33  ;;  %v1711_v44 = vpop.f32.mrf.mxu0 }
 0x14e   :  { %v1774_v49 = vpop.f32.mrf.mxu1  ;;  %v1712_v12 = vadd.f32 %v1711_v44, %v1710_v58 }
 0x14f   :  { %v1713_v2 = vpop.f32.mrf.mxu0  ;;  %v2572_v57 = vadd.f32 %v1773_v48, %v1709_v14 }
 0x150   :  { %v1775_v32 = vpop.f32.mrf.mxu1 }
 0x151   :  { %v1714_v4 = vpop.f32.mrf.mxu0  ;;  %v1776_v42 = vadd.f32 %v1775_v32, %v1774_v49 }
 0x152   :  { %v1777_v29 = vpop.f32.mrf.mxu1  ;;  %v1715_v39 = vadd.f32 %v1714_v4, %v1713_v2 }
 0x153   :  { %v2574_v50 = vpop.f32.mrf.mxu0  ;;  %v1140_v48 = vadd.f32 %v1776_v42, %v1712_v12 }
 0x154   :  { %v1778_v18 = vpop.f32.mrf.mxu1 }
 0x155   :  { %v2576_v1 = vpop.f32.mrf.mxu0  ;;  %v1779_v62 = vadd.f32 %v1778_v18, %v1777_v29 }
 0x156   :  { %v2578_v20 = vpop.f32.mrf.mxu1 }
 0x157   :  { %v2580_v16 = vpop.f32.mrf.mxu0  ;;  %v1143_v2 = vadd.f32 %v1779_v62, %v1715_v39 }
 0x158   :  { %v2582_v7 = vpop.f32.mrf.mxu1 }
 0x159   :  { %v2584_v19 = vpop.f32.mrf.mxu0 }
 0x15a   :  { %v2586_v24 = vpop.f32.mrf.mxu1 }
 0x15b   :  { %v2588_v36 = vpop.f32.mrf.mxu0 }
 0x15c   :  { %v2590_v54 = vpop.f32.mrf.mxu1 }
 0x15d   :  { %v2592_v59 = vpop.f32.mrf.mxu0 }
 0x15e   :  { %v2594_v27 = vpop.f32.mrf.mxu1 }
 0x15f   :  { %v2596_v23 = vpop.f32.mrf.mxu0 }
 0x160   :  { %v2598_v56 = vpop.f32.mrf.mxu1 }
 0x161   :  { %v2600_v26 = vpop.f32.mrf.mxu0 }
 0x162   :  { %v2602_v21 = vpop.f32.mrf.mxu1 }
 0x163   :  { %v1728_v28 = vpop.f32.mrf.mxu0 }
 0x164   :  { %v2604_v37 = vpop.f32.mrf.mxu1 }
 0x165   :  { %v1729_v40 = vpop.f32.mrf.mxu0 }
 0x166   :  { %v1792_v35 = vpop.f32.mrf.mxu1 }
 0x167   :  { %v2606_v55 = vpop.f32.mrf.mxu0 }
 0x168   :  { %v1793_v31 = vpop.f32.mrf.mxu1 }
 0x169   :  { %v1732_v3 = vpop.f32.mrf.mxu0 }
 0x16a   :  { %v1795_v51 = vpop.f32.mrf.mxu1 }
 0x16b   :  { %v1734_v60 = vpop.f32.mrf.mxu0 }
 0x16c   :  { %v1796_v63 = vpop.f32.mrf.mxu1 }
 0x16d   :  { %v1735_v17 = vpop.f32.mrf.mxu0 }
 0x16e   :  { %v1798_v0 = vpop.f32.mrf.mxu1  ;;  %v1736_v6 = vadd.f32 %v1735_v17, %v1734_v60 }
 0x16f   :  { %v1737_v41 = vpop.f32.mrf.mxu0 }
 0x170   :  { %v1799_v34 = vpop.f32.mrf.mxu1 }
 0x171   :  { %v1738_v46 = vpop.f32.mrf.mxu0  ;;  %v1800_v33 = vadd.f32 %v1799_v34, %v1798_v0  ;;  %v1730_v0 = vadd.f32 %v1729_v40, %v1728_v28  ;;  %v1794_v34 = vadd.f32 %v1793_v31, %v1792_v35  ;;  %v1788_v28 = vadd.f32 %v2598_v56, %v2594_v27 }
 0x172   :  { %v1801_v52 = vpop.f32.mrf.mxu1  ;;  %v1739_v49 = vadd.f32 %v1738_v46, %v1737_v41  ;;  %v1733_v31 = vadd.f32 %v1732_v3, %v2606_v55  ;;  %v1727_v27 = vadd.f32 %v2600_v26, %v2596_v23  ;;  %v1791_v3 = vadd.f32 %v2604_v37, %v2602_v21 }
 0x173   :  { %v2608_v38 = vpop.f32.mrf.mxu0  ;;  %v1164_v42 = vadd.f32 %v1794_v34, %v1730_v0 }
 0x174   :  { %v1802_v22 = vpop.f32.mrf.mxu1 }
 0x175   :  { %v2610_v8 = vpop.f32.mrf.mxu0  ;;  %v1803_v32 = vadd.f32 %v1802_v22, %v1801_v52  ;;  %v1724_v52 = vadd.f32 %v2592_v59, %v2588_v36  ;;  %v1797_v22 = vadd.f32 %v1796_v63, %v1795_v51  ;;  %v1718_v36 = vadd.f32 %v2576_v1, %v2574_v50 }
 0x176   :  { %v2612_v15 = vpop.f32.mrf.mxu1  ;;  %v1782_v59 = vadd.f32 %v2582_v7, %v2578_v20  ;;  %v1721_v1 = vadd.f32 %v2584_v19, %v2580_v16  ;;  %v1785_v20 = vadd.f32 %v2590_v54, %v2586_v24  ;;  %v1742_v21 = vadd.f32 %v2610_v8, %v2608_v38 }
 0x177   :  { %v2614_v25 = vpop.f32.mrf.mxu0  ;;  %v1167_v51 = vadd.f32 %v1797_v22, %v1733_v31  ;;  %v1156_v63 = vadd.f32 %v1788_v28, %v1724_v52 }
 0x178   :  { %v2616_v13 = vpop.f32.mrf.mxu1  ;;  %v1148_v7 = vadd.f32 %v1782_v59, %v1718_v36 }
 0x179   :  { %v2618_v9 = vpop.f32.mrf.mxu0  ;;  %v1806_v37 = vadd.f32 %v2616_v13, %v2612_v15 }
 0x17a   :  { %v2620_v61 = vpop.f32.mrf.mxu1  ;;  %v1745_v19 = vadd.f32 %v2618_v9, %v2614_v25 }
 0x17b   :  { %v2622_v45 = vpop.f32.mrf.mxu0 }
 0x17c   :  { %2872 = vst [vmem:[#allocation2_spill] sm:$0xff] %v2622_v45  ;;  %v2624_v43 = vpop.f32.mrf.mxu1 }
 0x17d   :  { %2873 = vst [vmem:[#allocation3_spill] sm:$0xff] %v2624_v43  ;;  %v2626_v11 = vpop.f32.mrf.mxu0 }
 0x17e   :  { %v2628_v53 = vpop.f32.mrf.mxu1 }
 0x17f   :  { %2874 = vst [vmem:[#allocation4_spill] sm:$0xff] %v2628_v53  ;;  %v2630_v10 = vpop.f32.mrf.mxu0 }
 0x180   :  { %2875 = vst [vmem:[#allocation5_spill] sm:$0xff] %v2630_v10  ;;  %v2632_v5 = vpop.f32.mrf.mxu1  ;;  %v1172_v10 = vadd.f32 %v1800_v33, %v1736_v6  ;;  %v1151_v6 = vadd.f32 %v1785_v20, %v1721_v1  ;;  %v2775_v20 = vld [vmem:[%s2870_s2] ss:$0 sm:$0xff] }
 0x181   :  { %v2634_v14 = vpop.f32.mrf.mxu0 }
 0x182   :  { %v2636_v30 = vpop.f32.mrf.mxu1 }
 0x183   :  { %v1838_v45 = vpop.f32.mrf.mxu0  ;;  %v2877_v8 = vld [vmem:[#allocation2_spill] sm:$0xff] }
 0x184   :  { %v2638_v43 = vpop.f32.mrf.mxu1  ;;  %v2640_v58 = vadd.f32 %v1838_v45, %v1140_v48  ;;  %v1175_v45 = vadd.f32 %v1803_v32, %v1739_v49  ;;  %v2876_v24 = vld [vmem:[#allocation3_spill] sm:$0xff]  ;;  %v1748_v15 = vadd.f32 %v2626_v11, %v2877_v8  ;;  %v1180_v48 = vadd.f32 %v1806_v37, %v1742_v21 }
 0x185   :  { %v1228_v44 = vpop.f32.mrf.mxu0  ;;  %v1809_v54 = vadd.f32 %v2876_v24, %v2620_v61 }
 0x186   :  { %v1846_v53 = vpop.f32.mrf.mxu1  ;;  %1311 = vrot.lane.b32.xlu0 %v2640_v58, %s1936_s0  ;;  %v2653_v41 = vadd.f32 %v1228_v44, %v2570_v47  ;;  %v2878_v13 = vld [vmem:[#allocation4_spill] sm:$0xff] }
 0x187   :  { %v1839_v4 = vpop.f32.mrf.mxu0  ;;  %v2644_v29 = vadd.f32 %v1846_v53, %v1172_v10  ;;  %v1159_v10 = vadd.f32 %v1791_v3, %v1727_v27  ;;  %v1812_v33 = vadd.f32 %v2632_v5, %v2878_v13  ;;  %v1183_v25 = vadd.f32 %v1809_v54, %v1745_v19  ;;  %v2879_v32 = vld [vmem:[#allocation5_spill] sm:$0xff] }
 0x188   :  { %v1260_v18 = vpop.f32.mrf.mxu1  ;;  %v2646_v60 = vadd.f32 %v1839_v4, %v1143_v2  ;;  %v1751_v61 = vadd.f32 %v2634_v14, %v2879_v32  ;;  %v1815_v2 = vadd.f32 %v2638_v43, %v2636_v30 }
 0x189   :  { %v1231_v17 = vpop.f32.mrf.mxu0  ;;  %v2666_v47 = vadd.f32 %v1260_v18, %v1164_v42  ;;  %v1188_v4 = vadd.f32 %v1812_v33, %v1748_v15 }
 0x18a   :  { %v1847_v12 = vpop.f32.mrf.mxu1  ;;  %1313 = vrot.lane.b32.xlu1 %v2646_v60, %s1936_s0  ;;  %1327 = vrot.lane.b32.xlu0 %v2644_v29, %s1936_s0  ;;  %v2669_v53 = vadd.f32 %v1231_v17, %v2572_v57  ;;  %v1191_v18 = vadd.f32 %v1815_v2, %v1751_v61 }
 0x18b   :  { %v2655_v46 = vadd.f32 %v1847_v12, %v1175_v45  ;;  %v1842_v35 = vpop.f32.mrf.mxu0 }
 0x18c   :  { %v1263_v40 = vpop.f32.mrf.mxu1  ;;  %v1253_v50 = vadd.f32 %v1842_v35, %v1156_v63 }
 0x18d   :  { %v1244_v55 = vpop.f32.mrf.mxu0  ;;  %v2683_v57 = vadd.f32 %v1263_v40, %v1167_v51 }
 0x18e   :  { %1307 = vrot.lane.b32.xlu0 %v2653_v41, %s1936_s0  ;;  %1329 = vrot.lane.b32.xlu1 %v2655_v46, %s1936_s0  ;;  %v1850_v56 = vpop.f32.mrf.mxu1  ;;  %v1245_v39 = vadd.f32 %v1244_v55, %v1148_v7 }
 0x18f   :  { %v1843_v26 = vpop.f32.mrf.mxu0  ;;  %v1285_v11 = vadd.f32 %v1850_v56, %v1188_v4 }
 0x190   :  { %v1276_v23 = vpop.f32.mrf.mxu1  ;;  %v1256_v16 = vadd.f32 %v1843_v26, %v1159_v10 }
 0x191   :  { %v1247_v38 = vpop.f32.mrf.mxu0  ;;  %v1277_v44 = vadd.f32 %v1276_v23, %v1180_v48 }
 0x192   :  { %1309 = vrot.lane.b32.xlu1 %v2669_v53, %s1936_s0  ;;  %1323 = vrot.lane.b32.xlu0 %v2666_v47, %s1936_s0  ;;  %v1851_v62 = vpop.f32.mrf.mxu1  ;;  %v1248_v49 = vadd.f32 %v1247_v38, %v1151_v6 }
 0x193   :  { %v1288_v17 = vadd.f32 %v1851_v62, %v1191_v18 }
 0x194   :  { %v1279_v9 = vpop.f32.mrf.mxu1 }
 0x195   :  { %v1280_v5 = vadd.f32 %v1279_v9, %v1183_v25 }
 0x196   :  { %1325 = vrot.lane.b32.xlu1 %v2683_v57, %s1936_s0  ;;  %1319 = vrot.lane.b32.xlu0 %v1253_v50, %s1936_s0 }
 0x19a   :  { %1321 = vrot.lane.b32.xlu1 %v1256_v16, %s1936_s0  ;;  %1315 = vrot.lane.b32.xlu0 %v1245_v39, %s1936_s0 }
 0x19e   :  { %1317 = vrot.lane.b32.xlu1 %v1248_v49, %s1936_s0  ;;  %1331 = vrot.lane.b32.xlu0 %v1277_v44, %s1936_s0 }
 0x1a2   :  { %1333 = vrot.lane.b32.xlu1 %v1280_v5, %s1936_s0  ;;  %1335 = vrot.lane.b32.xlu0 %v1285_v11, %s1936_s0 }
 0x1a6   :  { %1337 = vrot.lane.b32.xlu1 %v1288_v17, %s1936_s0 }
 0x1f8   :  { %v1312_v0 = vpop.permute.xlu0 %1311 }
 0x1f9   :  { %v1357_v14 = vmax.f32 %v2640_v58, %v1312_v0 }
 0x1fb   :  { %1391 = vrot.lane.b32.xlu0 %v1357_v14, %s1935_s7 }
 0x1fc   :  { %v1328_v43 = vpop.permute.xlu0 %1327  ;;  %v1314_v30 = vpop.permute.xlu1 %1313 }
 0x1fd   :  { %v1365_v34 = vmax.f32 %v2644_v29, %v1328_v43  ;;  %v1358_v45 = vmax.f32 %v2646_v60, %v1314_v30 }
 0x1ff   :  { %1407 = vrot.lane.b32.xlu0 %v1365_v34, %s1935_s7  ;;  %1393 = vrot.lane.b32.xlu1 %v1358_v45, %s1935_s7 }
 0x200   :  { %v1308_v12 = vpop.permute.xlu0 %1307  ;;  %v1330_v52 = vpop.permute.xlu1 %1329 }
 0x201   :  { %v1355_v28 = vmax.f32 %v2653_v41, %v1308_v12  ;;  %v1366_v40 = vmax.f32 %v2655_v46, %v1330_v52 }
 0x203   :  { %1387 = vrot.lane.b32.xlu0 %v1355_v28, %s1935_s7  ;;  %1409 = vrot.lane.b32.xlu1 %v1366_v40, %s1935_s7 }
 0x204   :  { %v1324_v58 = vpop.permute.xlu0 %1323  ;;  %v1310_v35 = vpop.permute.xlu1 %1309 }
 0x205   :  { %v2726_v29 = vmax.f32 %v2666_v47, %v1324_v58  ;;  %v2729_v60 = vmax.f32 %v2669_v53, %v1310_v35 }
 0x207   :  { %1403 = vrot.lane.b32.xlu0 %v2726_v29, %s1935_s7  ;;  %1389 = vrot.lane.b32.xlu1 %v2729_v60, %s1935_s7 }
 0x208   :  { %v1320_v41 = vpop.permute.xlu0 %1319  ;;  %v1326_v46 = vpop.permute.xlu1 %1325 }
 0x209   :  { %v2735_v31 = vmax.f32 %v1253_v50, %v1320_v41  ;;  %v2738_v22 = vmax.f32 %v2683_v57, %v1326_v46 }
 0x20b   :  { %1399 = vrot.lane.b32.xlu0 %v2735_v31, %s1935_s7  ;;  %1405 = vrot.lane.b32.xlu1 %v2738_v22, %s1935_s7 }
 0x20c   :  { %v1316_v42 = vpop.permute.xlu0 %1315  ;;  %v1322_v47 = vpop.permute.xlu1 %1321 }
 0x20d   :  { %v2744_v53 = vmax.f32 %v1245_v39, %v1316_v42  ;;  %v2746_v36 = vmax.f32 %v1256_v16, %v1322_v47 }
 0x20f   :  { %1395 = vrot.lane.b32.xlu0 %v2744_v53, %s1935_s7  ;;  %1401 = vrot.lane.b32.xlu1 %v2746_v36, %s1935_s7 }
 0x210   :  { %v1332_v59 = vpop.permute.xlu0 %1331  ;;  %v1318_v27 = vpop.permute.xlu1 %1317 }
 0x211   :  { %v2752_v56 = vmax.f32 %v1277_v44, %v1332_v59  ;;  %v2754_v55 = vmax.f32 %v1248_v49, %v1318_v27 }
 0x213   :  { %1411 = vrot.lane.b32.xlu0 %v2752_v56, %s1935_s7  ;;  %1397 = vrot.lane.b32.xlu1 %v2754_v55, %s1935_s7 }
 0x214   :  { %v1336_v3 = vpop.permute.xlu0 %1335  ;;  %v1334_v51 = vpop.permute.xlu1 %1333 }
 0x215   :  { %v2760_v63 = vmax.f32 %v1285_v11, %v1336_v3  ;;  %v2762_v57 = vmax.f32 %v1280_v5, %v1334_v51 }
 0x217   :  { %1415 = vrot.lane.b32.xlu0 %v2760_v63, %s1935_s7  ;;  %1413 = vrot.lane.b32.xlu1 %v2762_v57, %s1935_s7 }
 0x218   :  { %v1338_v50 = vpop.permute.xlu1 %1337 }
 0x219   :  { %v2768_v1 = vmax.f32 %v1288_v17, %v1338_v50 }
 0x21b   :  { %1417 = vrot.lane.b32.xlu1 %v2768_v1, %s1935_s7 }
 0x26d   :  { %v1392_v7 = vpop.permute.xlu0 %1391 }
 0x26e   :  { %v1437_v23 = vmax.f32 %v1357_v14, %v1392_v7 }
 0x270   :  { %v1460_v26 = vadd.f32 %v2775_v20, %v1437_v23 }
 0x271   :  { %v1408_v21 = vpop.permute.xlu0 %1407  ;;  %v1394_v37 = vpop.permute.xlu1 %1393 }
 0x272   :  { %v1476_v10 = vmax.f32 %v1460_v26, 0.0  ;;  %v1445_v39 = vmax.f32 %v1365_v34, %v1408_v21  ;;  %v1438_v16 = vmax.f32 %v1358_v45, %v1394_v37 }
 0x274   :  { %v1674_v19 = vpack.c.bf16 %v1476_v10, %v1476_v10  ;;  %v1468_v24 = vadd.f32 %v2775_v20, %v1445_v39  ;;  %v1461_v54 = vadd.f32 %v2775_v20, %v1438_v16 }
 0x275   :  { %v1388_v62 = vpop.permute.xlu0 %1387  ;;  %v1410_v6 = vpop.permute.xlu1 %1409 }
 0x276   :  { %1557 = vst.msk [vmem:[%s2871_s3 + $0x8] sm:$0xf] %vm1554_vm5, %v1674_v19  ;;  %v1484_v38 = vmax.f32 %v1468_v24, 0.0  ;;  %v1477_v8 = vmax.f32 %v1461_v54, 0.0  ;;  %v1435_v15 = vmax.f32 %v1355_v28, %v1388_v62  ;;  %v1446_v13 = vmax.f32 %v1366_v40, %v1410_v6 }
 0x278   :  { %v1682_v33 = vpack.c.bf16 %v1484_v38, %v1484_v38  ;;  %v1675_v48 = vpack.c.bf16 %v1477_v8, %v1477_v8  ;;  %v1458_v44 = vadd.f32 %v2775_v20, %v1435_v15  ;;  %v1469_v49 = vadd.f32 %v2775_v20, %v1446_v13 }
 0x279   :  { %v1404_v25 = vpop.permute.xlu0 %1403  ;;  %v1390_v9 = vpop.permute.xlu1 %1389 }
 0x27a   :  { %1565 = vst.msk [vmem:[%s2871_s3 + $0x28] sm:$0xf] %vm1554_vm5, %v1682_v33  ;;  %1558 = vst.msk [vmem:[%s2871_s3 + $0xc] sm:$0xf] %vm1554_vm5, %v1675_v48  ;;  %v1474_v32 = vmax.f32 %v1458_v44, 0.0  ;;  %v1485_v61 = vmax.f32 %v1469_v49, 0.0  ;;  %v1443_v2 = vmax.f32 %v2726_v29, %v1404_v25  ;;  %v1436_v4 = vmax.f32 %v2729_v60, %v1390_v9 }
 0x27c   :  { %v1672_v11 = vpack.c.bf16 %v1474_v32, %v1474_v32  ;;  %v1683_v5 = vpack.c.bf16 %v1485_v61, %v1485_v61  ;;  %v1466_v18 = vadd.f32 %v2775_v20, %v1443_v2  ;;  %v1459_v17 = vadd.f32 %v2775_v20, %v1436_v4 }
 0x27d   :  { %v1400_v0 = vpop.permute.xlu0 %1399  ;;  %v1406_v14 = vpop.permute.xlu1 %1405 }
 0x27e   :  { %1555 = vst.msk [vmem:[%s2871_s3] sm:$0xf] %vm1554_vm5, %v1672_v11  ;;  %1566 = vst.msk [vmem:[%s2871_s3 + $0x2c] sm:$0xf] %vm1554_vm5, %v1683_v5  ;;  %v1482_v43 = vmax.f32 %v1466_v18, 0.0  ;;  %v1475_v30 = vmax.f32 %v1459_v17, 0.0  ;;  %v1441_v34 = vmax.f32 %v2735_v31, %v1400_v0  ;;  %v1444_v45 = vmax.f32 %v2738_v22, %v1406_v14 }
 0x280   :  { %v1680_v12 = vpack.c.bf16 %v1482_v43, %v1482_v43  ;;  %v1673_v52 = vpack.c.bf16 %v1475_v30, %v1475_v30  ;;  %v1464_v28 = vadd.f32 %v2775_v20, %v1441_v34  ;;  %v1467_v40 = vadd.f32 %v2775_v20, %v1444_v45 }
 0x281   :  { %v1396_v58 = vpop.permute.xlu0 %1395  ;;  %v1402_v35 = vpop.permute.xlu1 %1401 }
 0x282   :  { %1563 = vst.msk [vmem:[%s2871_s3 + $0x20] sm:$0xf] %vm1554_vm5, %v1680_v12  ;;  %1556 = vst.msk [vmem:[%s2871_s3 + $0x4] sm:$0xf] %vm1554_vm5, %v1673_v52  ;;  %v1480_v29 = vmax.f32 %v1464_v28, 0.0  ;;  %v1483_v60 = vmax.f32 %v1467_v40, 0.0  ;;  %v1439_v41 = vmax.f32 %v2744_v53, %v1396_v58  ;;  %v1442_v46 = vmax.f32 %v2746_v36, %v1402_v35 }
 0x284   :  { %v1678_v31 = vpack.c.bf16 %v1480_v29, %v1480_v29  ;;  %v1681_v22 = vpack.c.bf16 %v1483_v60, %v1483_v60  ;;  %v1462_v42 = vadd.f32 %v2775_v20, %v1439_v41  ;;  %v1465_v47 = vadd.f32 %v2775_v20, %v1442_v46 }
 0x285   :  { %v1412_v59 = vpop.permute.xlu0 %1411  ;;  %v1398_v27 = vpop.permute.xlu1 %1397 }
 0x286   :  { %1561 = vst.msk [vmem:[%s2871_s3 + $0x18] sm:$0xf] %vm1554_vm5, %v1678_v31  ;;  %1564 = vst.msk [vmem:[%s2871_s3 + $0x24] sm:$0xf] %vm1554_vm5, %v1681_v22  ;;  %v1478_v53 = vmax.f32 %v1462_v42, 0.0  ;;  %v1481_v36 = vmax.f32 %v1465_v47, 0.0  ;;  %v1447_v3 = vmax.f32 %v2752_v56, %v1412_v59  ;;  %v1440_v51 = vmax.f32 %v2754_v55, %v1398_v27 }
 0x288   :  { %v1676_v50 = vpack.c.bf16 %v1478_v53, %v1478_v53  ;;  %v1679_v7 = vpack.c.bf16 %v1481_v36, %v1481_v36  ;;  %v1470_v23 = vadd.f32 %v2775_v20, %v1447_v3  ;;  %v1463_v26 = vadd.f32 %v2775_v20, %v1440_v51 }
 0x289   :  { %v1416_v21 = vpop.permute.xlu0 %1415  ;;  %v1414_v37 = vpop.permute.xlu1 %1413 }
 0x28a   :  { %1559 = vst.msk [vmem:[%s2871_s3 + $0x10] sm:$0xf] %vm1554_vm5, %v1676_v50  ;;  %1562 = vst.msk [vmem:[%s2871_s3 + $0x1c] sm:$0xf] %vm1554_vm5, %v1679_v7  ;;  %v1486_v56 = vmax.f32 %v1470_v23, 0.0  ;;  %v1479_v55 = vmax.f32 %v1463_v26, 0.0  ;;  %v1449_v10 = vmax.f32 %v2760_v63, %v1416_v21  ;;  %v1448_v39 = vmax.f32 %v2762_v57, %v1414_v37 }
 0x28c   :  { %v1684_v16 = vpack.c.bf16 %v1486_v56, %v1486_v56  ;;  %v1677_v19 = vpack.c.bf16 %v1479_v55, %v1479_v55  ;;  %v1472_v24 = vadd.f32 %v2775_v20, %v1449_v10  ;;  %v1471_v54 = vadd.f32 %v2775_v20, %v1448_v39 }
 0x28d   :  { %v1418_v62 = vpop.permute.xlu1 %1417 }
 0x28e   :  { %1567 = vst.msk [vmem:[%s2871_s3 + $0x30] sm:$0xf] %vm1554_vm5, %v1684_v16  ;;  %1560 = vst.msk [vmem:[%s2871_s3 + $0x14] sm:$0xf] %vm1554_vm5, %v1677_v19  ;;  %v1488_v63 = vmax.f32 %v1472_v24, 0.0  ;;  %v1487_v6 = vmax.f32 %v1471_v54, 0.0  ;;  %v1450_v57 = vmax.f32 %v2768_v1, %v1418_v62 }
 0x290   :  { %v1686_v38 = vpack.c.bf16 %v1488_v63, %v1488_v63  ;;  %v1685_v8 = vpack.c.bf16 %v1487_v6, %v1487_v6  ;;  %v1473_v15 = vadd.f32 %v2775_v20, %v1450_v57 }
 0x292   :  { %1569 = vst.msk [vmem:[%s2871_s3 + $0x38] sm:$0xf] %vm1554_vm5, %v1686_v38  ;;  %1568 = vst.msk [vmem:[%s2871_s3 + $0x34] sm:$0xf] %vm1554_vm5, %v1685_v8  ;;  %v1489_v13 = vmax.f32 %v1473_v15, 0.0 }
 0x294   :  { %v1687_v33 = vpack.c.bf16 %v1489_v13, %v1489_v13 }
 0x296   :  { %1570 = vst.msk [vmem:[%s2871_s3 + $0x3c] sm:$0xf] %vm1554_vm5, %v1687_v33 }

// kernel: fmnistnet_forward.6
= control target key start
LH: loop header
LB: loop body
LE: loop exit
PB: predicated region body
PF: predicated region fallthrough
CT: control target
= control target key end

     0   :  { %vm77_vm0 = vsmask.f32 7424  ;;  %vm155_vm1 = vcmask 1044480   ;;  %vm128_vm2 = vcmask 1046528   ;;  %vm257_vm3 = vcmask 1045504   ;;  %s1836_s26 = smov 64   ;;  %s2375_s1 = inlined_call_operand.vmem [shape: bf16[1152,128], index: 1, kind: input, shape index: {}]   ;;  %s2376_s0 = inlined_call_operand.vmem [shape: bf16[2,48,128], index: 0, kind: input, shape index: {}]   ;;  %s2377_s2 = inlined_call_operand.vmem [shape: f32[1,32], index: 2, kind: input, shape index: {}]   ;;  %s2378_s3 = inlined_call_operand.vmem [shape: bf16[2,32,32], index: 3, kind: output, shape index: {}]  }
   0x1   :  { %v1735_v0 = vld [vmem:[%s2375_s1 + $0x78] sm:$0xff]   ;;  %v1739_v4 = vld [vmem:[%s2375_s1 + $0x70] sm:$0xff]   ;;  %v1743_v8 = vld [vmem:[%s2375_s1 + $0x68] sm:$0xff]   ;;  %vm278_vm4 = vsmask.f32 5376  ;;  %vm1391_vm6 = vcmask 257024  }
   0x2   :  { %v1736_v1 = vld [vmem:[%s2375_s1 + $0xf8] sm:$0xff]   ;;  %1521 = vmatprep.subr.bf16.mxu0 %v1735_v0  ;;  %v1740_v5 = vld [vmem:[%s2375_s1 + $0xf0] sm:$0xff]   ;;  %v1744_v9 = vld [vmem:[%s2375_s1 + $0xe8] sm:$0xff]   ;;  %vm176_vm5 = vsmask.f32 4352 }
   0x3   :  { %v1737_v2 = vld [vmem:[%s2375_s1 + $0x38] sm:$0xff]   ;;  %1561 = vmatprep.subr.bf16.mxu1 %v1736_v1  ;;  %v1741_v6 = vld [vmem:[%s2375_s1 + $0x30] sm:$0xff]   ;;  %v1745_v10 = vld [vmem:[%s2375_s1 + $0x28] sm:$0xff]  }
   0x4   :  { %v1738_v3 = vld [vmem:[%s2375_s1 + $0xb8] sm:$0xff]   ;;  %1522 = vmatpush3.bf16.msra.mxu0 %v1737_v2  ;;  %v1742_v7 = vld [vmem:[%s2375_s1 + $0xb0] sm:$0xff]   ;;  %v1746_v11 = vld [vmem:[%s2375_s1 + $0xa8] sm:$0xff]  }
   0x5   :  { %1562 = vmatpush3.bf16.msra.mxu1 %v1738_v3  ;;  %1523 = vmatprep.subr.bf16.mxu0 %v1739_v4  ;;  %v1747_v12 = vld [vmem:[%s2375_s1 + $0x60] sm:$0xff]   ;;  %v1751_v16 = vld [vmem:[%s2375_s1 + $0x58] sm:$0xff]   ;;  %v1755_v20 = vld [vmem:[%s2375_s1 + $0x50] sm:$0xff]  }
   0x6   :  { %1563 = vmatprep.subr.bf16.mxu1 %v1740_v5  ;;  %v1748_v13 = vld [vmem:[%s2375_s1 + $0xe0] sm:$0xff]   ;;  %v1752_v17 = vld [vmem:[%s2375_s1 + $0xd8] sm:$0xff]   ;;  %v1756_v21 = vld [vmem:[%s2375_s1 + $0xd0] sm:$0xff]  }
   0x7   :  { %v1749_v14 = vld [vmem:[%s2375_s1 + $0x20] sm:$0xff]   ;;  %v1753_v18 = vld [vmem:[%s2375_s1 + $0x18] sm:$0xff]   ;;  %v1757_v22 = vld [vmem:[%s2375_s1 + $0x10] sm:$0xff]  }
   0x8   :  { %1524 = vmatpush3.bf16.msra.mxu0 %v1741_v6  ;;  %v1750_v15 = vld [vmem:[%s2375_s1 + $0xa0] sm:$0xff]   ;;  %v1754_v19 = vld [vmem:[%s2375_s1 + $0x98] sm:$0xff]   ;;  %v1758_v23 = vld [vmem:[%s2375_s1 + $0x90] sm:$0xff]  }
   0x9   :  { %1564 = vmatpush3.bf16.msra.mxu1 %v1742_v7  ;;  %1525 = vmatprep.subr.bf16.mxu0 %v1743_v8  ;;  %v1759_v24 = vld [vmem:[%s2375_s1 + $0x48] sm:$0xff]   ;;  %v1763_v28 = vld [vmem:[%s2375_s1 + $0x40] sm:$0xff]   ;;  %v1771_v42 = vld [vmem:[%s2375_s1 + $0x178] sm:$0xff]  }
   0xa   :  { %1565 = vmatprep.subr.bf16.mxu1 %v1744_v9  ;;  %v1760_v25 = vld [vmem:[%s2375_s1 + $0xc8] sm:$0xff]   ;;  %v1764_v29 = vld [vmem:[%s2375_s1 + $0xc0] sm:$0xff]   ;;  %v1772_v49 = vld [vmem:[%s2375_s1 + $0x1f8] sm:$0xff]  }
   0xb   :  { %v1761_v26 = vld [vmem:[%s2375_s1 + $0x8] sm:$0xff]   ;;  %v1765_v30 = vld [vmem:[%s2375_s1] sm:$0xff]   ;;  %v1773_v54 = vld [vmem:[%s2375_s1 + $0x138] sm:$0xff]  }
   0xc   :  { %1526 = vmatpush3.bf16.msra.mxu0 %v1745_v10  ;;  %v1762_v27 = vld [vmem:[%s2375_s1 + $0x88] sm:$0xff]   ;;  %v1766_v31 = vld [vmem:[%s2375_s1 + $0x80] sm:$0xff]   ;;  %v1774_v57 = vld [vmem:[%s2375_s1 + $0x1b8] sm:$0xff]  }
   0xd   :  { %1566 = vmatpush3.bf16.msra.mxu1 %v1746_v11  ;;  %1527 = vmatprep.subr.bf16.mxu0 %v1747_v12  ;;  %v15_v32 = vld [vmem:[%s2376_s0] sm:$0xf]  ;;  %v1959_v33 = vld [vmem:[%s2376_s0 + $0x4] sm:$0xf]  ;;  %v1964_v34 = vld [vmem:[%s2376_s0 + $0x8] sm:$0xf] }
   0xe   :  { %1567 = vmatprep.subr.bf16.mxu1 %v1748_v13  ;;  %v1969_v35 = vld [vmem:[%s2376_s0 + $0xc] sm:$0xf]  ;;  %v1404_v36 = vcombine.low %v15_v32, %v1959_v33  ;;  %v27_v37 = vld [vmem:[%s2376_s0] sm:$0x8]  ;;  %v1775_v58 = vld [vmem:[%s2375_s1 + $0x170] sm:$0xff]  }
   0xf   :  { %v25_v38 = vld [vmem:[%s2376_s0] sm:$0xe]  ;;  %v1405_v39 = vcombine.low %v1964_v34, %v1969_v35  ;;  %v1981_v40 = vcombine.low %v27_v37, %v1959_v33  ;;  %v1776_v60 = vld [vmem:[%s2375_s1 + $0x1f0] sm:$0xff]   ;;  %v1781_v2 = vld [vmem:[%s2375_s1 + $0x168] sm:$0xff]  }
  0x10   :  { %1528 = vmatpush3.bf16.msra.mxu0 %v1749_v14  ;;  %v1410_v41 = vcombine.low %v25_v38, %v1959_v33  ;;  %v79_v43 = vshrl.u32 %v1404_v36, 16  ;;  %v81_v44 = vshll.u32 %v1404_v36, 16  ;;  %v1777_v62 = vld [vmem:[%s2375_s1 + $0x130] sm:$0xff]   ;;  %v1782_v7 = vld [vmem:[%s2375_s1 + $0x1e8] sm:$0xff]   ;;  %v1793_v32 = vld [vmem:[%s2375_s1 + $0x158] sm:$0xff]  }
  0x11   :  { %1568 = vmatpush3.bf16.msra.mxu1 %v1750_v15  ;;  %1529 = vmatprep.subr.bf16.mxu0 %v1751_v16  ;;  %v86_v45 = vshll.u32 %v1405_v39, 16  ;;  %v156_v46 = vrot.slane %v1981_v40, 3  ;;  %v157_v47 = vrot.slane %v1405_v39, 3  ;;  %v130_v51 = vrot.slane %v1405_v39, 1  ;;  %v1778_v63 = vld [vmem:[%s2375_s1 + $0x1b0] sm:$0xff]   ;;  %v1783_v10 = vld [vmem:[%s2375_s1 + $0x128] sm:$0xff]  }
  0x12   :  { %1569 = vmatprep.subr.bf16.mxu1 %v1752_v17  ;;  %v129_v48 = vrot.slane %v1410_v41, 1  ;;  %v83_v50 = vrot.slane %v81_v44, 1  ;;  %v90_v61 = vshrl.u32 %v1405_v39, 16  ;;  %v1779_v0 = vld [vmem:[%s2376_s0 + $0x10] ss:$0 sps:$4 sm:$0x11]  }
  0x13   :  { %v88_v52 = vrot.slane %v86_v45, 1  ;;  %v158_v53 = vsel %vm155_vm1, %v156_v46, %v157_v47  ;;  %v1780_v1 = vld [vmem:[%s2376_s0 + $0x10] ss:$0 sps:$4 sm:$0x77]   ;;  %v94_v4 = vshll.u32 %v1779_v0, 16  ;;  %v132_v5 = vrot.slane %v1779_v0, 1 }
  0x14   :  { %1530 = vmatpush3.bf16.msra.mxu0 %v1753_v18  ;;  %v84_v55 = vor.u32 %v83_v50, %v79_v43  ;;  %1028 = vmatprep.mubr.bf16.mxu1 %v158_v53  ;;  %v131_v56 = vsel %vm128_vm2, %v129_v48, %v130_v51  ;;  %v159_v6 = vrot.slane %v1780_v1, 3  ;;  %v1784_v12 = vld [vmem:[%s2375_s1 + $0x1a8] sm:$0xff]   ;;  %v178_v13 = vshrl.u32 %v1981_v40, 16  ;;  %v1785_v15 = vld [vmem:[%s2375_s1 + $0x160] sm:$0xff]   ;;  %v1794_v44 = vld [vmem:[%s2375_s1 + $0x1d8] sm:$0xff]  }
  0x15   :  { %1570 = vmatpush3.bf16.msra.mxu1 %v1754_v19  ;;  %1531 = vmatprep.subr.bf16.mxu0 %v1755_v20  ;;  %v92_v3 = vor.u32 %v90_v61, %v88_v52  ;;  %v96_v8 = vrot.slane %v94_v4, 1  ;;  %v133_v9 = vsel %vm128_vm2, %v130_v51, %v132_v5  ;;  %v2037_v16 = vrot.slane %v86_v45, 4  ;;  %v1786_v17 = vld [vmem:[%s2375_s1 + $0x1e0] sm:$0xff]   ;;  %v1795_v45 = vld [vmem:[%s2375_s1 + $0x118] sm:$0xff]   ;;  %v1804_v0 = vld [vmem:[%s2375_s1 + $0x1c8] sm:$0xff]  }
  0x16   :  { %1571 = vmatprep.subr.bf16.mxu1 %v1756_v21  ;;  %v89_v59 = vsel %vm77_vm0, %v84_v55, %v88_v52  ;;  %v160_v11 = vsel %vm155_vm1, %v157_v47, %v159_v6  ;;  %v2042_v18 = vrot.slane %v90_v61, 3  ;;  %v1787_v19 = vld [vmem:[%s2375_s1 + $0x120] sm:$0xff]   ;;  %v2050_v21 = vrot.slane %v178_v13, 3  ;;  %v1797_v52 = vld [vmem:[%s2375_s1 + $0x150] sm:$0xff]   ;;  %v1805_v5 = vld [vmem:[%s2375_s1 + $0x108] sm:$0xff]  }
  0x17   :  { %963 = vmatprep.mubr.bf16.mxu0 %v89_v59  ;;  %v97_v14 = vsel %vm77_vm0, %v92_v3, %v96_v8  ;;  %v1788_v20 = vld [vmem:[%s2375_s1 + $0x1a0] sm:$0xff]   ;;  %v1800_v59 = vld [vmem:[%s2375_s1 + $0x190] sm:$0xff]   ;;  %v1801_v61 = vld [vmem:[%s2376_s0 + $0x28] ss:$0 sps:$4 sm:$0x11]  }
  0x18   :  { %1532 = vmatpush3.bf16.msra.mxu0 %v1757_v22  ;;  %v19_v22 = vld [vmem:[%s2376_s0 + $0x18] sm:$0xf]  ;;  %v137_v3 = vrot.slane %v1801_v61, 1  ;;  %v1806_v8 = vld [vmem:[%s2375_s1 + $0x188] sm:$0xff]   ;;  %v1808_v13 = vld [vmem:[%s2375_s1 + $0x1c0] sm:$0xff]  }
  0x19   :  { %1572 = vmatpush3.bf16.msra.mxu1 %v1758_v23  ;;  %1533 = vmatprep.subr.bf16.mxu0 %v1759_v24  ;;  %v2058_v23 = vld [vmem:[%s2376_s0 + $0x1c] sm:$0xf]  ;;  %v2063_v24 = vld [vmem:[%s2376_s0 + $0x20] sm:$0xf] }
  0x1a   :  { %1573 = vmatprep.subr.bf16.mxu1 %v1760_v25  ;;  %v2068_v25 = vld [vmem:[%s2376_s0 + $0x24] sm:$0xf] }
  0x1c   :  { %1534 = vmatpush3.bf16.msra.mxu0 %v1761_v26  ;;  %v1406_v26 = vcombine.low %v19_v22, %v2058_v23  ;;  %v1814_v22 = vld [vmem:[%s2375_s1 + $0x238] sm:$0xff]  }
  0x1d   :  { %1574 = vmatpush3.bf16.msra.mxu1 %v1762_v27  ;;  %1535 = vmatprep.subr.bf16.mxu0 %v1763_v28  ;;  %v29_v27 = vld [vmem:[%s2376_s0 + $0x18] sm:$0x8] }
  0x1e   :  { %1575 = vmatprep.subr.bf16.mxu1 %v1764_v29  ;;  %v26_v28 = vld [vmem:[%s2376_s0 + $0x18] sm:$0xe]  ;;  %v2079_v29 = vcombine.low %v2063_v24, %v2068_v25  ;;  %v99_v37 = vshrl.u32 %v1406_v26, 16  ;;  %v101_v38 = vshll.u32 %v1406_v26, 16 }
  0x20   :  { %1536 = vmatpush3.bf16.msra.mxu0 %v1765_v30  ;;  %v2082_v30 = vcombine.low %v29_v27, %v2058_v23  ;;  %v135_v46 = vrot.slane %v2079_v29, 1  ;;  %v110_v55 = vshrl.u32 %v2079_v29, 16 }
  0x21   :  { %1576 = vmatpush3.bf16.msra.mxu1 %v1766_v31  ;;  %1601 = vmatprep.subr.bf16.mxu0 %v1771_v42  ;;  %v1411_v31 = vcombine.low %v26_v28, %v2058_v23  ;;  %v162_v42 = vrot.slane %v2079_v29, 3 }
  0x22   :  { %1641 = vmatprep.subr.bf16.mxu1 %v1772_v49  ;;  %v161_v41 = vrot.slane %v2082_v30, 3  ;;  %v1796_v49 = vld [vmem:[%s2375_s1 + $0x198] sm:$0xff]  }
  0x23   :  { %964 = vmatmul.mubr.bf16.vlgmr.msra.gmra.mxu0 %v1404_v36  ;;  %v181_v36 = vshll.u32 %v1981_v40, 16  ;;  %v134_v43 = vrot.slane %v1411_v31, 1  ;;  %v103_v40 = vrot.slane %v101_v38, 1  ;;  %v31_v38 = vld [vmem:[%s2376_s0 + $0x10] sm:$0xf] }
  0x24   :  { %1029 = vmatmul.mubr.bf16.vlgmr.msra.gmra.mxu1 %v131_v56  ;;  %1602 = vmatpush3.bf16.msra.mxu0 %v1773_v54  ;;  %v163_v48 = vsel %vm155_vm1, %v161_v41, %v162_v42  ;;  %v1798_v54 = vld [vmem:[%s2375_s1 + $0x1d0] sm:$0xff]  }
  0x25   :  { %1642 = vmatpush3.bf16.msra.mxu1 %v1774_v57  ;;  %1603 = vmatprep.subr.bf16.mxu0 %v1775_v58  ;;  %v104_v50 = vor.u32 %v103_v40, %v99_v37  ;;  %v136_v51 = vsel %vm128_vm2, %v134_v43, %v135_v46  ;;  %v183_v53 = vrot.slane %v181_v36, 4  ;;  %v1799_v57 = vld [vmem:[%s2375_s1 + $0x110] sm:$0xff]   ;;  %v199_v58 = vshrl.u32 %v2082_v30, 16 }
  0x26   :  { %1643 = vmatprep.subr.bf16.mxu1 %v1776_v60  ;;  %1036 = vmatprep.mubr.bf16.mxu1 %v160_v11  ;;  %v202_v60 = vshll.u32 %v2082_v30, 16  ;;  %v1419_v40 = vcombine.low %v1969_v35, %v31_v38 }
  0x27   :  { %971 = vmatprep.mubr.bf16.mxu0 %v97_v14  ;;  %v2160_v14 = vor.u32 %v2037_v16, %v2042_v18  ;;  %v2175_v16 = vld [vmem:[%s2376_s0 + $0x8] sm:$0xf] }
  0x28   :  { %1604 = vmatpush3.bf16.msra.mxu0 %v1777_v62  ;;  %v1803_v62 = vld [vmem:[%s2375_s1 + $0x148] sm:$0xff]  }
  0x29   :  { %1644 = vmatpush3.bf16.msra.mxu1 %v1778_v63  ;;  %1605 = vmatprep.subr.bf16.mxu0 %v1781_v2  ;;  %v1802_v63 = vld [vmem:[%s2376_s0 + $0x28] ss:$0 sps:$4 sm:$0x77]   ;;  %v114_v2 = vshll.u32 %v1801_v61, 16 }
  0x2a   :  { %1645 = vmatprep.subr.bf16.mxu1 %v1782_v7  ;;  %v164_v4 = vrot.slane %v1802_v63, 3  ;;  %v138_v7 = vsel %vm128_vm2, %v135_v46, %v137_v3  ;;  %v2201_v46 = vld [vmem:[%s2376_s0 + $0x14] ss:$0 sps:$4 sm:$0x77]  }
  0x2b   :  { %972 = vmatmul.mubr.bf16.gmra.mxu0 %v1405_v39  ;;  %v106_v39 = vshll.u32 %v2079_v29, 16  ;;  %v116_v6 = vrot.slane %v114_v2, 1  ;;  %v2233_v2 = vld [vmem:[%s2376_s0 + $0x24] sm:$0xff]  }
  0x2c   :  { %1037 = vmatmul.mubr.bf16.gmra.mxu1 %v133_v9  ;;  %1606 = vmatpush3.bf16.msra.mxu0 %v1783_v10  ;;  %v165_v9 = vsel %vm155_vm1, %v162_v42, %v164_v4  ;;  %v1418_v10 = vcombine.low %v1959_v33, %v1964_v34  ;;  %v1809_v33 = vld [vmem:[%s2375_s1 + $0x100] sm:$0xff]   ;;  %v184_v34 = vor.u32 %v183_v53, %v2050_v21  ;;  %v2181_v21 = vld [vmem:[%s2376_s0 + $0xc] sm:$0xff]   ;;  %v297_v53 = vshrl.u32 %v2201_v46, 16 }
  0x2d   :  { %1646 = vmatpush3.bf16.msra.mxu1 %v1784_v12  ;;  %1607 = vmatprep.subr.bf16.mxu0 %v1785_v15  ;;  %v108_v47 = vrot.slane %v106_v39, 1  ;;  %v1807_v12 = vld [vmem:[%s2375_s1 + $0x140] sm:$0xff]   ;;  %v2162_v15 = vrot.slane %v199_v58, 3  ;;  %v288_v30 = vshrl.u32 %v2181_v21, 16  ;;  %v291_v31 = vshll.u32 %v2181_v21, 16 }
  0x2e   :  { %1647 = vmatprep.subr.bf16.mxu1 %v1786_v17  ;;  %1044 = vmatprep.mubr.bf16.mxu1 %v163_v48  ;;  %v1810_v17 = vld [vmem:[%s2375_s1 + $0x180] sm:$0xff]   ;;  %v259_v37 = vrot.slane %v2181_v21, 2  ;;  %v2209_v48 = vld [vmem:[%s2375_s1 + $0x228] sm:$0xff]   ;;  %v299_v61 = vrot.slane %v297_v53, 2  ;;  %v1420_v4 = vcombine.low %v2058_v23, %v2063_v24 }
  0x2f   :  { %v109_v56 = vsel %vm77_vm0, %v104_v50, %v108_v47  ;;  %v112_v1 = vor.u32 %v110_v55, %v108_v47  ;;  %v290_v43 = vrot.slane %v288_v30, 2  ;;  %v1819_v47 = vld [vmem:[%s2376_s0 + $0x14] ss:$0 sps:$4 sm:$0x33]   ;;  %v2221_v58 = vld [vmem:[%s2376_s0 + $0x20] sm:$0xf] }
  0x30   :  { %1608 = vmatpush3.bf16.msra.mxu0 %v1787_v19  ;;  %979 = vmatprep.mubr.bf16.mxu0 %v109_v56  ;;  %v33_v19 = vld [vmem:[%s2376_s0 + $0x4] sm:$0xc]  ;;  %v32_v23 = vld [vmem:[%s2376_s0 + $0x28] sm:$0xf] }
  0x31   :  { %1648 = vmatpush3.bf16.msra.mxu1 %v1788_v20  ;;  %1609 = vmatprep.subr.bf16.mxu0 %v1793_v32  ;;  %v117_v11 = vsel %vm77_vm0, %v112_v1, %v116_v6  ;;  %v2170_v20 = vrot.slane %v202_v60, 4  ;;  %v1422_v18 = vcombine.low %v33_v19, %v2175_v16  ;;  %v1815_v32 = vld [vmem:[%s2375_s1 + $0x230] sm:$0xff]   ;;  %v207_v60 = vrot.slane %v106_v39, 4  ;;  %v1821_v39 = vld [vmem:[%s2375_s1 + $0x220] sm:$0xff]  }
  0x32   :  { %1649 = vmatprep.subr.bf16.mxu1 %v1794_v44  ;;  %v293_v44 = vrot.slane %v291_v31, 3 }
  0x33   :  { %980 = vmatmul.mubr.bf16.gmra.mxu0 %v1406_v26  ;;  %v188_v26 = vsel %vm176_vm5, %v184_v34, %v2160_v14  ;;  %v280_v27 = vshrl.u32 %v1422_v18, 16  ;;  %v283_v28 = vshll.u32 %v1422_v18, 16  ;;  %v258_v36 = vrot.slane %v1422_v18, 2  ;;  %v1825_v18 = vld [vmem:[%s2375_s1 + $0x218] sm:$0xff]  }
  0x34   :  { %1610 = vmatpush3.bf16.msra.mxu0 %v1795_v45  ;;  %1045 = vmatmul.mubr.bf16.gmra.mxu1 %v136_v51  ;;  %v1416_v45 = vcombine.low %v31_v38, %v31_v38  ;;  %v294_v50 = vor.u32 %v293_v44, %v290_v43  ;;  %v45_v43 = vld [vmem:[%s2376_s0 + $0x4] sm:$0x8]  ;;  %v1826_v44 = vld [vmem:[%s2375_s1 + $0x210] sm:$0xff]  }
  0x35   :  { %1650 = vmatpush3.bf16.msra.mxu1 %v1796_v49  ;;  %1611 = vmatprep.subr.bf16.mxu0 %v1797_v52  ;;  %v282_v41 = vrot.slane %v280_v27, 2  ;;  %v285_v42 = vrot.slane %v283_v28, 3  ;;  %v260_v51 = vsel %vm257_vm3, %v258_v36, %v259_v37  ;;  %v264_v36 = vrot.slane %v2233_v2, 2 }
  0x36   :  { %1651 = vmatprep.subr.bf16.mxu1 %v1798_v54  ;;  %1052 = vmatprep.mubr.bf16.mxu1 %v165_v9  ;;  %v190_v35 = vshrl.u32 %v1416_v45, 16  ;;  %v193_v52 = vshll.u32 %v1416_v45, 16  ;;  %v300_v54 = vshll.u32 %v2201_v46, 16  ;;  %v1430_v45 = vcombine.low %v45_v43, %v2175_v16 }
  0x37   :  { %987 = vmatprep.mubr.bf16.mxu0 %v117_v11  ;;  %v286_v49 = vor.u32 %v285_v42, %v282_v41  ;;  %v205_v11 = vor.u32 %v2170_v20, %v2162_v15  ;;  %v2260_v15 = vld [vmem:[%s2376_s0 + $0x2c] ss:$0 sps:$4 sm:$0x77]  }
  0x38   :  { %1612 = vmatpush3.bf16.msra.mxu0 %v1799_v57  ;;  %v38_v57 = vld [vmem:[%s2376_s0 + $0x1c] sm:$0xc]  ;;  %v192_v63 = vrot.slane %v190_v35, 3  ;;  %v323_v27 = vshrl.u32 %v2260_v15, 16  ;;  %v326_v28 = vshll.u32 %v2260_v15, 16  ;;  %v341_v35 = vrot.slane %v1430_v45, 3 }
  0x39   :  { %1652 = vmatpush3.bf16.msra.mxu1 %v1800_v59  ;;  %1613 = vmatprep.subr.bf16.mxu0 %v1803_v62  ;;  %v295_v56 = vsel %vm278_vm4, %v286_v49, %v294_v50  ;;  %v206_v59 = vrot.slane %v110_v55, 3  ;;  %v302_v62 = vrot.slane %v300_v54, 3  ;;  %v2228_v1 = vcombine.low %v38_v57, %v2221_v58 }
  0x3a   :  { %1653 = vmatprep.subr.bf16.mxu1 %v1804_v0  ;;  %v195_v0 = vrot.slane %v193_v52, 4  ;;  %v328_v38 = vrot.slane %v326_v28, 3 }
  0x3b   :  { %988 = vmatmul.mubr.bf16.gmra.mxu0 %v2079_v29  ;;  %v303_v55 = vor.u32 %v302_v62, %v299_v61  ;;  %v261_v29 = vrot.slane %v1819_v47, 2  ;;  %v309_v6 = vshll.u32 %v2228_v1, 16  ;;  %v46_v47 = vld [vmem:[%s2376_s0 + $0x1c] sm:$0x8]  ;;  %v344_v62 = vrot.slane %v2201_v46, 3 }
  0x3c   :  { %1614 = vmatpush3.bf16.msra.mxu0 %v1805_v5  ;;  %1053 = vmatmul.mubr.bf16.gmra.mxu1 %v138_v7  ;;  %v196_v3 = vor.u32 %v195_v0, %v192_v63  ;;  %v306_v5 = vshrl.u32 %v2228_v1, 16  ;;  %v314_v7 = vshrl.u32 %v2233_v2, 16  ;;  %v349_v0 = vrot.slane %v2260_v15, 3 }
  0x3d   :  { %1654 = vmatpush3.bf16.msra.mxu1 %v1806_v8  ;;  %1615 = vmatprep.subr.bf16.mxu0 %v1807_v12  ;;  %v317_v8 = vshll.u32 %v2233_v2, 16  ;;  %v304_v9 = vsel %vm278_vm4, %v294_v50, %v303_v55  ;;  %v2250_v12 = vor.u32 %v207_v60, %v206_v59  ;;  %v1431_v50 = vcombine.low %v46_v47, %v2221_v58  ;;  %v1832_v60 = vld [vmem:[%s2375_s1 + $0x200] sm:$0xff]  }
  0x3e   :  { %1655 = vmatprep.subr.bf16.mxu1 %v1808_v13  ;;  %1093 = vmatprep.mubr.bf16.mxu0 %v1418_v10  ;;  %v197_v10 = vsel %vm176_vm5, %v2160_v14, %v196_v3  ;;  %v308_v24 = vrot.slane %v306_v5, 2  ;;  %v311_v13 = vrot.slane %v309_v6, 3  ;;  %v1417_v14 = vcombine.low %v32_v23, %v32_v23 }
  0x3f   :  { %1158 = vmatprep.mubr.bf16.mxu1 %v295_v56  ;;  %v319_v34 = vrot.slane %v317_v8, 3  ;;  %v209_v31 = vsel %vm176_vm5, %v205_v11, %v2250_v12  ;;  %v346_v53 = vrot.slane %v1431_v50, 3  ;;  %v1831_v56 = vld [vmem:[%s2375_s1 + $0x208] sm:$0xff]   ;;  %s1835_s1 = smov 96  }
  0x40   :  { %1616 = vmatpush3.bf16.msra.mxu0 %v1809_v33  ;;  %v316_v33 = vrot.slane %v314_v7, 2  ;;  %v312_v19 = vor.u32 %v311_v13, %v308_v24 }
  0x41   :  { %1656 = vmatpush3.bf16.msra.mxu1 %v1810_v17  ;;  %1693 = vmatprep.subr.bf16.mxu0 %v1814_v22  ;;  %v262_v17 = vsel %vm257_vm3, %v259_v37, %v261_v29  ;;  %v325_v37 = vrot.slane %v323_v27, 2 }
  0x42   :  { %1717 = vmatprep.subr.bf16.mxu1 %v1814_v22  ;;  %v320_v20 = vor.u32 %v319_v34, %v316_v33 }
  0x43   :  { %1094 = vmatmul.mubr.bf16.vlgmr.msra.gmra.mxu0 %v188_v26  ;;  %v214_v26 = vshll.u32 %v1417_v14, 16  ;;  %v329_v49 = vor.u32 %v328_v38, %v325_v37 }
  0x44   :  { %1694 = vmatpush3.bf16.msra.mxu0 %v1814_v22  ;;  %1101 = vmatprep.mubr.bf16.mxu0 %v1419_v40  ;;  %v321_v30 = vsel %vm278_vm4, %v312_v19, %v320_v20  ;;  %v342_v40 = vrot.slane %v2181_v21, 3  ;;  %v1830_v21 = vld [vmem:[%s2376_s0 + $0x2c] ss:$0 sps:$4 sm:$0x33]  }
  0x45   :  { %1695 = vmatprep.subr.bf16.mxu0 %v1815_v32  ;;  %1159 = vmatmul.mubr.bf16.vlgmr.msra.gmra.mxu1 %v260_v51  ;;  %v216_v42 = vrot.slane %v214_v26, 4  ;;  %v347_v51 = vrot.slane %v2233_v2, 3  ;;  %v330_v54 = vsel %vm278_vm4, %v320_v20, %v329_v49  ;;  %v266_v59 = vrot.slane %v1830_v21, 2 }
  0x46   :  { %1725 = vmatpush3.bf16.msra.mxu1 %v1814_v22  ;;  %1166 = vmatprep.mubr.bf16.mxu1 %v304_v9  ;;  %v211_v22 = vshrl.u32 %v1417_v14, 16  ;;  %v345_v63 = vsel %vm155_vm1, %v342_v40, %v344_v62 }
  0x47   :  { %1718 = vmatprep.subr.bf16.mxu1 %v1815_v32  ;;  %v348_v57 = vsel %vm155_vm1, %v346_v53, %v347_v51  ;;  %v267_v61 = vsel %vm257_vm3, %v264_v36, %v266_v59 }
  0x48   :  { %1696 = vmatpush3.bf16.msra.mxu0 %v1815_v32  ;;  %v213_v41 = vrot.slane %v211_v22, 3 }
  0x49   :  { %1697 = vmatprep.subr.bf16.mxu0 %v2209_v48 }
  0x4a   :  { %1726 = vmatpush3.bf16.msra.mxu1 %v1815_v32  ;;  %v263_v32 = vrot.slane %v2228_v1, 2  ;;  %v217_v16 = vor.u32 %v216_v42, %v213_v41  ;;  %v350_v1 = vsel %vm155_vm1, %v347_v51, %v349_v0 }
  0x4b   :  { %1102 = vmatmul.mubr.bf16.gmra.mxu0 %v197_v10  ;;  %1719 = vmatprep.subr.bf16.mxu1 %v2209_v48 }
  0x4c   :  { %1698 = vmatpush3.bf16.msra.mxu0 %v2209_v48  ;;  %1109 = vmatprep.mubr.bf16.mxu0 %v1420_v4  ;;  %v265_v52 = vsel %vm257_vm3, %v263_v32, %v264_v36  ;;  %v218_v58 = vsel %vm176_vm5, %v2250_v12, %v217_v16 }
  0x4d   :  { %1699 = vmatprep.subr.bf16.mxu0 %v1821_v39  ;;  %1167 = vmatmul.mubr.bf16.gmra.mxu1 %v262_v17 }
  0x4e   :  { %1727 = vmatpush3.bf16.msra.mxu1 %v2209_v48  ;;  %1174 = vmatprep.mubr.bf16.mxu1 %v321_v30  ;;  %v1421_v48 = vcombine.low %v2068_v25, %v32_v23  ;;  %v343_v25 = vsel %vm155_vm1, %v341_v35, %v342_v40 }
  0x4f   :  { %1720 = vmatprep.subr.bf16.mxu1 %v1821_v39 }
  0x50   :  { %1700 = vmatpush3.bf16.msra.mxu0 %v1821_v39 }
  0x51   :  { %1701 = vmatprep.subr.bf16.mxu0 %v1825_v18 }
  0x52   :  { %1728 = vmatpush3.bf16.msra.mxu1 %v1821_v39 }
  0x53   :  { %1110 = vmatmul.mubr.bf16.gmra.mxu0 %v209_v31  ;;  %1721 = vmatprep.subr.bf16.mxu1 %v1825_v18 }
  0x54   :  { %1702 = vmatpush3.bf16.msra.mxu0 %v1825_v18  ;;  %1117 = vmatprep.mubr.bf16.mxu0 %v1421_v48 }
  0x55   :  { %1703 = vmatprep.subr.bf16.mxu0 %v1826_v44  ;;  %1175 = vmatmul.mubr.bf16.gmra.mxu1 %v265_v52 }
  0x56   :  { %1729 = vmatpush3.bf16.msra.mxu1 %v1825_v18  ;;  %1182 = vmatprep.mubr.bf16.mxu1 %v330_v54 }
  0x57   :  { %1722 = vmatprep.subr.bf16.mxu1 %v1826_v44 }
  0x58   :  { %1704 = vmatpush3.bf16.msra.mxu0 %v1826_v44 }
  0x59   :  { %1705 = vmatprep.subr.bf16.mxu0 %v1831_v56 }
  0x5a   :  { %1730 = vmatpush3.bf16.msra.mxu1 %v1826_v44 }
  0x5b   :  { %1118 = vmatmul.mubr.bf16.gmra.mxu0 %v218_v58  ;;  %1723 = vmatprep.subr.bf16.mxu1 %v1831_v56 }
  0x5c   :  { %1706 = vmatpush3.bf16.msra.mxu0 %v1831_v56  ;;  %1709 = vmatprep.mubr.bf16.mxu0 %v343_v25 }
  0x5d   :  { %1707 = vmatprep.subr.bf16.mxu0 %v1832_v60  ;;  %1183 = vmatmul.mubr.bf16.gmra.mxu1 %v267_v61 }
  0x5e   :  { %1731 = vmatpush3.bf16.msra.mxu1 %v1831_v56  ;;  %1713 = vmatprep.mubr.bf16.mxu1 %v348_v57 }
  0x5f   :  { %1724 = vmatprep.subr.bf16.mxu1 %v1832_v60 }
  0x60   :  { %1708 = vmatpush3.bf16.msra.mxu0 %v1832_v60 }
  0x62   :  { %1732 = vmatpush3.bf16.msra.mxu1 %v1832_v60 }
  0x63   :  { %1710 = vmatmul.mubr.bf16.vlgmr.msra.gmra.mxu0 %v345_v63 }
  0x65   :  { %1714 = vmatmul.mubr.bf16.vlgmr.msra.gmra.mxu1 %v350_v1 }
  0xe3   :  { %v1537_v46 = vpop.f32.mrf.mxu0 }
  0xe4   :  { %v1577_v2 = vpop.f32.mrf.mxu1 }
  0xe5   :  { %v1538_v29 = vpop.f32.mrf.mxu0 }
  0xe6   :  { %v1578_v55 = vpop.f32.mrf.mxu1  ;;  %v1539_v56 = vadd.f32 %v1538_v29, %v1537_v46 }
  0xe7   :  { %v2312_v4 = vpop.f32.mrf.mxu0  ;;  %v1579_v57 = vadd.f32 %v1578_v55, %v1577_v2 }
  0xe8   :  { %v2308_v3 = vpop.f32.mrf.mxu1  ;;  %2381 = vst [vmem:[#allocation4_spill] sm:$0xff] %v2312_v4 }
  0xe9   :  { %2379 = vst [vmem:[#allocation2_spill] sm:$0xff] %v2308_v3  ;;  %v2314_v5 = vpop.f32.mrf.mxu0 }
  0xea   :  { %v2310_v39 = vpop.f32.mrf.mxu1  ;;  %2382 = vst [vmem:[#allocation5_spill] sm:$0xff] %v2314_v5 }
  0xeb   :  { %2380 = vst [vmem:[#allocation3_spill] sm:$0xff] %v2310_v39  ;;  %v1543_v7 = vpop.f32.mrf.mxu0 }
  0xec   :  { %v1583_v6 = vpop.f32.mrf.mxu1 }
  0xed   :  { %v1544_v9 = vpop.f32.mrf.mxu0 }
  0xee   :  { %v1584_v8 = vpop.f32.mrf.mxu1  ;;  %v1545_v25 = vadd.f32 %v1544_v9, %v1543_v7 }
  0xef   :  { %v1546_v11 = vpop.f32.mrf.mxu0  ;;  %v1585_v54 = vadd.f32 %v1584_v8, %v1583_v6  ;;  %v2387_v29 = vld [vmem:[#allocation4_spill] sm:$0xff] }
  0xf0   :  { %v1586_v10 = vpop.f32.mrf.mxu1 }
  0xf1   :  { %v1547_v23 = vpop.f32.mrf.mxu0  ;;  %v1039_v0 = vadd.f32 %v1585_v54, %v1545_v25  ;;  %v2388_v8 = vld [vmem:[#allocation5_spill] sm:$0xff] }
  0xf2   :  { %v1587_v12 = vpop.f32.mrf.mxu1  ;;  %v1548_v1 = vadd.f32 %v1547_v23, %v1546_v11  ;;  %v1542_v9 = vadd.f32 %v2388_v8, %v2387_v29 }
  0xf3   :  { %v1549_v33 = vpop.f32.mrf.mxu0 }
  0xf4   :  { %v1589_v24 = vpop.f32.mrf.mxu1 }
  0xf5   :  { %v1550_v17 = vpop.f32.mrf.mxu0 }
  0xf6   :  { %v1590_v13 = vpop.f32.mrf.mxu1 }
  0xf7   :  { %v1552_v15 = vpop.f32.mrf.mxu0 }
  0xf8   :  { %v2316_v34 = vpop.f32.mrf.mxu1 }
  0xf9   :  { %2383 = vst [vmem:[#allocation6_spill] sm:$0xff] %v2316_v34  ;;  %v1553_v19 = vpop.f32.mrf.mxu0  ;;  %v1591_v34 = vadd.f32 %v1590_v13, %v1589_v24 }
  0xfa   :  { %v1593_v14 = vpop.f32.mrf.mxu1  ;;  %v1554_v23 = vadd.f32 %v1553_v19, %v1552_v15 }
  0xfb   :  { %v1555_v18 = vpop.f32.mrf.mxu0 }
  0xfc   :  { %v1595_v20 = vpop.f32.mrf.mxu1 }
  0xfd   :  { %v1556_v26 = vpop.f32.mrf.mxu0 }
  0xfe   :  { %v1596_v22 = vpop.f32.mrf.mxu1 }
  0xff   :  { %v2318_v27 = vpop.f32.mrf.mxu0 }
 0x100   :  { %2384 = vst [vmem:[#allocation7_spill] sm:$0xff] %v2318_v27  ;;  %v1598_v28 = vpop.f32.mrf.mxu1  ;;  %v1551_v27 = vadd.f32 %v1550_v17, %v1549_v33  ;;  %v2391_v24 = vld [vmem:[#allocation6_spill] sm:$0xff]  ;;  %v1597_v33 = vadd.f32 %v1596_v22, %v1595_v20 }
 0x101   :  { %v1559_v30 = vpop.f32.mrf.mxu0  ;;  %v1594_v13 = vadd.f32 %v1593_v14, %v2391_v24 }
 0x102   :  { %v1599_v32 = vpop.f32.mrf.mxu1 }
 0x103   :  { %v1617_v31 = vpop.f32.mrf.mxu0  ;;  %v1050_v14 = vadd.f32 %v1594_v13, %v1554_v23 }
 0x105   :  { %v1618_v36 = vpop.f32.mrf.mxu0  ;;  %v1657_v38 = vpop.f32.mrf.mxu1 }
 0x106   :  { %v1619_v61 = vadd.f32 %v1618_v36, %v1617_v31  ;;  %v2389_v31 = vld [vmem:[#allocation2_spill] sm:$0xff]  ;;  %v2390_v36 = vld [vmem:[#allocation3_spill] sm:$0xff] }
 0x107   :  { %v1620_v37 = vpop.f32.mrf.mxu0  ;;  %v1658_v42 = vpop.f32.mrf.mxu1 }
 0x108   :  { %v1659_v46 = vadd.f32 %v1658_v42, %v1657_v38 }
 0x109   :  { %v1621_v41 = vpop.f32.mrf.mxu0  ;;  %v2320_v43 = vpop.f32.mrf.mxu1 }
 0x10a   :  { %2385 = vst [vmem:[#allocation8_spill] sm:$0xff] %v2320_v43  ;;  %v1031_v43 = vadd.f32 %v1579_v57, %v1539_v56 }
 0x10b   :  { %v1623_v44 = vpop.f32.mrf.mxu0  ;;  %v2322_v45 = vpop.f32.mrf.mxu1 }
 0x10c   :  { %2386 = vst [vmem:[#allocation9_spill] sm:$0xff] %v2322_v45  ;;  %v1588_v45 = vadd.f32 %v1587_v12, %v1586_v10  ;;  %v1096_v6 = vadd.f32 %v1619_v61, %v1031_v43  ;;  %v1047_v12 = vadd.f32 %v1591_v34, %v1551_v27  ;;  %v1600_v43 = vadd.f32 %v1599_v32, %v1598_v28 }
 0x10d   :  { %v1624_v40 = vpop.f32.mrf.mxu0  ;;  %v1663_v47 = vpop.f32.mrf.mxu1 }
 0x10e   :  { %v1625_v60 = vadd.f32 %v1624_v40, %v1623_v44  ;;  %v1582_v44 = vadd.f32 %v2390_v36, %v2389_v31  ;;  %v1042_v11 = vadd.f32 %v1588_v45, %v1548_v1  ;;  %v1161_v57 = vadd.f32 %v1659_v46, %v1096_v6 }
 0x10f   :  { %v1626_v48 = vpop.f32.mrf.mxu0  ;;  %v1664_v49 = vpop.f32.mrf.mxu1 }
 0x110   :  { %v1104_v5 = vadd.f32 %v1625_v60, %v1039_v0  ;;  %v1665_v4 = vadd.f32 %v1664_v49, %v1663_v47  ;;  %v1557_v47 = vadd.f32 %v1556_v26, %v1555_v18  ;;  %v1034_v19 = vadd.f32 %v1582_v44, %v1542_v9 }
 0x111   :  { %v1627_v50 = vpop.f32.mrf.mxu0  ;;  %v1666_v51 = vpop.f32.mrf.mxu1 }
 0x112   :  { %v1628_v7 = vadd.f32 %v1627_v50, %v1626_v48  ;;  %v1169_v42 = vadd.f32 %v1665_v4, %v1104_v5  ;;  %v2392_v48 = vld [vmem:[#allocation7_spill] sm:$0xff]  ;;  %v1622_v50 = vadd.f32 %v1621_v41, %v1620_v37  ;;  %v1055_v5 = vadd.f32 %v1597_v33, %v1557_v47 }
 0x113   :  { %v1629_v35 = vpop.f32.mrf.mxu0  ;;  %v1667_v52 = vpop.f32.mrf.mxu1  ;;  %v1560_v49 = vadd.f32 %v1559_v30, %v2392_v48  ;;  %v1504_v48 = vld [vmem:[%s2377_s2] ss:$0 sm:$0xff] }
 0x114   :  { %v1107_v38 = vadd.f32 %v1628_v7, %v1042_v11  ;;  %v1668_v25 = vadd.f32 %v1667_v52, %v1666_v51  ;;  %v1099_v37 = vadd.f32 %v1622_v50, %v1034_v19 }
 0x115   :  { %v1630_v16 = vpop.f32.mrf.mxu0  ;;  %v1669_v21 = vpop.f32.mrf.mxu1  ;;  %v1058_v28 = vadd.f32 %v1600_v43, %v1560_v49 }
 0x116   :  { %v1631_v10 = vadd.f32 %v1630_v16, %v1629_v35  ;;  %v1172_v4 = vadd.f32 %v1668_v25, %v1107_v38  ;;  %v2393_v16 = vld [vmem:[#allocation8_spill] sm:$0xff] }
 0x117   :  { %v1632_v53 = vpop.f32.mrf.mxu0  ;;  %v1670_v58 = vpop.f32.mrf.mxu1 }
 0x118   :  { %v1112_v45 = vadd.f32 %v1631_v10, %v1047_v12  ;;  %v1671_v35 = vadd.f32 %v1670_v58, %v1669_v21  ;;  %v2394_v21 = vld [vmem:[#allocation9_spill] sm:$0xff] }
 0x119   :  { %v1633_v59 = vpop.f32.mrf.mxu0  ;;  %v1672_v62 = vpop.f32.mrf.mxu1 }
 0x11a   :  { %v1634_v34 = vadd.f32 %v1633_v59, %v1632_v53  ;;  %v1177_v51 = vadd.f32 %v1671_v35, %v1112_v45  ;;  %v1662_v53 = vadd.f32 %v2394_v21, %v2393_v16 }
 0x11b   :  { %v1635_v63 = vpop.f32.mrf.mxu0  ;;  %v1673_v39 = vpop.f32.mrf.mxu1 }
 0x11c   :  { %v1115_v41 = vadd.f32 %v1634_v34, %v1050_v14  ;;  %v1164_v6 = vadd.f32 %v1662_v53, %v1099_v37 }
 0x11d   :  { %v1636_v3 = vpop.f32.mrf.mxu0  ;;  %v1675_v2 = vpop.f32.mrf.mxu1 }
 0x11e   :  { %v1637_v27 = vadd.f32 %v1636_v3, %v1635_v63  ;;  %v1674_v3 = vadd.f32 %v1673_v39, %v1672_v62 }
 0x11f   :  { %v1638_v55 = vpop.f32.mrf.mxu0  ;;  %v1676_v17 = vpop.f32.mrf.mxu1 }
 0x120   :  { %v1120_v59 = vadd.f32 %v1637_v27, %v1055_v5  ;;  %v1677_v60 = vadd.f32 %v1676_v17, %v1675_v2  ;;  %v1180_v46 = vadd.f32 %v1674_v3, %v1115_v41 }
 0x121   :  { %v1639_v40 = vpop.f32.mrf.mxu0  ;;  %v1678_v54 = vpop.f32.mrf.mxu1 }
 0x122   :  { %v1640_v18 = vadd.f32 %v1639_v40, %v1638_v55  ;;  %v1185_v29 = vadd.f32 %v1677_v60, %v1120_v59 }
 0x123   :  { %v1711_v56 = vpop.f32.mrf.mxu0  ;;  %v1679_v20 = vpop.f32.mrf.mxu1 }
 0x124   :  { %v1234_v15 = vadd.f32 %v1711_v56, %v1169_v42  ;;  %v1123_v61 = vadd.f32 %v1640_v18, %v1058_v28  ;;  %v1680_v7 = vadd.f32 %v1679_v20, %v1678_v54 }
 0x125   :  { %v1225_v22 = vpop.f32.mrf.mxu0  ;;  %v1715_v30 = vpop.f32.mrf.mxu1 }
 0x126   :  { %v1226_v26 = vadd.f32 %v1225_v22, %v1161_v57  ;;  %1268 = vrot.lane.b32.xlu1 %v1234_v15, %s1835_s1  ;;  %v1188_v8 = vadd.f32 %v1680_v7, %v1123_v61  ;;  %v1250_v39 = vadd.f32 %v1715_v30, %v1185_v29 }
 0x127   :  { %v1712_v32 = vpop.f32.mrf.mxu0  ;;  %v1241_v58 = vpop.f32.mrf.mxu1 }
 0x128   :  { %v1237_v52 = vadd.f32 %v1712_v32, %v1172_v4  ;;  %1264 = vrot.lane.b32.xlu0 %v1226_v26, %s1835_s1  ;;  %v1242_v63 = vadd.f32 %v1241_v58, %v1177_v51 }
 0x129   :  { %v1716_v0 = vpop.f32.mrf.mxu1  ;;  %v1228_v1 = vpop.f32.mrf.mxu0 }
 0x12a   :  { %1270 = vrot.lane.b32.xlu1 %v1237_v52, %s1835_s1  ;;  %v1229_v9 = vadd.f32 %v1228_v1, %v1164_v6  ;;  %v1253_v62 = vadd.f32 %v1716_v0, %v1188_v8 }
 0x12b   :  { %v1244_v55 = vpop.f32.mrf.mxu1 }
 0x12c   :  { %1272 = vrot.lane.b32.xlu0 %v1242_v63, %s1835_s1  ;;  %v1245_v31 = vadd.f32 %v1244_v55, %v1180_v46 }
 0x12e   :  { %1274 = vrot.lane.b32.xlu1 %v1245_v31, %s1835_s1 }
 0x130   :  { %1266 = vrot.lane.b32.xlu0 %v1229_v9, %s1835_s1 }
 0x132   :  { %1278 = vrot.lane.b32.xlu1 %v1253_v62, %s1835_s1 }
 0x134   :  { %1276 = vrot.lane.b32.xlu0 %v1250_v39, %s1835_s1 }
 0x198   :  { %v1269_v2 = vpop.permute.xlu1 %1268 }
 0x199   :  { %v1290_v36 = vmax.f32 %v1234_v15, %v1269_v2 }
 0x19a   :  { %v1265_v44 = vpop.permute.xlu0 %1264 }
 0x19b   :  { %1308 = vrot.lane.b32.xlu0 %v1290_v36, %s1836_s26  ;;  %v1288_v10 = vmax.f32 %v1226_v26, %v1265_v44 }
 0x19c   :  { %v1271_v11 = vpop.permute.xlu1 %1270 }
 0x19d   :  { %v1291_v12 = vmax.f32 %v1237_v52, %v1271_v11 }
 0x19e   :  { %v1273_v23 = vpop.permute.xlu0 %1272 }
 0x19f   :  { %1310 = vrot.lane.b32.xlu1 %v1291_v12, %s1836_s26  ;;  %1304 = vrot.lane.b32.xlu0 %v1288_v10, %s1836_s26  ;;  %v1292_v24 = vmax.f32 %v1242_v63, %v1273_v23 }
 0x1a0   :  { %v1275_v13 = vpop.permute.xlu1 %1274 }
 0x1a1   :  { %v1293_v47 = vmax.f32 %v1245_v31, %v1275_v13 }
 0x1a2   :  { %v1267_v33 = vpop.permute.xlu0 %1266 }
 0x1a3   :  { %v1289_v17 = vmax.f32 %v1229_v9, %v1267_v33  ;;  %1312 = vrot.lane.b32.xlu0 %v1292_v24, %s1836_s26 }
 0x1a4   :  { %v1279_v38 = vpop.permute.xlu1 %1278 }
 0x1a5   :  { %1306 = vrot.lane.b32.xlu1 %v1289_v17, %s1836_s26  ;;  %v1295_v42 = vmax.f32 %v1253_v62, %v1279_v38 }
 0x1a6   :  { %v1277_v40 = vpop.permute.xlu0 %1276 }
 0x1a7   :  { %v1294_v43 = vmax.f32 %v1250_v39, %v1277_v40 }
 0x1a9   :  { %1314 = vrot.lane.b32.xlu1 %v1293_v47, %s1836_s26  ;;  %1316 = vrot.lane.b32.xlu0 %v1294_v43, %s1836_s26 }
 0x1ad   :  { %1318 = vrot.lane.b32.xlu1 %v1295_v42, %s1836_s26 }
 0x20d   :  { %v1309_v49 = vpop.permute.xlu0 %1308 }
 0x20e   :  { %v1330_v50 = vmax.f32 %v1290_v36, %v1309_v49 }
 0x210   :  { %v1345_v25 = vadd.f32 %v1504_v48, %v1330_v50 }
 0x211   :  { %v1311_v54 = vpop.permute.xlu1 %1310  ;;  %v1305_v56 = vpop.permute.xlu0 %1304 }
 0x212   :  { %v1353_v57 = vmax.f32 %v1345_v25, 0.0  ;;  %v1331_v45 = vmax.f32 %v1291_v12, %v1311_v54  ;;  %v1328_v35 = vmax.f32 %v1288_v10, %v1305_v56 }
 0x214   :  { %v1515_v34 = vpack.c.bf16 %v1353_v57, %v1353_v57  ;;  %v1346_v15 = vadd.f32 %v1504_v48, %v1331_v45  ;;  %v1343_v19 = vadd.f32 %v1504_v48, %v1328_v35 }
 0x215   :  { %v1313_v14 = vpop.permute.xlu0 %1312 }
 0x216   :  { %1394 = vst.msk [vmem:[%s2378_s3 + $0x8] sm:$0xf] %vm1391_vm6, %v1515_v34  ;;  %v1354_v20 = vmax.f32 %v1346_v15, 0.0  ;;  %v1351_v22 = vmax.f32 %v1343_v19, 0.0  ;;  %v1332_v27 = vmax.f32 %v1292_v24, %v1313_v14 }
 0x217   :  { %v1307_v18 = vpop.permute.xlu1 %1306 }
 0x218   :  { %v1516_v26 = vpack.c.bf16 %v1354_v20, %v1354_v20  ;;  %v1513_v4 = vpack.c.bf16 %v1351_v22, %v1351_v22  ;;  %v1347_v5 = vadd.f32 %v1504_v48, %v1332_v27  ;;  %v1329_v28 = vmax.f32 %v1289_v17, %v1307_v18 }
 0x21a   :  { %1395 = vst.msk [vmem:[%s2378_s3 + $0xc] sm:$0xf] %vm1391_vm6, %v1516_v26  ;;  %1392 = vst.msk [vmem:[%s2378_s3] sm:$0xf] %vm1391_vm6, %v1513_v4  ;;  %v1355_v30 = vmax.f32 %v1347_v5, 0.0  ;;  %v1344_v32 = vadd.f32 %v1504_v48, %v1329_v28 }
 0x21b   :  { %v1315_v37 = vpop.permute.xlu1 %1314  ;;  %v1317_v41 = vpop.permute.xlu0 %1316 }
 0x21c   :  { %v1517_v51 = vpack.c.bf16 %v1355_v30, %v1355_v30  ;;  %v1352_v52 = vmax.f32 %v1344_v32, 0.0  ;;  %v1333_v16 = vmax.f32 %v1293_v47, %v1315_v37  ;;  %v1334_v21 = vmax.f32 %v1294_v43, %v1317_v41 }
 0x21e   :  { %1396 = vst.msk [vmem:[%s2378_s3 + $0x10] sm:$0xf] %vm1391_vm6, %v1517_v51  ;;  %v1514_v53 = vpack.c.bf16 %v1352_v52, %v1352_v52  ;;  %v1348_v3 = vadd.f32 %v1504_v48, %v1333_v16  ;;  %v1349_v58 = vadd.f32 %v1504_v48, %v1334_v21 }
 0x21f   :  { %v1319_v59 = vpop.permute.xlu1 %1318 }
 0x220   :  { %1393 = vst.msk [vmem:[%s2378_s3 + $0x4] sm:$0xf] %vm1391_vm6, %v1514_v53  ;;  %v1356_v60 = vmax.f32 %v1348_v3, 0.0  ;;  %v1357_v61 = vmax.f32 %v1349_v58, 0.0  ;;  %v1335_v63 = vmax.f32 %v1295_v42, %v1319_v59 }
 0x222   :  { %v1518_v0 = vpack.c.bf16 %v1356_v60, %v1356_v60  ;;  %v1519_v1 = vpack.c.bf16 %v1357_v61, %v1357_v61  ;;  %v1350_v7 = vadd.f32 %v1504_v48, %v1335_v63 }
 0x224   :  { %1397 = vst.msk [vmem:[%s2378_s3 + $0x14] sm:$0xf] %vm1391_vm6, %v1518_v0  ;;  %1398 = vst.msk [vmem:[%s2378_s3 + $0x18] sm:$0xf] %vm1391_vm6, %v1519_v1  ;;  %v1358_v6 = vmax.f32 %v1350_v7, 0.0 }
 0x226   :  { %v1520_v46 = vpack.c.bf16 %v1358_v6, %v1358_v6 }
 0x228   :  { %1399 = vst.msk [vmem:[%s2378_s3 + $0x1c] sm:$0xf] %vm1391_vm6, %v1520_v46 }

// kernel: fmnistnet_forward.7
= control target key start
LH: loop header
LB: loop body
LE: loop exit
PB: predicated region body
PF: predicated region fallthrough
CT: control target
= control target key end

     0   :  { %v1309_v1 = vmov 0   ;;  %vm487_vm0 = vcmask 261120   ;;  %s1675_s1 = inlined_call_operand.vmem [shape: bf16[288,512], index: 1, kind: input, shape index: {}]   ;;  %s1676_s0 = inlined_call_operand.vmem [shape: bf16[8,288], index: 0, kind: input, shape index: {}]   ;;  %s1677_s3 = inlined_call_operand.vmem [shape: bf16[512,128], index: 3, kind: input, shape index: {}]   ;;  %s1678_s2 = inlined_call_operand.vmem [shape: f32[1,512], index: 2, kind: input, shape index: {}]   ;;  %s1679_s4 = inlined_call_operand.vmem [shape: f32[1,128], index: 4, kind: input, shape index: {}]   ;;  %s1680_s5 = inlined_call_operand.vmem [shape: f32[8,128], index: 5, kind: output, shape index: {}]  }
   0x1   :  { %v1166_v0 = vld [vmem:[%s1675_s1 + $0xe4] ss:$16 sps:$4 sm:$0xff]   ;;  %564 = vmatprep.mubr.bf16.mxu1 %v1309_v1  ;;  %v1170_v3 = vld [vmem:[%s1675_s1 + $0xe0] ss:$16 sps:$4 sm:$0xff]   ;;  %v1371_v10 = vld [vmem:[%s1676_s0 + $0x8] ss:$0 sps:$4 sm:$0xff]  }
   0x2   :  { %v1168_v2 = vld [vmem:[%s1675_s1 + $0x224] ss:$16 sps:$4 sm:$0xff]   ;;  %491 = vmatprep.subr.bf16.mxu0 %v1166_v0  ;;  %v1171_v4 = vld [vmem:[%s1675_s1 + $0x220] ss:$16 sps:$4 sm:$0xff]   ;;  %v1181_v11 = vld [vmem:[%s1675_s1 + $0xe8] ss:$16 sps:$4 sm:$0xff]  }
   0x3   :  { %544 = vmatprep.subr.bf16.mxu1 %v1168_v2  ;;  %v1172_v5 = vld [vmem:[%s1675_s1 + $0xc4] ss:$16 sps:$4 sm:$0xff]   ;;  %492 = vmatpush1.bf16.msra.mxu0 %v1170_v3  ;;  %v1176_v7 = vld [vmem:[%s1675_s1 + $0xc0] ss:$16 sps:$4 sm:$0xff]   ;;  %v1183_v12 = vld [vmem:[%s1675_s1 + $0xec] ss:$16 sps:$4 sm:$0xff]  }
   0x4   :  { %545 = vmatpush1.bf16.msra.mxu1 %v1171_v4  ;;  %v1174_v6 = vld [vmem:[%s1675_s1 + $0x204] ss:$16 sps:$4 sm:$0xff]   ;;  %493 = vmatprep.subr.bf16.mxu0 %v1172_v5  ;;  %v1177_v8 = vld [vmem:[%s1675_s1 + $0x200] ss:$16 sps:$4 sm:$0xff]   ;;  %v1189_v15 = vld [vmem:[%s1675_s1 + $0xcc] ss:$16 sps:$4 sm:$0xff]  }
   0x5   :  { %546 = vmatprep.subr.bf16.mxu1 %v1174_v6  ;;  %v1178_v9 = vld [vmem:[%s1675_s1 + $0xa4] ss:$16 sps:$4 sm:$0xff]   ;;  %v1184_v13 = vld [vmem:[%s1675_s1 + $0xa0] ss:$16 sps:$4 sm:$0xff]   ;;  %v1187_v16 = vld [vmem:[%s1675_s1 + $0xc8] ss:$16 sps:$4 sm:$0xff]  }
   0x6   :  { %v1185_v14 = vld [vmem:[%s1675_s1 + $0x84] ss:$16 sps:$4 sm:$0xff]   ;;  %v1190_v17 = vld [vmem:[%s1675_s1 + $0x80] ss:$16 sps:$4 sm:$0xff]   ;;  %v1195_v19 = vld [vmem:[%s1675_s1 + $0xac] ss:$16 sps:$4 sm:$0xff]  }
   0x7   :  { %494 = vmatpush1.bf16.msra.mxu0 %v1176_v7  ;;  %v1191_v18 = vld [vmem:[%s1675_s1 + $0x64] ss:$16 sps:$4 sm:$0xff]   ;;  %v1193_v20 = vld [vmem:[%s1675_s1 + $0xa8] ss:$16 sps:$4 sm:$0xff]   ;;  %v1196_v21 = vld [vmem:[%s1675_s1 + $0x60] ss:$16 sps:$4 sm:$0xff]  }
   0x8   :  { %547 = vmatpush1.bf16.msra.mxu1 %v1177_v8  ;;  %495 = vmatprep.subr.bf16.mxu0 %v1178_v9  ;;  %v1197_v22 = vld [vmem:[%s1675_s1 + $0x44] ss:$16 sps:$4 sm:$0xff]   ;;  %v1201_v23 = vld [vmem:[%s1675_s1 + $0x8c] ss:$16 sps:$4 sm:$0xff]   ;;  %v1199_v24 = vld [vmem:[%s1675_s1 + $0x88] ss:$16 sps:$4 sm:$0xff]  }
   0x9   :  { %573 = vmatprep.subr.bf16.mxu1 %v1183_v12  ;;  %v1202_v25 = vld [vmem:[%s1675_s1 + $0x40] ss:$16 sps:$4 sm:$0xff]   ;;  %v1203_v26 = vld [vmem:[%s1675_s1 + $0x24] ss:$16 sps:$4 sm:$0xff]   ;;  %v1207_v27 = vld [vmem:[%s1675_s1 + $0x6c] ss:$16 sps:$4 sm:$0xff]  }
   0xa   :  { %v1205_v28 = vld [vmem:[%s1675_s1 + $0x68] ss:$16 sps:$4 sm:$0xff]   ;;  %v1208_v29 = vld [vmem:[%s1675_s1 + $0x20] ss:$16 sps:$4 sm:$0xff]   ;;  %v1209_v30 = vld [vmem:[%s1675_s1 + $0x4] ss:$16 sps:$4 sm:$0xff]  }
   0xb   :  { %1086 = vmatmul.mubr.msk.bf16.vlgmr.msra.gmra.mxu1 %vm487_vm0, %v1371_v10  ;;  %496 = vmatpush1.bf16.msra.mxu0 %v1184_v13  ;;  %v1213_v31 = vld [vmem:[%s1675_s1 + $0x4c] ss:$16 sps:$4 sm:$0xff]   ;;  %v1211_v32 = vld [vmem:[%s1675_s1 + $0x48] ss:$16 sps:$4 sm:$0xff]   ;;  %v1214_v33 = vld [vmem:[%s1675_s1] ss:$16 sps:$4 sm:$0xff]  }
   0xc   :  { %574 = vmatpush1.bf16.msra.mxu1 %v1181_v11  ;;  %497 = vmatprep.subr.bf16.mxu0 %v1185_v14  ;;  %v1215_v34 = vld [vmem:[%s1675_s1 + $0x1e4] ss:$16 sps:$4 sm:$0xff]   ;;  %v1219_v35 = vld [vmem:[%s1675_s1 + $0x2c] ss:$16 sps:$4 sm:$0xff]   ;;  %v1217_v36 = vld [vmem:[%s1675_s1 + $0x28] ss:$16 sps:$4 sm:$0xff]  }
   0xd   :  { %575 = vmatprep.subr.bf16.mxu1 %v1189_v15  ;;  %v1220_v37 = vld [vmem:[%s1675_s1 + $0x1e0] ss:$16 sps:$4 sm:$0xff]   ;;  %v1221_v38 = vld [vmem:[%s1675_s1 + $0x1c4] ss:$16 sps:$4 sm:$0xff]   ;;  %v1225_v39 = vld [vmem:[%s1675_s1 + $0xc] ss:$16 sps:$4 sm:$0xff]  }
   0xe   :  { %v1223_v40 = vld [vmem:[%s1675_s1 + $0x8] ss:$16 sps:$4 sm:$0xff]   ;;  %v1226_v41 = vld [vmem:[%s1675_s1 + $0x1c0] ss:$16 sps:$4 sm:$0xff]   ;;  %v1227_v42 = vld [vmem:[%s1675_s1 + $0x1a4] ss:$16 sps:$4 sm:$0xff]  }
   0xf   :  { %498 = vmatpush1.bf16.msra.mxu0 %v1190_v17  ;;  %v1231_v43 = vld [vmem:[%s1675_s1 + $0x1ec] ss:$16 sps:$4 sm:$0xff]   ;;  %v1229_v44 = vld [vmem:[%s1675_s1 + $0x1e8] ss:$16 sps:$4 sm:$0xff]   ;;  %v1232_v45 = vld [vmem:[%s1675_s1 + $0x1a0] ss:$16 sps:$4 sm:$0xff]  }
  0x10   :  { %576 = vmatpush1.bf16.msra.mxu1 %v1187_v16  ;;  %499 = vmatprep.subr.bf16.mxu0 %v1191_v18  ;;  %v1233_v46 = vld [vmem:[%s1675_s1 + $0x184] ss:$16 sps:$4 sm:$0xff]   ;;  %v1237_v47 = vld [vmem:[%s1675_s1 + $0x1cc] ss:$16 sps:$4 sm:$0xff]   ;;  %v1235_v48 = vld [vmem:[%s1675_s1 + $0x1c8] ss:$16 sps:$4 sm:$0xff]  }
  0x11   :  { %577 = vmatprep.subr.bf16.mxu1 %v1195_v19  ;;  %v21_v49 = vld [vmem:[%s1676_s0] sm:$0xff]  ;;  %v1243_v53 = vld [vmem:[%s1675_s1 + $0x1ac] ss:$16 sps:$4 sm:$0xff]   ;;  %v1241_v54 = vld [vmem:[%s1675_s1 + $0x1a8] ss:$16 sps:$4 sm:$0xff]  }
  0x12   :  { %v1238_v50 = vld [vmem:[%s1675_s1 + $0x180] ss:$16 sps:$4 sm:$0xff]   ;;  %v1239_v51 = vld [vmem:[%s1675_s1 + $0x164] ss:$16 sps:$4 sm:$0xff]   ;;  %v1012_v52 = vcombine.high %v21_v49, %v21_v49  ;;  %v1249_v57 = vld [vmem:[%s1675_s1 + $0x18c] ss:$16 sps:$4 sm:$0xff]   ;;  %v1011_v7 = vcombine.low %v21_v49, %v21_v49  ;;  %v97_v49 = vlaneseq }
  0x13   :  { %500 = vmatpush1.bf16.msra.mxu0 %v1196_v21  ;;  %v1244_v55 = vld [vmem:[%s1675_s1 + $0x160] ss:$16 sps:$4 sm:$0xff]   ;;  %v1245_v56 = vld [vmem:[%s1675_s1 + $0x144] ss:$16 sps:$4 sm:$0xff]   ;;  %v1247_v58 = vld [vmem:[%s1675_s1 + $0x188] ss:$16 sps:$4 sm:$0xff]  }
  0x14   :  { %578 = vmatpush1.bf16.msra.mxu1 %v1193_v20  ;;  %501 = vmatprep.subr.bf16.mxu0 %v1197_v22  ;;  %v1250_v59 = vld [vmem:[%s1675_s1 + $0x140] ss:$16 sps:$4 sm:$0xff]   ;;  %v1251_v60 = vld [vmem:[%s1675_s1 + $0x124] ss:$16 sps:$4 sm:$0xff]   ;;  %v1255_v61 = vld [vmem:[%s1675_s1 + $0x16c] ss:$16 sps:$4 sm:$0xff]  }
  0x15   :  { %579 = vmatprep.subr.bf16.mxu1 %v1201_v23  ;;  %523 = vmatprep.mubr.bf16.mxu0 %v1012_v52  ;;  %v1253_v62 = vld [vmem:[%s1675_s1 + $0x168] ss:$16 sps:$4 sm:$0xff]   ;;  %v1256_v63 = vld [vmem:[%s1675_s1 + $0x120] ss:$16 sps:$4 sm:$0xff]   ;;  %v1257_v0 = vld [vmem:[%s1675_s1 + $0x104] ss:$16 sps:$4 sm:$0xff]  }
  0x16   :  { %605 = vmatprep.mubr.bf16.mxu1 %v1012_v52  ;;  %v1261_v2 = vld [vmem:[%s1675_s1 + $0x14c] ss:$16 sps:$4 sm:$0xff]   ;;  %v1259_v3 = vld [vmem:[%s1675_s1 + $0x148] ss:$16 sps:$4 sm:$0xff]   ;;  %v1262_v4 = vld [vmem:[%s1675_s1 + $0x100] ss:$16 sps:$4 sm:$0xff]  }
  0x17   :  { %502 = vmatpush1.bf16.msra.mxu0 %v1202_v25  ;;  %v1267_v5 = vld [vmem:[%s1675_s1 + $0x12c] ss:$16 sps:$4 sm:$0xff]   ;;  %v1265_v8 = vld [vmem:[%s1675_s1 + $0x128] ss:$16 sps:$4 sm:$0xff]   ;;  %v1279_v17 = vld [vmem:[%s1677_s3 + $0x70] sm:$0xff]  }
  0x18   :  { %580 = vmatpush1.bf16.msra.mxu1 %v1199_v24  ;;  %503 = vmatprep.subr.bf16.mxu0 %v1203_v26  ;;  %v1270_v6 = vld [vmem:[%s1675_s1 + $0x22c] ss:$16 sps:$4 sm:$0xff]   ;;  %v1268_v9 = vld [vmem:[%s1675_s1 + $0x228] ss:$16 sps:$4 sm:$0xff]   ;;  %v1285_v21 = vld [vmem:[%s1677_s3 + $0x60] sm:$0xff]  }
  0x19   :  { %581 = vmatprep.subr.bf16.mxu1 %v1207_v27  ;;  %v1273_v11 = vld [vmem:[%s1675_s1 + $0x10c] ss:$16 sps:$4 sm:$0xff]   ;;  %v1271_v13 = vld [vmem:[%s1675_s1 + $0x108] ss:$16 sps:$4 sm:$0xff]   ;;  %v1286_v22 = vld [vmem:[%s1677_s3 + $0xf0] sm:$0xff]  }
  0x1a   :  { %v1276_v12 = vld [vmem:[%s1675_s1 + $0x20c] ss:$16 sps:$4 sm:$0xff]   ;;  %v1274_v14 = vld [vmem:[%s1675_s1 + $0x208] ss:$16 sps:$4 sm:$0xff]   ;;  %v1287_v23 = vld [vmem:[%s1677_s3 + $0x20] sm:$0xff]  }
  0x1b   :  { %504 = vmatpush1.bf16.msra.mxu0 %v1208_v29  ;;  %v1277_v15 = vld [vmem:[%s1677_s3 + $0x78] sm:$0xff]   ;;  %v1283_v19 = vld [vmem:[%s1677_s3 + $0x28] sm:$0xff]   ;;  %v1288_v24 = vld [vmem:[%s1677_s3 + $0xb0] sm:$0xff]  }
  0x1c   :  { %582 = vmatpush1.bf16.msra.mxu1 %v1205_v28  ;;  %505 = vmatprep.subr.bf16.mxu0 %v1209_v30  ;;  %v1278_v16 = vld [vmem:[%s1677_s3 + $0x38] sm:$0xff]   ;;  %v1290_v26 = vld [vmem:[%s1677_s3 + $0xe8] sm:$0xff]   ;;  %v1293_v29 = vld [vmem:[%s1677_s3 + $0x50] sm:$0xff]  }
  0x1d   :  { %583 = vmatprep.subr.bf16.mxu1 %v1213_v31  ;;  %v1282_v18 = vld [vmem:[%s1677_s3 + $0xf8] sm:$0xff]   ;;  %v1292_v28 = vld [vmem:[%s1677_s3 + $0xa8] sm:$0xff]   ;;  %v1294_v30 = vld [vmem:[%s1677_s3 + $0xe0] sm:$0xff]  }
  0x1e   :  { %v1284_v20 = vld [vmem:[%s1677_s3 + $0xb8] sm:$0xff]   ;;  %v1295_v31 = vld [vmem:[%s1677_s3 + $0x10] sm:$0xff]   ;;  %v95_v52 = vld [vmem:[%s1678_s2] sm:$0xf] }
  0x1f   :  { %506 = vmatpush1.bf16.msra.mxu0 %v1214_v33  ;;  %v1289_v25 = vld [vmem:[%s1677_s3 + $0x58] sm:$0xff]   ;;  %v1297_v33 = vld [vmem:[%s1677_s3 + $0x48] sm:$0xff]  }
  0x20   :  { %584 = vmatpush1.bf16.msra.mxu1 %v1211_v32  ;;  %507 = vmatprep.subr.bf16.mxu0 %v1215_v34  ;;  %v1291_v27 = vld [vmem:[%s1677_s3 + $0x18] sm:$0xff]   ;;  %v1296_v32 = vld [vmem:[%s1677_s3 + $0xa0] sm:$0xff]  }
  0x21   :  { %585 = vmatprep.subr.bf16.mxu1 %v1219_v35  ;;  %v1298_v34 = vld [vmem:[%s1677_s3 + $0xd8] sm:$0xff]   ;;  %v1299_v35 = vld [vmem:[%s1677_s3 + $0x8] sm:$0xff]  }
  0x23   :  { %508 = vmatpush2.bf16.msra.mxu0 %v1220_v37  ;;  %v1301_v37 = vld [vmem:[%s1677_s3 + $0x40] sm:$0xff]  }
  0x24   :  { %586 = vmatpush1.bf16.msra.mxu1 %v1217_v36  ;;  %509 = vmatprep.subr.bf16.mxu0 %v1221_v38  ;;  %v1300_v36 = vld [vmem:[%s1677_s3 + $0x98] sm:$0xff]   ;;  %v1302_v38 = vld [vmem:[%s1677_s3 + $0xd0] sm:$0xff]  }
  0x25   :  { %587 = vmatprep.subr.bf16.mxu1 %v1225_v39  ;;  %v1303_v39 = vld [vmem:[%s1677_s3] sm:$0xff]  }
  0x27   :  { %510 = vmatpush2.bf16.msra.mxu0 %v1226_v41  ;;  %v1305_v41 = vld [vmem:[%s1677_s3 + $0xc8] sm:$0xff]  }
  0x28   :  { %588 = vmatpush1.bf16.msra.mxu1 %v1223_v40  ;;  %511 = vmatprep.subr.bf16.mxu0 %v1227_v42  ;;  %v1304_v40 = vld [vmem:[%s1677_s3 + $0x90] sm:$0xff]   ;;  %v1306_v42 = vld [vmem:[%s1677_s3 + $0x88] sm:$0xff]  }
  0x29   :  { %589 = vmatprep.subr.bf16.mxu1 %v1231_v43  ;;  %v1307_v43 = vld [vmem:[%s1677_s3 + $0xc0] sm:$0xff]  }
  0x2b   :  { %512 = vmatpush2.bf16.msra.mxu0 %v1232_v45 }
  0x2c   :  { %590 = vmatpush2.bf16.msra.mxu1 %v1229_v44  ;;  %513 = vmatprep.subr.bf16.mxu0 %v1233_v46  ;;  %v1308_v44 = vld [vmem:[%s1677_s3 + $0x80] sm:$0xff]  }
  0x2d   :  { %591 = vmatprep.subr.bf16.mxu1 %v1237_v47 }
  0x2f   :  { %514 = vmatpush2.bf16.msra.mxu0 %v1238_v50  ;;  %v98_v50 = vshrl.u32 %v97_v49, 7 }
  0x30   :  { %592 = vmatpush2.bf16.msra.mxu1 %v1235_v48  ;;  %515 = vmatprep.subr.bf16.mxu0 %v1239_v51 }
  0x31   :  { %593 = vmatprep.subr.bf16.mxu1 %v1243_v53  ;;  %v99_v51 = vsub.s32 0, %v98_v50  ;;  %v103_v53 = vsub.s32 1, %v98_v50 }
  0x33   :  { %516 = vmatpush2.bf16.msra.mxu0 %v1244_v55  ;;  %v104_v55 = vrot.slane %v95_v52, %v103_v53 }
  0x34   :  { %594 = vmatpush2.bf16.msra.mxu1 %v1241_v54  ;;  %517 = vmatprep.subr.bf16.mxu0 %v1245_v56  ;;  %v100_v54 = vrot.slane %v95_v52, %v99_v51 }
  0x35   :  { %595 = vmatprep.subr.bf16.mxu1 %v1249_v57 }
  0x37   :  { %518 = vmatpush2.bf16.msra.mxu0 %v1250_v59 }
  0x38   :  { %596 = vmatpush2.bf16.msra.mxu1 %v1247_v58  ;;  %519 = vmatprep.subr.bf16.mxu0 %v1251_v60  ;;  %v107_v58 = vsub.s32 2, %v98_v50 }
  0x39   :  { %597 = vmatprep.subr.bf16.mxu1 %v1255_v61 }
  0x3b   :  { %520 = vmatpush2.bf16.msra.mxu0 %v1256_v63 }
  0x3c   :  { %598 = vmatpush2.bf16.msra.mxu1 %v1253_v62  ;;  %521 = vmatprep.subr.bf16.mxu0 %v1257_v0  ;;  %v111_v62 = vsub.s32 3, %v98_v50 }
  0x3d   :  { %599 = vmatprep.subr.bf16.mxu1 %v1261_v2  ;;  %v108_v2 = vrot.slane %v95_v52, %v107_v58 }
  0x3f   :  { %522 = vmatpush2.bf16.msra.mxu0 %v1262_v4 }
  0x40   :  { %600 = vmatpush2.bf16.msra.mxu1 %v1259_v3  ;;  %626 = vmatprep.subr.bf16.mxu0 %v1270_v6  ;;  %v112_v6 = vrot.slane %v95_v52, %v111_v62 }
  0x41   :  { %601 = vmatprep.subr.bf16.mxu1 %v1267_v5 }
  0x42   :  { %524 = vmatmul.mubr.bf16.vlgmr.msra.gmra.mxu0 %v1011_v7 }
  0x43   :  { %627 = vmatpush1.bf16.msra.mxu0 %v1268_v9  ;;  %646 = vmatprep.mubr.bf16.mxu0 %v1309_v1  ;;  %v1280_v1 = vld [vmem:[%s1677_s3 + $0x30] sm:$0xff]  }
  0x44   :  { %602 = vmatpush2.bf16.msra.mxu1 %v1265_v8  ;;  %628 = vmatprep.subr.bf16.mxu0 %v1276_v12 }
  0x45   :  { %603 = vmatprep.subr.bf16.mxu1 %v1273_v11 }
  0x47   :  { %629 = vmatpush1.bf16.msra.mxu0 %v1274_v14 }
  0x48   :  { %604 = vmatpush2.bf16.msra.mxu1 %v1271_v13  ;;  %1121 = vmatprep.subr.bf16.mxu0 %v1277_v15 }
  0x49   :  { %1143 = vmatprep.subr.bf16.mxu1 %v1282_v18 }
  0x4a   :  { %1087 = vmatmul.mubr.msk.bf16.vlgmr.msra.gmra.mxu0 %vm487_vm0, %v1371_v10  ;;  %v1281_v10 = vld [vmem:[%s1677_s3 + $0x68] sm:$0xff]  }
  0x4b   :  { %606 = vmatmul.mubr.bf16.vlgmr.msra.gmra.mxu1 %v1011_v7  ;;  %1122 = vmatpush3.bf16.msra.mxu0 %v1278_v16 }
  0x4c   :  { %1123 = vmatprep.subr.bf16.mxu0 %v1279_v17  ;;  %1144 = vmatpush3.bf16.msra.mxu1 %v1284_v20 }
  0x4d   :  { %1145 = vmatprep.subr.bf16.mxu1 %v1286_v22 }
  0x4f   :  { %1124 = vmatpush3.bf16.msra.mxu0 %v1280_v1 }
  0x50   :  { %1125 = vmatprep.subr.bf16.mxu0 %v1281_v10  ;;  %1146 = vmatpush3.bf16.msra.mxu1 %v1288_v24 }
  0x51   :  { %1147 = vmatprep.subr.bf16.mxu1 %v1290_v26 }
  0x53   :  { %1126 = vmatpush3.bf16.msra.mxu0 %v1283_v19 }
  0x54   :  { %1127 = vmatprep.subr.bf16.mxu0 %v1285_v21  ;;  %1148 = vmatpush3.bf16.msra.mxu1 %v1292_v28 }
  0x55   :  { %1149 = vmatprep.subr.bf16.mxu1 %v1294_v30 }
  0x57   :  { %1128 = vmatpush3.bf16.msra.mxu0 %v1287_v23 }
  0x58   :  { %1129 = vmatprep.subr.bf16.mxu0 %v1289_v25  ;;  %1150 = vmatpush3.bf16.msra.mxu1 %v1296_v32 }
  0x59   :  { %1151 = vmatprep.subr.bf16.mxu1 %v1298_v34 }
  0x5b   :  { %1130 = vmatpush3.bf16.msra.mxu0 %v1291_v27 }
  0x5c   :  { %1131 = vmatprep.subr.bf16.mxu0 %v1293_v29  ;;  %1152 = vmatpush3.bf16.msra.mxu1 %v1300_v36  ;;  %v1088_v29 = vld [vmem:[%s1679_s4] ss:$0 sm:$0xff] }
  0x5d   :  { %1153 = vmatprep.subr.bf16.mxu1 %v1302_v38 }
  0x5f   :  { %1132 = vmatpush3.bf16.msra.mxu0 %v1295_v31 }
  0x60   :  { %1133 = vmatprep.subr.bf16.mxu0 %v1297_v33  ;;  %1154 = vmatpush3.bf16.msra.mxu1 %v1304_v40 }
  0x61   :  { %1155 = vmatprep.subr.bf16.mxu1 %v1305_v41 }
  0x63   :  { %1134 = vmatpush3.bf16.msra.mxu0 %v1299_v35 }
  0x64   :  { %1135 = vmatprep.subr.bf16.mxu0 %v1301_v37  ;;  %1156 = vmatpush3.bf16.msra.mxu1 %v1306_v42 }
  0x65   :  { %1157 = vmatprep.subr.bf16.mxu1 %v1307_v43 }
  0x67   :  { %1136 = vmatpush3.bf16.msra.mxu0 %v1303_v39 }
  0x68   :  { %1158 = vmatpush3.bf16.msra.mxu1 %v1308_v44 }
  0xcb   :  { %v566_v45 = vpop.f32.mrf.mxu1 }
  0xcd   :  { %v568_v46 = vpop.f32.mrf.mxu1 }
  0xcf   :  { %v570_v47 = vpop.f32.mrf.mxu1 }
  0xd1   :  { %v571_v48 = vpop.f32.mrf.mxu1 }
 0x102   :  { %v525_v56 = vpop.f32.mrf.mxu0 }
 0x103   :  { %v526_v57 = vadd.f32 %v525_v56, %v100_v54 }
 0x104   :  { %v527_v59 = vpop.f32.mrf.mxu0 }
 0x105   :  { %v567_v60 = vadd.f32 %v566_v45, %v526_v57  ;;  %v528_v61 = vadd.f32 %v527_v59, %v104_v55 }
 0x106   :  { %v529_v63 = vpop.f32.mrf.mxu0 }
 0x107   :  { %v569_v0 = vadd.f32 %v568_v46, %v528_v61  ;;  %v655_v3 = vmax.f32 %v567_v60, 0.0 }
 0x108   :  { %v530_v4 = vpop.f32.mrf.mxu0 }
 0x109   :  { %v656_v5 = vmax.f32 %v569_v0, 0.0  ;;  %v659_v12 = vpack.c.bf16 %v655_v3, %v655_v3 }
 0x10a   :  { %v648_v8 = vpop.f32.mrf.mxu0 }
 0x10b   :  { %v607_v7 = vpop.f32.mrf.mxu1  ;;  %v660_v9 = vpack.c.bf16 %v656_v5, %v656_v5 }
 0x10c   :  { %v608_v11 = vadd.f32 %v607_v7, %v108_v2  ;;  %v650_v14 = vpop.f32.mrf.mxu0 }
 0x10d   :  { %v609_v13 = vpop.f32.mrf.mxu1  ;;  %958 = vmatprep.mubr.bf16.mxu0 %v660_v9 }
 0x10e   :  { %v649_v15 = vadd.f32 %v648_v8, %v608_v11  ;;  %v610_v16 = vadd.f32 %v609_v13, %v112_v6  ;;  %v652_v1 = vpop.f32.mrf.mxu0  ;;  %959 = vmatmul.mubr.bf16.vlgmr.msra.gmra.mxu0 %v659_v12 }
 0x10f   :  { %v611_v17 = vpop.f32.mrf.mxu1 }
 0x110   :  { %v651_v10 = vadd.f32 %v650_v14, %v610_v16  ;;  %v657_v18 = vmax.f32 %v649_v15, 0.0  ;;  %v653_v20 = vpop.f32.mrf.mxu0 }
 0x111   :  { %v612_v19 = vpop.f32.mrf.mxu1 }
 0x112   :  { %v658_v21 = vmax.f32 %v651_v10, 0.0  ;;  %v661_v23 = vpack.c.bf16 %v657_v18, %v657_v18 }
 0x114   :  { %v662_v22 = vpack.c.bf16 %v658_v21, %v658_v21 }
 0x116   :  { %998 = vmatprep.mubr.bf16.mxu1 %v662_v22 }
 0x117   :  { %999 = vmatmul.mubr.bf16.vlgmr.msra.gmra.mxu1 %v661_v23 }
 0x1ce   :  { %v1137_v24 = vpop.f32.mrf.mxu0 }
 0x1d0   :  { %v1138_v25 = vpop.f32.mrf.mxu0 }
 0x1d1   :  { %v1139_v28 = vadd.f32 %v1138_v25, %v1137_v24 }
 0x1d2   :  { %v1140_v26 = vpop.f32.mrf.mxu0 }
 0x1d3   :  { %v961_v32 = vadd.f32 %v1139_v28, %v1088_v29 }
 0x1d4   :  { %v1141_v27 = vpop.f32.mrf.mxu0 }
 0x1d7   :  { %v1159_v30 = vpop.f32.mrf.mxu1 }
 0x1d9   :  { %v1160_v31 = vpop.f32.mrf.mxu1 }
 0x1da   :  { %v1161_v33 = vadd.f32 %v1160_v31, %v1159_v30 }
 0x1db   :  { %v1162_v34 = vpop.f32.mrf.mxu1 }
 0x1dc   :  { %v1001_v35 = vadd.f32 %v1161_v33, %v961_v32 }
 0x1dd   :  { %v1163_v36 = vpop.f32.mrf.mxu1 }
 0x1de   :  { %1006 = vst [vmem:[%s1680_s5] sm:$0xff] %v1001_v35 }

</bundles_post_ra>
